<compile_context>
chip_gen: v7x
topology: tpu7x:2x2x1
jax: 0.10.0
libtpu: 0.0.40
codegen_flags: <defaults>
</compile_context>

<pallas_src>
import math
import jax
import jax.numpy as jnp
from jax.experimental import pallas as pl
from jax.experimental.pallas import tpu as pltpu


# -----------------------------------------------------------------------------
# Config (tiny synthetic stand-in for flan-t5-large).
# -----------------------------------------------------------------------------
class Config:
    vocab = 64
    d_model = 32
    n_heads = 4
    d_kv = 8                      # inner dim = n_heads * d_kv = 32
    d_ff = 64
    rel_buckets = 8
    rel_max_dist = 16
    pad_id = 0
    decoder_start_id = 0
    ln_eps = 1e-6


_VMEM = pl.BlockSpec(memory_space=pltpu.MemorySpace.VMEM)


# -----------------------------------------------------------------------------
# In-kernel building blocks (all operate on values already resident in VMEM)
# -----------------------------------------------------------------------------
def _rmsnorm(x, ln, eps):
    """T5 LayerNorm (RMS, no mean subtraction, no bias). f32 math."""
    var = jnp.mean(x * x, axis=-1, keepdims=True)
    return x * jax.lax.rsqrt(var + eps) * ln


def _gated_gelu_ffn(cfg, x, ln, wi, wo):
    """RMSNorm -> (wi0|wi1) matmul -> gated tanh-GELU -> wo matmul -> residual."""
    ff = cfg.d_ff
    n = _rmsnorm(x, ln, cfg.ln_eps).astype(jnp.bfloat16)
    hcat = jnp.dot(n, wi, preferred_element_type=jnp.float32)       # (N, 2*ff)
    h0, h1 = hcat[:, :ff], hcat[:, ff:]
    # HF NewGELUActivation (tanh approximation), float32 on the VPU/EUP.
    g = 0.5 * h0 * (1.0 + jnp.tanh(0.7978845608028654 *
                                   (h0 + 0.044715 * h0 * h0 * h0)))
    gg = (g * h1).astype(jnp.bfloat16)
    return x + jnp.dot(gg, wo, preferred_element_type=jnp.float32)


def _attention(cfg, b, sq, sk, x, kv_bf16, ln, wq, wkv, wo, bias):
    """RMSNorm -> Q / (K|V) projections -> attention (additive bias, no
    1/sqrt(d) scaling, T5 style) -> single fused output projection -> residual.

    x       : (b*sq, d) f32 residual stream
    kv_bf16 : (b*sk, d) bf16 K/V source, or None => self-attention (use normed x)
    wq      : (d, inner) bf16;  wkv: (d, 2*inner) bf16;  wo: (inner, d) bf16
    bias    : (h, sq, sk) f32 or None (rel-pos [+ causal] bias, bcast over batch)
    """
    h, dk, d = cfg.n_heads, cfg.d_kv, cfg.d_model
    inner = h * dk

    n = _rmsnorm(x, ln, cfg.ln_eps).astype(jnp.bfloat16)
    kv_in = n if kv_bf16 is None else kv_bf16

    q = jnp.dot(n, wq, preferred_element_type=jnp.float32)          # (b*sq, inner)
    kvp = jnp.dot(kv_in, wkv, preferred_element_type=jnp.float32)   # (b*sk, 2*inner)
    k, v = kvp[:, :inner], kvp[:, inner:]

    ctx_heads = []
    # TODO(synk): at real flan-t5-large shapes collapse this static head loop
    # into a single (b*h)-batched dot_general (needs a head-major relayout);
    # at h=4/dk=8 the fused projections above already carry the MXU work and
    # the output projection below is a single matmul over all heads.
    for hh in range(h):
        sl = slice(hh * dk, (hh + 1) * dk)
        qh = q[:, sl].reshape(b, sq, dk)
        kh = k[:, sl].reshape(b, sk, dk)
        vh = v[:, sl].reshape(b, sk, dk)
        s = jnp.einsum('bqd,bkd->bqk', qh, kh,
                       preferred_element_type=jnp.float32)          # (b, sq, sk)
        if bias is not None:
            s = s + bias[hh]                                         # bcast over batch
        s = s - jnp.max(s, axis=-1, keepdims=True)
        p = jnp.exp(s)
        # approx reciprocal runs on the EUP slot; ~1e-3 deviation vs exact softmax.
        p = p * pl.reciprocal(jnp.sum(p, axis=-1, keepdims=True), approx=True)
        ctx_heads.append(
            jnp.einsum('bqk,bkd->bqd', p, vh,
                       preferred_element_type=jnp.float32).reshape(b * sq, dk))
    ctx = jnp.concatenate(ctx_heads, axis=-1).astype(jnp.bfloat16)   # (b*sq, inner)
    return x + jnp.dot(ctx, wo, preferred_element_type=jnp.float32)  # single out-proj


# -----------------------------------------------------------------------------
# The single fused forward kernel: encoder + decoder + lm_head + CE loss.
# -----------------------------------------------------------------------------
def _make_kernel(cfg, b, s_enc, s_dec):
    def kernel(enc_x_ref, dec_x_ref, enc_bias_ref, dec_bias_ref,
               lab_ref, val_ref, ln_ref,
               e_wq_ref, e_wkv_ref, e_wo_ref, e_wi_ref, e_wof_ref,
               d_sq_ref, d_skv_ref, d_so_ref,
               d_cq_ref, d_ckv_ref, d_co_ref, d_wi_ref, d_wof_ref,
               lm_ref, loss_ref):
        lns = ln_ref[...]                                            # (8, d) f32

        # ----------------------------- encoder ------------------------------
        ex = enc_x_ref[...].astype(jnp.float32)                      # (b*S, d)
        ex = _attention(cfg, b, s_enc, s_enc, ex, None, lns[0:1],
                        e_wq_ref[...], e_wkv_ref[...], e_wo_ref[...],
                        enc_bias_ref[...])
        ex = _gated_gelu_ffn(cfg, ex, lns[1:2], e_wi_ref[...], e_wof_ref[...])
        enc_out = _rmsnorm(ex, lns[2:3], cfg.ln_eps).astype(jnp.bfloat16)

        # ----------------------------- decoder ------------------------------
        dx = dec_x_ref[...].astype(jnp.float32)                      # (b*T, d)
        dx = _attention(cfg, b, s_dec, s_dec, dx, None, lns[3:4],
                        d_sq_ref[...], d_skv_ref[...], d_so_ref[...],
                        dec_bias_ref[...])
        # Cross-attention: K/V from the (already bf16) encoder output; HF T5
        # cross-attention has zero position bias and an all-ones mask here.
        dx = _attention(cfg, b, s_dec, s_enc, dx, enc_out, lns[4:5],
                        d_cq_ref[...], d_ckv_ref[...], d_co_ref[...], None)
        dx = _gated_gelu_ffn(cfg, dx, lns[5:6], d_wi_ref[...], d_wof_ref[...])
        dh = _rmsnorm(dx, lns[6:7], cfg.ln_eps).astype(jnp.bfloat16)

        # ------------------------- lm_head + CE loss -------------------------
        # TODO(synk): at vocab=32128 tile this over the vocab axis (last grid
        # axis, 'arbitrary') with an online max/sum and tile rows ('parallel')
        # so logits/lm_head never exceed v7x's 64 MiB VMEM.
        logits = jnp.dot(dh, lm_ref[...], preferred_element_type=jnp.float32)  # (b*T, V)
        labs = lab_ref[...]                                          # (b*T, 1) i32
        valid = val_ref[...]                                         # (b*T, 1) f32
        m = jnp.max(logits, axis=-1, keepdims=True)
        lse = m + jnp.log(jnp.sum(jnp.exp(logits - m), axis=-1, keepdims=True))
        onehot = jax.lax.broadcasted_iota(jnp.int32, logits.shape, 1) == labs
        tgt = jnp.sum(jnp.where(onehot, logits, 0.0), axis=-1, keepdims=True)
        nll = (lse - tgt) * valid                                    # (b*T, 1)
        total = jnp.sum(nll, axis=0, keepdims=True)                  # (1, 1)
        denom = jnp.maximum(jnp.sum(valid, axis=0, keepdims=True), 1.0)
        # mean over valid tokens == CrossEntropyLoss(ignore_index=-100);
        # an all-ignored batch yields 0 via the max(denom, 1) guard.
        loss_ref[...] = total / denom

    return kernel


def _cost_estimate(cfg, b, s, t):
    """Rough advisory CostEstimate for the fused kernel."""
    d, inner, ff, v = cfg.d_model, cfg.n_heads * cfg.d_kv, cfg.d_ff, cfg.vocab
    h, dk = cfg.n_heads, cfg.d_kv
    ns, nt = b * s, b * t

    def attn_fl(nq, nk, sq, sk):
        return (2 * nq * d * inner + 2 * nk * d * 2 * inner
                + 4 * b * h * sq * sk * dk + 2 * nq * inner * d)

    def ffn_fl(n):
        return 2 * n * d * 2 * ff + 2 * n * ff * d

    flops = (attn_fl(ns, ns, s, s) + ffn_fl(ns)
             + attn_fl(nt, nt, t, t) + attn_fl(nt, ns, t, s) + ffn_fl(nt)
             + 2 * nt * d * v)
    transcendentals = (b * h * (s * s + t * t + t * s)   # softmax exp
                       + ns * ff + nt * ff               # tanh-GELU
                       + nt * v)                          # CE exp
    w_bytes = 2 * (3 * d * inner + 3 * d * 2 * inner + 3 * inner * d
                   + 2 * d * 2 * ff + 2 * ff * d + d * v)
    act_bytes = (2 * (ns + nt) * d + 4 * h * (s * s + t * t)
                 + 8 * nt + 4 * 8 * d + 4)
    return pl.CostEstimate(flops=int(flops),
                           transcendentals=int(transcendentals),
                           bytes_accessed=int(w_bytes + act_bytes))


# -----------------------------------------------------------------------------
# Plain-JAX glue: T5 relative position buckets, shift-right, embedding gather.
# -----------------------------------------------------------------------------
def _relative_position_bucket(relative_position, bidirectional,
                              num_buckets, max_distance):
    relative_buckets = jnp.zeros_like(relative_position)
    if bidirectional:
        num_buckets //= 2
        relative_buckets += (relative_position > 0).astype(jnp.int32) * num_buckets
        relative_position = jnp.abs(relative_position)
    else:
        relative_position = -jnp.minimum(relative_position, 0)
    max_exact = num_buckets // 2
    is_small = relative_position < max_exact
    rp_f = jnp.maximum(relative_position, 1).astype(jnp.float32)
    rp_large = max_exact + (
        jnp.log(rp_f / max_exact) / math.log(max_distance / max_exact)
        * (num_buckets - max_exact)
    ).astype(jnp.int32)
    rp_large = jnp.minimum(rp_large, num_buckets - 1)
    relative_buckets += jnp.where(is_small, relative_position, rp_large)
    return relative_buckets


def relative_position_bias(rel_emb, q_len, k_len, bidirectional, cfg):
    ctx = jnp.arange(q_len, dtype=jnp.int32)[:, None]
    mem = jnp.arange(k_len, dtype=jnp.int32)[None, :]
    buckets = _relative_position_bucket(mem - ctx, bidirectional,
                                        cfg.rel_buckets, cfg.rel_max_dist)
    bias = rel_emb[buckets]                       # (q, k, H)
    return jnp.transpose(bias, (2, 0, 1))         # (H, q, k) — batch bcast in-kernel


def shift_right(labels, cfg):
    start = jnp.full((labels.shape[0], 1), cfg.decoder_start_id, labels.dtype)
    shifted = jnp.concatenate([start, labels[:, :-1]], axis=1)
    return jnp.where(shifted == -100, cfg.pad_id, shifted)


# -----------------------------------------------------------------------------
# Parameter init (deterministic, synthetic). Matmul weights + embedding bf16.
# -----------------------------------------------------------------------------
def init_params(key, cfg):
    keys = iter(jax.random.split(key, 32))
    d, inner, ff = cfg.d_model, cfg.n_heads * cfg.d_kv, cfg.d_ff

    def w(shape, scale=0.05, dtype=jnp.bfloat16):
        return (jax.random.normal(next(keys), shape, jnp.float32) * scale).astype(dtype)

    ones = lambda: jnp.ones((d,), jnp.float32)
    return {
        "shared": w((cfg.vocab, d), 1.0, jnp.bfloat16),   # bf16 embedding table
        "lm_head": w((d, cfg.vocab)),
        "enc": {
            "ln1": ones(), "wq": w((d, inner)), "wkv": w((d, 2 * inner)),
            "wo": w((inner, d)),
            "rel_bias": w((cfg.rel_buckets, cfg.n_heads), 0.05, jnp.float32),
            "ln2": ones(), "wi": w((d, 2 * ff)), "wo_ff": w((ff, d)),
            "ln_f": ones(),
        },
        "dec": {
            "ln1": ones(), "sq": w((d, inner)), "skv": w((d, 2 * inner)),
            "so": w((inner, d)),
            "rel_bias": w((cfg.rel_buckets, cfg.n_heads), 0.05, jnp.float32),
            "ln2": ones(), "cq": w((d, inner)), "ckv": w((d, 2 * inner)),
            "co": w((inner, d)),
            "ln3": ones(), "wi": w((d, 2 * ff)), "wo_ff": w((ff, d)),
            "ln_f": ones(),
        },
    }


# -----------------------------------------------------------------------------
# Forward (training/loss path of the original module)
# -----------------------------------------------------------------------------
def forward(params, cfg, source_input_ids, target_input_ids, inference_mode=0):
    if inference_mode == 1:
        # TODO(synk): autoregressive .generate() (greedy/beam decode loop with
        # KV cache) has no clean single-Pallas-kernel equivalent; only the
        # training/loss path is implemented.
        raise NotImplementedError("generate path not implemented")

    b, s_enc = source_input_ids.shape
    s_dec = target_input_ids.shape[1]
    d = cfg.d_model
    e, dp = params["enc"], params["dec"]

    dec_ids = shift_right(target_input_ids, cfg)
    enc_x = params["shared"][source_input_ids].reshape(b * s_enc, d)   # bf16
    dec_x = params["shared"][dec_ids].reshape(b * s_dec, d)            # bf16

    enc_bias = relative_position_bias(e["rel_bias"], s_enc, s_enc, True, cfg)
    rel = relative_position_bias(dp["rel_bias"], s_dec, s_dec, False, cfg)
    # Scores/bias stay f32 inside the kernel, so -1e9 is a safe additive mask.
    causal = jnp.where(jnp.arange(s_dec)[:, None] >= jnp.arange(s_dec)[None, :],
                       0.0, -1e9).astype(jnp.float32)
    dec_bias = rel + causal[None]

    labels = target_input_ids.reshape(b * s_dec, 1).astype(jnp.int32)
    valid = (labels != -100).astype(jnp.float32)     # single source of truth

    lns = jnp.stack([e["ln1"], e["ln2"], e["ln_f"],
                     dp["ln1"], dp["ln2"], dp["ln3"], dp["ln_f"],
                     jnp.zeros((d,), jnp.float32)], axis=0)            # (8, d)

    kernel = _make_kernel(cfg, b, s_enc, s_dec)
    out = pl.pallas_call(
        kernel,
        out_shape=jax.ShapeDtypeStruct((1, 1), jnp.float32),
        in_specs=[_VMEM] * 21,
        out_specs=_VMEM,
        compiler_params=pltpu.CompilerParams(vmem_limit_bytes=32 * 1024 * 1024),
        cost_estimate=_cost_estimate(cfg, b, s_enc, s_dec),
    )(enc_x, dec_x, enc_bias, dec_bias, labels, valid, lns,
      e["wq"], e["wkv"], e["wo"], e["wi"], e["wo_ff"],
      dp["sq"], dp["skv"], dp["so"], dp["cq"], dp["ckv"], dp["co"],
      dp["wi"], dp["wo_ff"], params["lm_head"])
    return out[0, 0]


# -----------------------------------------------------------------------------
if __name__ == "__main__":
    cfg = Config()
    key = jax.random.PRNGKey(0)
    pkey, skey, tkey = jax.random.split(key, 3)
    params = init_params(pkey, cfg)

    B, S, T = 2, 8, 8
    source_input_ids = jax.random.randint(skey, (B, S), 1, cfg.vocab,
                                          dtype=jnp.int32)
    target_input_ids = jax.random.randint(tkey, (B, T), 1, cfg.vocab,
                                          dtype=jnp.int32)

    run = jax.jit(lambda p, s, t: forward(p, cfg, s, t, inference_mode=0))
    loss = run(params, source_input_ids, target_input_ids)
    jax.block_until_ready(loss)
    assert loss.shape == () and bool(jnp.isfinite(loss))
    print("KERNEL_OK")
</pallas_src>

<mosaic_0001>
module attributes {stable_mosaic.version = 11 : i64} {
  func.func @kernel(%arg0: memref<16x32xbf16, #tpu.memory_space<vmem>>, %arg1: memref<16x32xbf16, #tpu.memory_space<vmem>>, %arg2: memref<4x8x8xf32, #tpu.memory_space<vmem>>, %arg3: memref<4x8x8xf32, #tpu.memory_space<vmem>>, %arg4: memref<16x1xi32, #tpu.memory_space<vmem>>, %arg5: memref<16x1xf32, #tpu.memory_space<vmem>>, %arg6: memref<8x32xf32, #tpu.memory_space<vmem>>, %arg7: memref<32x32xbf16, #tpu.memory_space<vmem>>, %arg8: memref<32x64xbf16, #tpu.memory_space<vmem>>, %arg9: memref<32x32xbf16, #tpu.memory_space<vmem>>, %arg10: memref<32x128xbf16, #tpu.memory_space<vmem>>, %arg11: memref<64x32xbf16, #tpu.memory_space<vmem>>, %arg12: memref<32x32xbf16, #tpu.memory_space<vmem>>, %arg13: memref<32x64xbf16, #tpu.memory_space<vmem>>, %arg14: memref<32x32xbf16, #tpu.memory_space<vmem>>, %arg15: memref<32x32xbf16, #tpu.memory_space<vmem>>, %arg16: memref<32x64xbf16, #tpu.memory_space<vmem>>, %arg17: memref<32x32xbf16, #tpu.memory_space<vmem>>, %arg18: memref<32x128xbf16, #tpu.memory_space<vmem>>, %arg19: memref<64x32xbf16, #tpu.memory_space<vmem>>, %arg20: memref<32x64xbf16, #tpu.memory_space<vmem>>, %arg21: memref<1x1xf32, #tpu.memory_space<vmem>>) attributes {dimension_semantics = [], scalar_prefetch = 0 : i64, scratch_operands = 0 : i64, tpu.core_type = #tpu.core_type<tc>} {
    %c0 = arith.constant 0 : index
    %c0_0 = arith.constant 0 : index
    %0 = vector.load %arg6[%c0, %c0_0] : memref<8x32xf32, #tpu.memory_space<vmem>>, vector<8x32xf32>
    %c0_1 = arith.constant 0 : index
    %c0_2 = arith.constant 0 : index
    %1 = vector.load %arg0[%c0_1, %c0_2] : memref<16x32xbf16, #tpu.memory_space<vmem>>, vector<16x32xbf16>
    %2 = arith.extf %1 : vector<16x32xbf16> to vector<16x32xf32>
    %3 = vector.extract_strided_slice %0 {offsets = [0, 0], sizes = [1, 32], strides = [1, 1]} : vector<8x32xf32> to vector<1x32xf32>
    %c0_3 = arith.constant 0 : index
    %c0_4 = arith.constant 0 : index
    %4 = vector.load %arg7[%c0_3, %c0_4] : memref<32x32xbf16, #tpu.memory_space<vmem>>, vector<32x32xbf16>
    %c0_5 = arith.constant 0 : index
    %c0_6 = arith.constant 0 : index
    %5 = vector.load %arg8[%c0_5, %c0_6] : memref<32x64xbf16, #tpu.memory_space<vmem>>, vector<32x64xbf16>
    %c0_7 = arith.constant 0 : index
    %c0_8 = arith.constant 0 : index
    %6 = vector.load %arg9[%c0_7, %c0_8] : memref<32x32xbf16, #tpu.memory_space<vmem>>, vector<32x32xbf16>
    %c0_9 = arith.constant 0 : index
    %c0_10 = arith.constant 0 : index
    %c0_11 = arith.constant 0 : index
    %7 = vector.load %arg2[%c0_9, %c0_10, %c0_11] : memref<4x8x8xf32, #tpu.memory_space<vmem>>, vector<4x8x8xf32>
    %8 = arith.mulf %2, %2 : vector<16x32xf32>
    %cst = arith.constant dense<0.000000e+00> : vector<16xf32>
    %9 = vector.multi_reduction <add>, %8, %cst [1] : vector<16x32xf32> to vector<16xf32>
    %10 = vector.shape_cast %9 : vector<16xf32> to vector<16x1xf32>
    %cst_12 = arith.constant 3.200000e+01 : f32
    %11 = vector.broadcast %cst_12 : f32 to vector<16x1xf32>
    %12 = arith.divf %10, %11 : vector<16x1xf32>
    %cst_13 = arith.constant 9.99999997E-7 : f32
    %13 = vector.broadcast %cst_13 : f32 to vector<16x1xf32>
    %14 = arith.addf %12, %13 : vector<16x1xf32>
    %15 = math.rsqrt %14 : vector<16x1xf32>
    %16 = vector.broadcast %15 : vector<16x1xf32> to vector<16x32xf32>
    %17 = arith.mulf %2, %16 : vector<16x32xf32>
    %18 = vector.broadcast %3 : vector<1x32xf32> to vector<16x32xf32>
    %19 = arith.mulf %17, %18 : vector<16x32xf32>
    %20 = arith.truncf %19 : vector<16x32xf32> to vector<16x32xbf16>
    %cst_14 = arith.constant dense<0.000000e+00> : vector<16x32xf32>
    %21 = tpu.matmul %20, %4, %cst_14 {dimension_numbers = #tpu.dot_dimension_numbers<[1], [0], [0], [1], [0, 0, 1, 1], [], []>} : vector<16x32xbf16>, vector<32x32xbf16>, vector<16x32xf32> -> vector<16x32xf32>
    %cst_15 = arith.constant dense<0.000000e+00> : vector<16x64xf32>
    %22 = tpu.matmul %20, %5, %cst_15 {dimension_numbers = #tpu.dot_dimension_numbers<[1], [0], [0], [1], [0, 0, 1, 1], [], []>} : vector<16x32xbf16>, vector<32x64xbf16>, vector<16x64xf32> -> vector<16x64xf32>
    %23 = vector.extract_strided_slice %22 {offsets = [0, 0], sizes = [16, 32], strides = [1, 1]} : vector<16x64xf32> to vector<16x32xf32>
    %24 = vector.extract_strided_slice %22 {offsets = [0, 32], sizes = [16, 32], strides = [1, 1]} : vector<16x64xf32> to vector<16x32xf32>
    %25 = vector.extract_strided_slice %21 {offsets = [0, 0], sizes = [16, 8], strides = [1, 1]} : vector<16x32xf32> to vector<16x8xf32>
    %26 = vector.shape_cast %25 : vector<16x8xf32> to vector<2x8x8xf32>
    %27 = vector.extract_strided_slice %23 {offsets = [0, 0], sizes = [16, 8], strides = [1, 1]} : vector<16x32xf32> to vector<16x8xf32>
    %28 = vector.shape_cast %27 : vector<16x8xf32> to vector<2x8x8xf32>
    %29 = vector.extract_strided_slice %24 {offsets = [0, 0], sizes = [16, 8], strides = [1, 1]} : vector<16x32xf32> to vector<16x8xf32>
    %30 = vector.shape_cast %29 : vector<16x8xf32> to vector<2x8x8xf32>
    "tpu.trace_start"() <{level = 10 : i32, message = "bqd,bkd->bqk"}> : () -> ()
    %cst_16 = arith.constant dense<0.000000e+00> : vector<2x8x8xf32>
    %31 = tpu.matmul %26, %28, %cst_16 {dimension_numbers = #tpu.dot_dimension_numbers<[2], [2], [1], [1], [0, 0, 0, 1, 1, 1], [0], [0]>} : vector<2x8x8xf32>, vector<2x8x8xf32>, vector<2x8x8xf32> -> vector<2x8x8xf32>
    "tpu.trace_stop"() : () -> ()
    %32 = vector.extract_strided_slice %7 {offsets = [0, 0, 0], sizes = [1, 8, 8], strides = [1, 1, 1]} : vector<4x8x8xf32> to vector<1x8x8xf32>
    %33 = vector.shape_cast %32 : vector<1x8x8xf32> to vector<8x8xf32>
    %34 = vector.shape_cast %33 : vector<8x8xf32> to vector<1x8x8xf32>
    %35 = vector.broadcast %34 : vector<1x8x8xf32> to vector<2x8x8xf32>
    %36 = arith.addf %31, %35 : vector<2x8x8xf32>
    %cst_17 = arith.constant dense<0xFF800000> : vector<2x8xf32>
    %37 = vector.multi_reduction <maximumf>, %36, %cst_17 [2] : vector<2x8x8xf32> to vector<2x8xf32>
    %38 = vector.shape_cast %37 : vector<2x8xf32> to vector<2x8x1xf32>
    %39 = vector.broadcast %38 : vector<2x8x1xf32> to vector<2x8x8xf32>
    %40 = arith.subf %36, %39 : vector<2x8x8xf32>
    %41 = math.exp %40 : vector<2x8x8xf32>
    %cst_18 = arith.constant dense<0.000000e+00> : vector<2x8xf32>
    %42 = vector.multi_reduction <add>, %41, %cst_18 [2] : vector<2x8x8xf32> to vector<2x8xf32>
    %43 = vector.shape_cast %42 : vector<2x8xf32> to vector<2x8x1xf32>
    %44 = tpu.reciprocal %43 {approx = true} : vector<2x8x1xf32> -> vector<2x8x1xf32>
    %45 = vector.broadcast %44 : vector<2x8x1xf32> to vector<2x8x8xf32>
    %46 = arith.mulf %41, %45 : vector<2x8x8xf32>
    "tpu.trace_start"() <{level = 10 : i32, message = "bqk,bkd->bqd"}> : () -> ()
    %cst_19 = arith.constant dense<0.000000e+00> : vector<2x8x8xf32>
    %47 = tpu.matmul %46, %30, %cst_19 {dimension_numbers = #tpu.dot_dimension_numbers<[2], [1], [1], [2], [0, 0, 0, 1, 1, 2], [0], [0]>} : vector<2x8x8xf32>, vector<2x8x8xf32>, vector<2x8x8xf32> -> vector<2x8x8xf32>
    "tpu.trace_stop"() : () -> ()
    %48 = vector.shape_cast %47 : vector<2x8x8xf32> to vector<16x8xf32>
    %49 = vector.extract_strided_slice %21 {offsets = [0, 8], sizes = [16, 8], strides = [1, 1]} : vector<16x32xf32> to vector<16x8xf32>
    %50 = vector.shape_cast %49 : vector<16x8xf32> to vector<2x8x8xf32>
    %51 = vector.extract_strided_slice %23 {offsets = [0, 8], sizes = [16, 8], strides = [1, 1]} : vector<16x32xf32> to vector<16x8xf32>
    %52 = vector.shape_cast %51 : vector<16x8xf32> to vector<2x8x8xf32>
    %53 = vector.extract_strided_slice %24 {offsets = [0, 8], sizes = [16, 8], strides = [1, 1]} : vector<16x32xf32> to vector<16x8xf32>
    %54 = vector.shape_cast %53 : vector<16x8xf32> to vector<2x8x8xf32>
    "tpu.trace_start"() <{level = 10 : i32, message = "bqd,bkd->bqk"}> : () -> ()
    %cst_20 = arith.constant dense<0.000000e+00> : vector<2x8x8xf32>
    %55 = tpu.matmul %50, %52, %cst_20 {dimension_numbers = #tpu.dot_dimension_numbers<[2], [2], [1], [1], [0, 0, 0, 1, 1, 1], [0], [0]>} : vector<2x8x8xf32>, vector<2x8x8xf32>, vector<2x8x8xf32> -> vector<2x8x8xf32>
    "tpu.trace_stop"() : () -> ()
    %56 = vector.extract_strided_slice %7 {offsets = [1, 0, 0], sizes = [1, 8, 8], strides = [1, 1, 1]} : vector<4x8x8xf32> to vector<1x8x8xf32>
    %57 = vector.shape_cast %56 : vector<1x8x8xf32> to vector<8x8xf32>
    %58 = vector.shape_cast %57 : vector<8x8xf32> to vector<1x8x8xf32>
    %59 = vector.broadcast %58 : vector<1x8x8xf32> to vector<2x8x8xf32>
    %60 = arith.addf %55, %59 : vector<2x8x8xf32>
    %cst_21 = arith.constant dense<0xFF800000> : vector<2x8xf32>
    %61 = vector.multi_reduction <maximumf>, %60, %cst_21 [2] : vector<2x8x8xf32> to vector<2x8xf32>
    %62 = vector.shape_cast %61 : vector<2x8xf32> to vector<2x8x1xf32>
    %63 = vector.broadcast %62 : vector<2x8x1xf32> to vector<2x8x8xf32>
    %64 = arith.subf %60, %63 : vector<2x8x8xf32>
    %65 = math.exp %64 : vector<2x8x8xf32>
    %cst_22 = arith.constant dense<0.000000e+00> : vector<2x8xf32>
    %66 = vector.multi_reduction <add>, %65, %cst_22 [2] : vector<2x8x8xf32> to vector<2x8xf32>
    %67 = vector.shape_cast %66 : vector<2x8xf32> to vector<2x8x1xf32>
    %68 = tpu.reciprocal %67 {approx = true} : vector<2x8x1xf32> -> vector<2x8x1xf32>
    %69 = vector.broadcast %68 : vector<2x8x1xf32> to vector<2x8x8xf32>
    %70 = arith.mulf %65, %69 : vector<2x8x8xf32>
    "tpu.trace_start"() <{level = 10 : i32, message = "bqk,bkd->bqd"}> : () -> ()
    %cst_23 = arith.constant dense<0.000000e+00> : vector<2x8x8xf32>
    %71 = tpu.matmul %70, %54, %cst_23 {dimension_numbers = #tpu.dot_dimension_numbers<[2], [1], [1], [2], [0, 0, 0, 1, 1, 2], [0], [0]>} : vector<2x8x8xf32>, vector<2x8x8xf32>, vector<2x8x8xf32> -> vector<2x8x8xf32>
    "tpu.trace_stop"() : () -> ()
    %72 = vector.shape_cast %71 : vector<2x8x8xf32> to vector<16x8xf32>
    %73 = vector.extract_strided_slice %21 {offsets = [0, 16], sizes = [16, 8], strides = [1, 1]} : vector<16x32xf32> to vector<16x8xf32>
    %74 = vector.shape_cast %73 : vector<16x8xf32> to vector<2x8x8xf32>
    %75 = vector.extract_strided_slice %23 {offsets = [0, 16], sizes = [16, 8], strides = [1, 1]} : vector<16x32xf32> to vector<16x8xf32>
    %76 = vector.shape_cast %75 : vector<16x8xf32> to vector<2x8x8xf32>
    %77 = vector.extract_strided_slice %24 {offsets = [0, 16], sizes = [16, 8], strides = [1, 1]} : vector<16x32xf32> to vector<16x8xf32>
    %78 = vector.shape_cast %77 : vector<16x8xf32> to vector<2x8x8xf32>
    "tpu.trace_start"() <{level = 10 : i32, message = "bqd,bkd->bqk"}> : () -> ()
    %cst_24 = arith.constant dense<0.000000e+00> : vector<2x8x8xf32>
    %79 = tpu.matmul %74, %76, %cst_24 {dimension_numbers = #tpu.dot_dimension_numbers<[2], [2], [1], [1], [0, 0, 0, 1, 1, 1], [0], [0]>} : vector<2x8x8xf32>, vector<2x8x8xf32>, vector<2x8x8xf32> -> vector<2x8x8xf32>
    "tpu.trace_stop"() : () -> ()
    %80 = vector.extract_strided_slice %7 {offsets = [2, 0, 0], sizes = [1, 8, 8], strides = [1, 1, 1]} : vector<4x8x8xf32> to vector<1x8x8xf32>
    %81 = vector.shape_cast %80 : vector<1x8x8xf32> to vector<8x8xf32>
    %82 = vector.shape_cast %81 : vector<8x8xf32> to vector<1x8x8xf32>
    %83 = vector.broadcast %82 : vector<1x8x8xf32> to vector<2x8x8xf32>
    %84 = arith.addf %79, %83 : vector<2x8x8xf32>
    %cst_25 = arith.constant dense<0xFF800000> : vector<2x8xf32>
    %85 = vector.multi_reduction <maximumf>, %84, %cst_25 [2] : vector<2x8x8xf32> to vector<2x8xf32>
    %86 = vector.shape_cast %85 : vector<2x8xf32> to vector<2x8x1xf32>
    %87 = vector.broadcast %86 : vector<2x8x1xf32> to vector<2x8x8xf32>
    %88 = arith.subf %84, %87 : vector<2x8x8xf32>
    %89 = math.exp %88 : vector<2x8x8xf32>
    %cst_26 = arith.constant dense<0.000000e+00> : vector<2x8xf32>
    %90 = vector.multi_reduction <add>, %89, %cst_26 [2] : vector<2x8x8xf32> to vector<2x8xf32>
    %91 = vector.shape_cast %90 : vector<2x8xf32> to vector<2x8x1xf32>
    %92 = tpu.reciprocal %91 {approx = true} : vector<2x8x1xf32> -> vector<2x8x1xf32>
    %93 = vector.broadcast %92 : vector<2x8x1xf32> to vector<2x8x8xf32>
    %94 = arith.mulf %89, %93 : vector<2x8x8xf32>
    "tpu.trace_start"() <{level = 10 : i32, message = "bqk,bkd->bqd"}> : () -> ()
    %cst_27 = arith.constant dense<0.000000e+00> : vector<2x8x8xf32>
    %95 = tpu.matmul %94, %78, %cst_27 {dimension_numbers = #tpu.dot_dimension_numbers<[2], [1], [1], [2], [0, 0, 0, 1, 1, 2], [0], [0]>} : vector<2x8x8xf32>, vector<2x8x8xf32>, vector<2x8x8xf32> -> vector<2x8x8xf32>
    "tpu.trace_stop"() : () -> ()
    %96 = vector.shape_cast %95 : vector<2x8x8xf32> to vector<16x8xf32>
    %97 = vector.extract_strided_slice %21 {offsets = [0, 24], sizes = [16, 8], strides = [1, 1]} : vector<16x32xf32> to vector<16x8xf32>
    %98 = vector.shape_cast %97 : vector<16x8xf32> to vector<2x8x8xf32>
    %99 = vector.extract_strided_slice %23 {offsets = [0, 24], sizes = [16, 8], strides = [1, 1]} : vector<16x32xf32> to vector<16x8xf32>
    %100 = vector.shape_cast %99 : vector<16x8xf32> to vector<2x8x8xf32>
    %101 = vector.extract_strided_slice %24 {offsets = [0, 24], sizes = [16, 8], strides = [1, 1]} : vector<16x32xf32> to vector<16x8xf32>
    %102 = vector.shape_cast %101 : vector<16x8xf32> to vector<2x8x8xf32>
    "tpu.trace_start"() <{level = 10 : i32, message = "bqd,bkd->bqk"}> : () -> ()
    %cst_28 = arith.constant dense<0.000000e+00> : vector<2x8x8xf32>
    %103 = tpu.matmul %98, %100, %cst_28 {dimension_numbers = #tpu.dot_dimension_numbers<[2], [2], [1], [1], [0, 0, 0, 1, 1, 1], [0], [0]>} : vector<2x8x8xf32>, vector<2x8x8xf32>, vector<2x8x8xf32> -> vector<2x8x8xf32>
    "tpu.trace_stop"() : () -> ()
    %104 = vector.extract_strided_slice %7 {offsets = [3, 0, 0], sizes = [1, 8, 8], strides = [1, 1, 1]} : vector<4x8x8xf32> to vector<1x8x8xf32>
    %105 = vector.shape_cast %104 : vector<1x8x8xf32> to vector<8x8xf32>
    %106 = vector.shape_cast %105 : vector<8x8xf32> to vector<1x8x8xf32>
    %107 = vector.broadcast %106 : vector<1x8x8xf32> to vector<2x8x8xf32>
    %108 = arith.addf %103, %107 : vector<2x8x8xf32>
    %cst_29 = arith.constant dense<0xFF800000> : vector<2x8xf32>
    %109 = vector.multi_reduction <maximumf>, %108, %cst_29 [2] : vector<2x8x8xf32> to vector<2x8xf32>
    %110 = vector.shape_cast %109 : vector<2x8xf32> to vector<2x8x1xf32>
    %111 = vector.broadcast %110 : vector<2x8x1xf32> to vector<2x8x8xf32>
    %112 = arith.subf %108, %111 : vector<2x8x8xf32>
    %113 = math.exp %112 : vector<2x8x8xf32>
    %cst_30 = arith.constant dense<0.000000e+00> : vector<2x8xf32>
    %114 = vector.multi_reduction <add>, %113, %cst_30 [2] : vector<2x8x8xf32> to vector<2x8xf32>
    %115 = vector.shape_cast %114 : vector<2x8xf32> to vector<2x8x1xf32>
    %116 = tpu.reciprocal %115 {approx = true} : vector<2x8x1xf32> -> vector<2x8x1xf32>
    %117 = vector.broadcast %116 : vector<2x8x1xf32> to vector<2x8x8xf32>
    %118 = arith.mulf %113, %117 : vector<2x8x8xf32>
    "tpu.trace_start"() <{level = 10 : i32, message = "bqk,bkd->bqd"}> : () -> ()
    %cst_31 = arith.constant dense<0.000000e+00> : vector<2x8x8xf32>
    %119 = tpu.matmul %118, %102, %cst_31 {dimension_numbers = #tpu.dot_dimension_numbers<[2], [1], [1], [2], [0, 0, 0, 1, 1, 2], [0], [0]>} : vector<2x8x8xf32>, vector<2x8x8xf32>, vector<2x8x8xf32> -> vector<2x8x8xf32>
    "tpu.trace_stop"() : () -> ()
    %120 = vector.shape_cast %119 : vector<2x8x8xf32> to vector<16x8xf32>
    %121 = tpu.concatenate %48, %72, %96, %120 in 1 : vector<16x8xf32>, vector<16x8xf32>, vector<16x8xf32>, vector<16x8xf32> -> vector<16x32xf32>
    %122 = arith.truncf %121 : vector<16x32xf32> to vector<16x32xbf16>
    %cst_32 = arith.constant dense<0.000000e+00> : vector<16x32xf32>
    %123 = tpu.matmul %122, %6, %cst_32 {dimension_numbers = #tpu.dot_dimension_numbers<[1], [0], [0], [1], [0, 0, 1, 1], [], []>} : vector<16x32xbf16>, vector<32x32xbf16>, vector<16x32xf32> -> vector<16x32xf32>
    %124 = arith.addf %2, %123 : vector<16x32xf32>
    %125 = vector.extract_strided_slice %0 {offsets = [1, 0], sizes = [1, 32], strides = [1, 1]} : vector<8x32xf32> to vector<1x32xf32>
    %c0_33 = arith.constant 0 : index
    %c0_34 = arith.constant 0 : index
    %126 = vector.load %arg10[%c0_33, %c0_34] : memref<32x128xbf16, #tpu.memory_space<vmem>>, vector<32x128xbf16>
    %c0_35 = arith.constant 0 : index
    %c0_36 = arith.constant 0 : index
    %127 = vector.load %arg11[%c0_35, %c0_36] : memref<64x32xbf16, #tpu.memory_space<vmem>>, vector<64x32xbf16>
    %128 = arith.mulf %124, %124 : vector<16x32xf32>
    %cst_37 = arith.constant dense<0.000000e+00> : vector<16xf32>
    %129 = vector.multi_reduction <add>, %128, %cst_37 [1] : vector<16x32xf32> to vector<16xf32>
    %130 = vector.shape_cast %129 : vector<16xf32> to vector<16x1xf32>
    %cst_38 = arith.constant 3.200000e+01 : f32
    %131 = vector.broadcast %cst_38 : f32 to vector<16x1xf32>
    %132 = arith.divf %130, %131 : vector<16x1xf32>
    %cst_39 = arith.constant 9.99999997E-7 : f32
    %133 = vector.broadcast %cst_39 : f32 to vector<16x1xf32>
    %134 = arith.addf %132, %133 : vector<16x1xf32>
    %135 = math.rsqrt %134 : vector<16x1xf32>
    %136 = vector.broadcast %135 : vector<16x1xf32> to vector<16x32xf32>
    %137 = arith.mulf %124, %136 : vector<16x32xf32>
    %138 = vector.broadcast %125 : vector<1x32xf32> to vector<16x32xf32>
    %139 = arith.mulf %137, %138 : vector<16x32xf32>
    %140 = arith.truncf %139 : vector<16x32xf32> to vector<16x32xbf16>
    %cst_40 = arith.constant dense<0.000000e+00> : vector<16x128xf32>
    %141 = tpu.matmul %140, %126, %cst_40 {dimension_numbers = #tpu.dot_dimension_numbers<[1], [0], [0], [1], [0, 0, 1, 1], [], []>} : vector<16x32xbf16>, vector<32x128xbf16>, vector<16x128xf32> -> vector<16x128xf32>
    %142 = vector.extract_strided_slice %141 {offsets = [0, 0], sizes = [16, 64], strides = [1, 1]} : vector<16x128xf32> to vector<16x64xf32>
    %143 = vector.extract_strided_slice %141 {offsets = [0, 64], sizes = [16, 64], strides = [1, 1]} : vector<16x128xf32> to vector<16x64xf32>
    %cst_41 = arith.constant 5.000000e-01 : f32
    %144 = vector.broadcast %cst_41 : f32 to vector<16x64xf32>
    %145 = arith.mulf %144, %142 : vector<16x64xf32>
    %cst_42 = arith.constant 4.471500e-02 : f32
    %146 = vector.broadcast %cst_42 : f32 to vector<16x64xf32>
    %147 = arith.mulf %146, %142 : vector<16x64xf32>
    %148 = arith.mulf %147, %142 : vector<16x64xf32>
    %149 = arith.mulf %148, %142 : vector<16x64xf32>
    %150 = arith.addf %142, %149 : vector<16x64xf32>
    %cst_43 = arith.constant 0.797884583 : f32
    %151 = vector.broadcast %cst_43 : f32 to vector<16x64xf32>
    %152 = arith.mulf %151, %150 : vector<16x64xf32>
    %153 = math.tanh %152 : vector<16x64xf32>
    %cst_44 = arith.constant 1.000000e+00 : f32
    %154 = vector.broadcast %cst_44 : f32 to vector<16x64xf32>
    %155 = arith.addf %154, %153 : vector<16x64xf32>
    %156 = arith.mulf %145, %155 : vector<16x64xf32>
    %157 = arith.mulf %156, %143 : vector<16x64xf32>
    %158 = arith.truncf %157 : vector<16x64xf32> to vector<16x64xbf16>
    %cst_45 = arith.constant dense<0.000000e+00> : vector<16x32xf32>
    %159 = tpu.matmul %158, %127, %cst_45 {dimension_numbers = #tpu.dot_dimension_numbers<[1], [0], [0], [1], [0, 0, 1, 1], [], []>} : vector<16x64xbf16>, vector<64x32xbf16>, vector<16x32xf32> -> vector<16x32xf32>
    %160 = arith.addf %124, %159 : vector<16x32xf32>
    %161 = vector.extract_strided_slice %0 {offsets = [2, 0], sizes = [1, 32], strides = [1, 1]} : vector<8x32xf32> to vector<1x32xf32>
    %162 = arith.mulf %160, %160 : vector<16x32xf32>
    %cst_46 = arith.constant dense<0.000000e+00> : vector<16xf32>
    %163 = vector.multi_reduction <add>, %162, %cst_46 [1] : vector<16x32xf32> to vector<16xf32>
    %164 = vector.shape_cast %163 : vector<16xf32> to vector<16x1xf32>
    %cst_47 = arith.constant 3.200000e+01 : f32
    %165 = vector.broadcast %cst_47 : f32 to vector<16x1xf32>
    %166 = arith.divf %164, %165 : vector<16x1xf32>
    %cst_48 = arith.constant 9.99999997E-7 : f32
    %167 = vector.broadcast %cst_48 : f32 to vector<16x1xf32>
    %168 = arith.addf %166, %167 : vector<16x1xf32>
    %169 = math.rsqrt %168 : vector<16x1xf32>
    %170 = vector.broadcast %169 : vector<16x1xf32> to vector<16x32xf32>
    %171 = arith.mulf %160, %170 : vector<16x32xf32>
    %172 = vector.broadcast %161 : vector<1x32xf32> to vector<16x32xf32>
    %173 = arith.mulf %171, %172 : vector<16x32xf32>
    %174 = arith.truncf %173 : vector<16x32xf32> to vector<16x32xbf16>
    %c0_49 = arith.constant 0 : index
    %c0_50 = arith.constant 0 : index
    %175 = vector.load %arg1[%c0_49, %c0_50] : memref<16x32xbf16, #tpu.memory_space<vmem>>, vector<16x32xbf16>
    %176 = arith.extf %175 : vector<16x32xbf16> to vector<16x32xf32>
    %177 = vector.extract_strided_slice %0 {offsets = [3, 0], sizes = [1, 32], strides = [1, 1]} : vector<8x32xf32> to vector<1x32xf32>
    %c0_51 = arith.constant 0 : index
    %c0_52 = arith.constant 0 : index
    %178 = vector.load %arg12[%c0_51, %c0_52] : memref<32x32xbf16, #tpu.memory_space<vmem>>, vector<32x32xbf16>
    %c0_53 = arith.constant 0 : index
    %c0_54 = arith.constant 0 : index
    %179 = vector.load %arg13[%c0_53, %c0_54] : memref<32x64xbf16, #tpu.memory_space<vmem>>, vector<32x64xbf16>
    %c0_55 = arith.constant 0 : index
    %c0_56 = arith.constant 0 : index
    %180 = vector.load %arg14[%c0_55, %c0_56] : memref<32x32xbf16, #tpu.memory_space<vmem>>, vector<32x32xbf16>
    %c0_57 = arith.constant 0 : index
    %c0_58 = arith.constant 0 : index
    %c0_59 = arith.constant 0 : index
    %181 = vector.load %arg3[%c0_57, %c0_58, %c0_59] : memref<4x8x8xf32, #tpu.memory_space<vmem>>, vector<4x8x8xf32>
    %182 = arith.mulf %176, %176 : vector<16x32xf32>
    %cst_60 = arith.constant dense<0.000000e+00> : vector<16xf32>
    %183 = vector.multi_reduction <add>, %182, %cst_60 [1] : vector<16x32xf32> to vector<16xf32>
    %184 = vector.shape_cast %183 : vector<16xf32> to vector<16x1xf32>
    %cst_61 = arith.constant 3.200000e+01 : f32
    %185 = vector.broadcast %cst_61 : f32 to vector<16x1xf32>
    %186 = arith.divf %184, %185 : vector<16x1xf32>
    %cst_62 = arith.constant 9.99999997E-7 : f32
    %187 = vector.broadcast %cst_62 : f32 to vector<16x1xf32>
    %188 = arith.addf %186, %187 : vector<16x1xf32>
    %189 = math.rsqrt %188 : vector<16x1xf32>
    %190 = vector.broadcast %189 : vector<16x1xf32> to vector<16x32xf32>
    %191 = arith.mulf %176, %190 : vector<16x32xf32>
    %192 = vector.broadcast %177 : vector<1x32xf32> to vector<16x32xf32>
    %193 = arith.mulf %191, %192 : vector<16x32xf32>
    %194 = arith.truncf %193 : vector<16x32xf32> to vector<16x32xbf16>
    %cst_63 = arith.constant dense<0.000000e+00> : vector<16x32xf32>
    %195 = tpu.matmul %194, %178, %cst_63 {dimension_numbers = #tpu.dot_dimension_numbers<[1], [0], [0], [1], [0, 0, 1, 1], [], []>} : vector<16x32xbf16>, vector<32x32xbf16>, vector<16x32xf32> -> vector<16x32xf32>
    %cst_64 = arith.constant dense<0.000000e+00> : vector<16x64xf32>
    %196 = tpu.matmul %194, %179, %cst_64 {dimension_numbers = #tpu.dot_dimension_numbers<[1], [0], [0], [1], [0, 0, 1, 1], [], []>} : vector<16x32xbf16>, vector<32x64xbf16>, vector<16x64xf32> -> vector<16x64xf32>
    %197 = vector.extract_strided_slice %196 {offsets = [0, 0], sizes = [16, 32], strides = [1, 1]} : vector<16x64xf32> to vector<16x32xf32>
    %198 = vector.extract_strided_slice %196 {offsets = [0, 32], sizes = [16, 32], strides = [1, 1]} : vector<16x64xf32> to vector<16x32xf32>
    %199 = vector.extract_strided_slice %195 {offsets = [0, 0], sizes = [16, 8], strides = [1, 1]} : vector<16x32xf32> to vector<16x8xf32>
    %200 = vector.shape_cast %199 : vector<16x8xf32> to vector<2x8x8xf32>
    %201 = vector.extract_strided_slice %197 {offsets = [0, 0], sizes = [16, 8], strides = [1, 1]} : vector<16x32xf32> to vector<16x8xf32>
    %202 = vector.shape_cast %201 : vector<16x8xf32> to vector<2x8x8xf32>
    %203 = vector.extract_strided_slice %198 {offsets = [0, 0], sizes = [16, 8], strides = [1, 1]} : vector<16x32xf32> to vector<16x8xf32>
    %204 = vector.shape_cast %203 : vector<16x8xf32> to vector<2x8x8xf32>
    "tpu.trace_start"() <{level = 10 : i32, message = "bqd,bkd->bqk"}> : () -> ()
    %cst_65 = arith.constant dense<0.000000e+00> : vector<2x8x8xf32>
    %205 = tpu.matmul %200, %202, %cst_65 {dimension_numbers = #tpu.dot_dimension_numbers<[2], [2], [1], [1], [0, 0, 0, 1, 1, 1], [0], [0]>} : vector<2x8x8xf32>, vector<2x8x8xf32>, vector<2x8x8xf32> -> vector<2x8x8xf32>
    "tpu.trace_stop"() : () -> ()
    %206 = vector.extract_strided_slice %181 {offsets = [0, 0, 0], sizes = [1, 8, 8], strides = [1, 1, 1]} : vector<4x8x8xf32> to vector<1x8x8xf32>
    %207 = vector.shape_cast %206 : vector<1x8x8xf32> to vector<8x8xf32>
    %208 = vector.shape_cast %207 : vector<8x8xf32> to vector<1x8x8xf32>
    %209 = vector.broadcast %208 : vector<1x8x8xf32> to vector<2x8x8xf32>
    %210 = arith.addf %205, %209 : vector<2x8x8xf32>
    %cst_66 = arith.constant dense<0xFF800000> : vector<2x8xf32>
    %211 = vector.multi_reduction <maximumf>, %210, %cst_66 [2] : vector<2x8x8xf32> to vector<2x8xf32>
    %212 = vector.shape_cast %211 : vector<2x8xf32> to vector<2x8x1xf32>
    %213 = vector.broadcast %212 : vector<2x8x1xf32> to vector<2x8x8xf32>
    %214 = arith.subf %210, %213 : vector<2x8x8xf32>
    %215 = math.exp %214 : vector<2x8x8xf32>
    %cst_67 = arith.constant dense<0.000000e+00> : vector<2x8xf32>
    %216 = vector.multi_reduction <add>, %215, %cst_67 [2] : vector<2x8x8xf32> to vector<2x8xf32>
    %217 = vector.shape_cast %216 : vector<2x8xf32> to vector<2x8x1xf32>
    %218 = tpu.reciprocal %217 {approx = true} : vector<2x8x1xf32> -> vector<2x8x1xf32>
    %219 = vector.broadcast %218 : vector<2x8x1xf32> to vector<2x8x8xf32>
    %220 = arith.mulf %215, %219 : vector<2x8x8xf32>
    "tpu.trace_start"() <{level = 10 : i32, message = "bqk,bkd->bqd"}> : () -> ()
    %cst_68 = arith.constant dense<0.000000e+00> : vector<2x8x8xf32>
    %221 = tpu.matmul %220, %204, %cst_68 {dimension_numbers = #tpu.dot_dimension_numbers<[2], [1], [1], [2], [0, 0, 0, 1, 1, 2], [0], [0]>} : vector<2x8x8xf32>, vector<2x8x8xf32>, vector<2x8x8xf32> -> vector<2x8x8xf32>
    "tpu.trace_stop"() : () -> ()
    %222 = vector.shape_cast %221 : vector<2x8x8xf32> to vector<16x8xf32>
    %223 = vector.extract_strided_slice %195 {offsets = [0, 8], sizes = [16, 8], strides = [1, 1]} : vector<16x32xf32> to vector<16x8xf32>
    %224 = vector.shape_cast %223 : vector<16x8xf32> to vector<2x8x8xf32>
    %225 = vector.extract_strided_slice %197 {offsets = [0, 8], sizes = [16, 8], strides = [1, 1]} : vector<16x32xf32> to vector<16x8xf32>
    %226 = vector.shape_cast %225 : vector<16x8xf32> to vector<2x8x8xf32>
    %227 = vector.extract_strided_slice %198 {offsets = [0, 8], sizes = [16, 8], strides = [1, 1]} : vector<16x32xf32> to vector<16x8xf32>
    %228 = vector.shape_cast %227 : vector<16x8xf32> to vector<2x8x8xf32>
    "tpu.trace_start"() <{level = 10 : i32, message = "bqd,bkd->bqk"}> : () -> ()
    %cst_69 = arith.constant dense<0.000000e+00> : vector<2x8x8xf32>
    %229 = tpu.matmul %224, %226, %cst_69 {dimension_numbers = #tpu.dot_dimension_numbers<[2], [2], [1], [1], [0, 0, 0, 1, 1, 1], [0], [0]>} : vector<2x8x8xf32>, vector<2x8x8xf32>, vector<2x8x8xf32> -> vector<2x8x8xf32>
    "tpu.trace_stop"() : () -> ()
    %230 = vector.extract_strided_slice %181 {offsets = [1, 0, 0], sizes = [1, 8, 8], strides = [1, 1, 1]} : vector<4x8x8xf32> to vector<1x8x8xf32>
    %231 = vector.shape_cast %230 : vector<1x8x8xf32> to vector<8x8xf32>
    %232 = vector.shape_cast %231 : vector<8x8xf32> to vector<1x8x8xf32>
    %233 = vector.broadcast %232 : vector<1x8x8xf32> to vector<2x8x8xf32>
    %234 = arith.addf %229, %233 : vector<2x8x8xf32>
    %cst_70 = arith.constant dense<0xFF800000> : vector<2x8xf32>
    %235 = vector.multi_reduction <maximumf>, %234, %cst_70 [2] : vector<2x8x8xf32> to vector<2x8xf32>
    %236 = vector.shape_cast %235 : vector<2x8xf32> to vector<2x8x1xf32>
    %237 = vector.broadcast %236 : vector<2x8x1xf32> to vector<2x8x8xf32>
    %238 = arith.subf %234, %237 : vector<2x8x8xf32>
    %239 = math.exp %238 : vector<2x8x8xf32>
    %cst_71 = arith.constant dense<0.000000e+00> : vector<2x8xf32>
    %240 = vector.multi_reduction <add>, %239, %cst_71 [2] : vector<2x8x8xf32> to vector<2x8xf32>
    %241 = vector.shape_cast %240 : vector<2x8xf32> to vector<2x8x1xf32>
    %242 = tpu.reciprocal %241 {approx = true} : vector<2x8x1xf32> -> vector<2x8x1xf32>
    %243 = vector.broadcast %242 : vector<2x8x1xf32> to vector<2x8x8xf32>
    %244 = arith.mulf %239, %243 : vector<2x8x8xf32>
    "tpu.trace_start"() <{level = 10 : i32, message = "bqk,bkd->bqd"}> : () -> ()
    %cst_72 = arith.constant dense<0.000000e+00> : vector<2x8x8xf32>
    %245 = tpu.matmul %244, %228, %cst_72 {dimension_numbers = #tpu.dot_dimension_numbers<[2], [1], [1], [2], [0, 0, 0, 1, 1, 2], [0], [0]>} : vector<2x8x8xf32>, vector<2x8x8xf32>, vector<2x8x8xf32> -> vector<2x8x8xf32>
    "tpu.trace_stop"() : () -> ()
    %246 = vector.shape_cast %245 : vector<2x8x8xf32> to vector<16x8xf32>
    %247 = vector.extract_strided_slice %195 {offsets = [0, 16], sizes = [16, 8], strides = [1, 1]} : vector<16x32xf32> to vector<16x8xf32>
    %248 = vector.shape_cast %247 : vector<16x8xf32> to vector<2x8x8xf32>
    %249 = vector.extract_strided_slice %197 {offsets = [0, 16], sizes = [16, 8], strides = [1, 1]} : vector<16x32xf32> to vector<16x8xf32>
    %250 = vector.shape_cast %249 : vector<16x8xf32> to vector<2x8x8xf32>
    %251 = vector.extract_strided_slice %198 {offsets = [0, 16], sizes = [16, 8], strides = [1, 1]} : vector<16x32xf32> to vector<16x8xf32>
    %252 = vector.shape_cast %251 : vector<16x8xf32> to vector<2x8x8xf32>
    "tpu.trace_start"() <{level = 10 : i32, message = "bqd,bkd->bqk"}> : () -> ()
    %cst_73 = arith.constant dense<0.000000e+00> : vector<2x8x8xf32>
    %253 = tpu.matmul %248, %250, %cst_73 {dimension_numbers = #tpu.dot_dimension_numbers<[2], [2], [1], [1], [0, 0, 0, 1, 1, 1], [0], [0]>} : vector<2x8x8xf32>, vector<2x8x8xf32>, vector<2x8x8xf32> -> vector<2x8x8xf32>
    "tpu.trace_stop"() : () -> ()
    %254 = vector.extract_strided_slice %181 {offsets = [2, 0, 0], sizes = [1, 8, 8], strides = [1, 1, 1]} : vector<4x8x8xf32> to vector<1x8x8xf32>
    %255 = vector.shape_cast %254 : vector<1x8x8xf32> to vector<8x8xf32>
    %256 = vector.shape_cast %255 : vector<8x8xf32> to vector<1x8x8xf32>
    %257 = vector.broadcast %256 : vector<1x8x8xf32> to vector<2x8x8xf32>
    %258 = arith.addf %253, %257 : vector<2x8x8xf32>
    %cst_74 = arith.constant dense<0xFF800000> : vector<2x8xf32>
    %259 = vector.multi_reduction <maximumf>, %258, %cst_74 [2] : vector<2x8x8xf32> to vector<2x8xf32>
    %260 = vector.shape_cast %259 : vector<2x8xf32> to vector<2x8x1xf32>
    %261 = vector.broadcast %260 : vector<2x8x1xf32> to vector<2x8x8xf32>
    %262 = arith.subf %258, %261 : vector<2x8x8xf32>
    %263 = math.exp %262 : vector<2x8x8xf32>
    %cst_75 = arith.constant dense<0.000000e+00> : vector<2x8xf32>
    %264 = vector.multi_reduction <add>, %263, %cst_75 [2] : vector<2x8x8xf32> to vector<2x8xf32>
    %265 = vector.shape_cast %264 : vector<2x8xf32> to vector<2x8x1xf32>
    %266 = tpu.reciprocal %265 {approx = true} : vector<2x8x1xf32> -> vector<2x8x1xf32>
    %267 = vector.broadcast %266 : vector<2x8x1xf32> to vector<2x8x8xf32>
    %268 = arith.mulf %263, %267 : vector<2x8x8xf32>
    "tpu.trace_start"() <{level = 10 : i32, message = "bqk,bkd->bqd"}> : () -> ()
    %cst_76 = arith.constant dense<0.000000e+00> : vector<2x8x8xf32>
    %269 = tpu.matmul %268, %252, %cst_76 {dimension_numbers = #tpu.dot_dimension_numbers<[2], [1], [1], [2], [0, 0, 0, 1, 1, 2], [0], [0]>} : vector<2x8x8xf32>, vector<2x8x8xf32>, vector<2x8x8xf32> -> vector<2x8x8xf32>
    "tpu.trace_stop"() : () -> ()
    %270 = vector.shape_cast %269 : vector<2x8x8xf32> to vector<16x8xf32>
    %271 = vector.extract_strided_slice %195 {offsets = [0, 24], sizes = [16, 8], strides = [1, 1]} : vector<16x32xf32> to vector<16x8xf32>
    %272 = vector.shape_cast %271 : vector<16x8xf32> to vector<2x8x8xf32>
    %273 = vector.extract_strided_slice %197 {offsets = [0, 24], sizes = [16, 8], strides = [1, 1]} : vector<16x32xf32> to vector<16x8xf32>
    %274 = vector.shape_cast %273 : vector<16x8xf32> to vector<2x8x8xf32>
    %275 = vector.extract_strided_slice %198 {offsets = [0, 24], sizes = [16, 8], strides = [1, 1]} : vector<16x32xf32> to vector<16x8xf32>
    %276 = vector.shape_cast %275 : vector<16x8xf32> to vector<2x8x8xf32>
    "tpu.trace_start"() <{level = 10 : i32, message = "bqd,bkd->bqk"}> : () -> ()
    %cst_77 = arith.constant dense<0.000000e+00> : vector<2x8x8xf32>
    %277 = tpu.matmul %272, %274, %cst_77 {dimension_numbers = #tpu.dot_dimension_numbers<[2], [2], [1], [1], [0, 0, 0, 1, 1, 1], [0], [0]>} : vector<2x8x8xf32>, vector<2x8x8xf32>, vector<2x8x8xf32> -> vector<2x8x8xf32>
    "tpu.trace_stop"() : () -> ()
    %278 = vector.extract_strided_slice %181 {offsets = [3, 0, 0], sizes = [1, 8, 8], strides = [1, 1, 1]} : vector<4x8x8xf32> to vector<1x8x8xf32>
    %279 = vector.shape_cast %278 : vector<1x8x8xf32> to vector<8x8xf32>
    %280 = vector.shape_cast %279 : vector<8x8xf32> to vector<1x8x8xf32>
    %281 = vector.broadcast %280 : vector<1x8x8xf32> to vector<2x8x8xf32>
    %282 = arith.addf %277, %281 : vector<2x8x8xf32>
    %cst_78 = arith.constant dense<0xFF800000> : vector<2x8xf32>
    %283 = vector.multi_reduction <maximumf>, %282, %cst_78 [2] : vector<2x8x8xf32> to vector<2x8xf32>
    %284 = vector.shape_cast %283 : vector<2x8xf32> to vector<2x8x1xf32>
    %285 = vector.broadcast %284 : vector<2x8x1xf32> to vector<2x8x8xf32>
    %286 = arith.subf %282, %285 : vector<2x8x8xf32>
    %287 = math.exp %286 : vector<2x8x8xf32>
    %cst_79 = arith.constant dense<0.000000e+00> : vector<2x8xf32>
    %288 = vector.multi_reduction <add>, %287, %cst_79 [2] : vector<2x8x8xf32> to vector<2x8xf32>
    %289 = vector.shape_cast %288 : vector<2x8xf32> to vector<2x8x1xf32>
    %290 = tpu.reciprocal %289 {approx = true} : vector<2x8x1xf32> -> vector<2x8x1xf32>
    %291 = vector.broadcast %290 : vector<2x8x1xf32> to vector<2x8x8xf32>
    %292 = arith.mulf %287, %291 : vector<2x8x8xf32>
    "tpu.trace_start"() <{level = 10 : i32, message = "bqk,bkd->bqd"}> : () -> ()
    %cst_80 = arith.constant dense<0.000000e+00> : vector<2x8x8xf32>
    %293 = tpu.matmul %292, %276, %cst_80 {dimension_numbers = #tpu.dot_dimension_numbers<[2], [1], [1], [2], [0, 0, 0, 1, 1, 2], [0], [0]>} : vector<2x8x8xf32>, vector<2x8x8xf32>, vector<2x8x8xf32> -> vector<2x8x8xf32>
    "tpu.trace_stop"() : () -> ()
    %294 = vector.shape_cast %293 : vector<2x8x8xf32> to vector<16x8xf32>
    %295 = tpu.concatenate %222, %246, %270, %294 in 1 : vector<16x8xf32>, vector<16x8xf32>, vector<16x8xf32>, vector<16x8xf32> -> vector<16x32xf32>
    %296 = arith.truncf %295 : vector<16x32xf32> to vector<16x32xbf16>
    %cst_81 = arith.constant dense<0.000000e+00> : vector<16x32xf32>
    %297 = tpu.matmul %296, %180, %cst_81 {dimension_numbers = #tpu.dot_dimension_numbers<[1], [0], [0], [1], [0, 0, 1, 1], [], []>} : vector<16x32xbf16>, vector<32x32xbf16>, vector<16x32xf32> -> vector<16x32xf32>
    %298 = arith.addf %176, %297 : vector<16x32xf32>
    %299 = vector.extract_strided_slice %0 {offsets = [4, 0], sizes = [1, 32], strides = [1, 1]} : vector<8x32xf32> to vector<1x32xf32>
    %c0_82 = arith.constant 0 : index
    %c0_83 = arith.constant 0 : index
    %300 = vector.load %arg15[%c0_82, %c0_83] : memref<32x32xbf16, #tpu.memory_space<vmem>>, vector<32x32xbf16>
    %c0_84 = arith.constant 0 : index
    %c0_85 = arith.constant 0 : index
    %301 = vector.load %arg16[%c0_84, %c0_85] : memref<32x64xbf16, #tpu.memory_space<vmem>>, vector<32x64xbf16>
    %c0_86 = arith.constant 0 : index
    %c0_87 = arith.constant 0 : index
    %302 = vector.load %arg17[%c0_86, %c0_87] : memref<32x32xbf16, #tpu.memory_space<vmem>>, vector<32x32xbf16>
    %303 = arith.mulf %298, %298 : vector<16x32xf32>
    %cst_88 = arith.constant dense<0.000000e+00> : vector<16xf32>
    %304 = vector.multi_reduction <add>, %303, %cst_88 [1] : vector<16x32xf32> to vector<16xf32>
    %305 = vector.shape_cast %304 : vector<16xf32> to vector<16x1xf32>
    %cst_89 = arith.constant 3.200000e+01 : f32
    %306 = vector.broadcast %cst_89 : f32 to vector<16x1xf32>
    %307 = arith.divf %305, %306 : vector<16x1xf32>
    %cst_90 = arith.constant 9.99999997E-7 : f32
    %308 = vector.broadcast %cst_90 : f32 to vector<16x1xf32>
    %309 = arith.addf %307, %308 : vector<16x1xf32>
    %310 = math.rsqrt %309 : vector<16x1xf32>
    %311 = vector.broadcast %310 : vector<16x1xf32> to vector<16x32xf32>
    %312 = arith.mulf %298, %311 : vector<16x32xf32>
    %313 = vector.broadcast %299 : vector<1x32xf32> to vector<16x32xf32>
    %314 = arith.mulf %312, %313 : vector<16x32xf32>
    %315 = arith.truncf %314 : vector<16x32xf32> to vector<16x32xbf16>
    %cst_91 = arith.constant dense<0.000000e+00> : vector<16x32xf32>
    %316 = tpu.matmul %315, %300, %cst_91 {dimension_numbers = #tpu.dot_dimension_numbers<[1], [0], [0], [1], [0, 0, 1, 1], [], []>} : vector<16x32xbf16>, vector<32x32xbf16>, vector<16x32xf32> -> vector<16x32xf32>
    %cst_92 = arith.constant dense<0.000000e+00> : vector<16x64xf32>
    %317 = tpu.matmul %174, %301, %cst_92 {dimension_numbers = #tpu.dot_dimension_numbers<[1], [0], [0], [1], [0, 0, 1, 1], [], []>} : vector<16x32xbf16>, vector<32x64xbf16>, vector<16x64xf32> -> vector<16x64xf32>
    %318 = vector.extract_strided_slice %317 {offsets = [0, 0], sizes = [16, 32], strides = [1, 1]} : vector<16x64xf32> to vector<16x32xf32>
    %319 = vector.extract_strided_slice %317 {offsets = [0, 32], sizes = [16, 32], strides = [1, 1]} : vector<16x64xf32> to vector<16x32xf32>
    %320 = vector.extract_strided_slice %316 {offsets = [0, 0], sizes = [16, 8], strides = [1, 1]} : vector<16x32xf32> to vector<16x8xf32>
    %321 = vector.shape_cast %320 : vector<16x8xf32> to vector<2x8x8xf32>
    %322 = vector.extract_strided_slice %318 {offsets = [0, 0], sizes = [16, 8], strides = [1, 1]} : vector<16x32xf32> to vector<16x8xf32>
    %323 = vector.shape_cast %322 : vector<16x8xf32> to vector<2x8x8xf32>
    %324 = vector.extract_strided_slice %319 {offsets = [0, 0], sizes = [16, 8], strides = [1, 1]} : vector<16x32xf32> to vector<16x8xf32>
    %325 = vector.shape_cast %324 : vector<16x8xf32> to vector<2x8x8xf32>
    "tpu.trace_start"() <{level = 10 : i32, message = "bqd,bkd->bqk"}> : () -> ()
    %cst_93 = arith.constant dense<0.000000e+00> : vector<2x8x8xf32>
    %326 = tpu.matmul %321, %323, %cst_93 {dimension_numbers = #tpu.dot_dimension_numbers<[2], [2], [1], [1], [0, 0, 0, 1, 1, 1], [0], [0]>} : vector<2x8x8xf32>, vector<2x8x8xf32>, vector<2x8x8xf32> -> vector<2x8x8xf32>
    "tpu.trace_stop"() : () -> ()
    %cst_94 = arith.constant dense<0xFF800000> : vector<2x8xf32>
    %327 = vector.multi_reduction <maximumf>, %326, %cst_94 [2] : vector<2x8x8xf32> to vector<2x8xf32>
    %328 = vector.shape_cast %327 : vector<2x8xf32> to vector<2x8x1xf32>
    %329 = vector.broadcast %328 : vector<2x8x1xf32> to vector<2x8x8xf32>
    %330 = arith.subf %326, %329 : vector<2x8x8xf32>
    %331 = math.exp %330 : vector<2x8x8xf32>
    %cst_95 = arith.constant dense<0.000000e+00> : vector<2x8xf32>
    %332 = vector.multi_reduction <add>, %331, %cst_95 [2] : vector<2x8x8xf32> to vector<2x8xf32>
    %333 = vector.shape_cast %332 : vector<2x8xf32> to vector<2x8x1xf32>
    %334 = tpu.reciprocal %333 {approx = true} : vector<2x8x1xf32> -> vector<2x8x1xf32>
    %335 = vector.broadcast %334 : vector<2x8x1xf32> to vector<2x8x8xf32>
    %336 = arith.mulf %331, %335 : vector<2x8x8xf32>
    "tpu.trace_start"() <{level = 10 : i32, message = "bqk,bkd->bqd"}> : () -> ()
    %cst_96 = arith.constant dense<0.000000e+00> : vector<2x8x8xf32>
    %337 = tpu.matmul %336, %325, %cst_96 {dimension_numbers = #tpu.dot_dimension_numbers<[2], [1], [1], [2], [0, 0, 0, 1, 1, 2], [0], [0]>} : vector<2x8x8xf32>, vector<2x8x8xf32>, vector<2x8x8xf32> -> vector<2x8x8xf32>
    "tpu.trace_stop"() : () -> ()
    %338 = vector.shape_cast %337 : vector<2x8x8xf32> to vector<16x8xf32>
    %339 = vector.extract_strided_slice %316 {offsets = [0, 8], sizes = [16, 8], strides = [1, 1]} : vector<16x32xf32> to vector<16x8xf32>
    %340 = vector.shape_cast %339 : vector<16x8xf32> to vector<2x8x8xf32>
    %341 = vector.extract_strided_slice %318 {offsets = [0, 8], sizes = [16, 8], strides = [1, 1]} : vector<16x32xf32> to vector<16x8xf32>
    %342 = vector.shape_cast %341 : vector<16x8xf32> to vector<2x8x8xf32>
    %343 = vector.extract_strided_slice %319 {offsets = [0, 8], sizes = [16, 8], strides = [1, 1]} : vector<16x32xf32> to vector<16x8xf32>
    %344 = vector.shape_cast %343 : vector<16x8xf32> to vector<2x8x8xf32>
    "tpu.trace_start"() <{level = 10 : i32, message = "bqd,bkd->bqk"}> : () -> ()
    %cst_97 = arith.constant dense<0.000000e+00> : vector<2x8x8xf32>
    %345 = tpu.matmul %340, %342, %cst_97 {dimension_numbers = #tpu.dot_dimension_numbers<[2], [2], [1], [1], [0, 0, 0, 1, 1, 1], [0], [0]>} : vector<2x8x8xf32>, vector<2x8x8xf32>, vector<2x8x8xf32> -> vector<2x8x8xf32>
    "tpu.trace_stop"() : () -> ()
    %cst_98 = arith.constant dense<0xFF800000> : vector<2x8xf32>
    %346 = vector.multi_reduction <maximumf>, %345, %cst_98 [2] : vector<2x8x8xf32> to vector<2x8xf32>
    %347 = vector.shape_cast %346 : vector<2x8xf32> to vector<2x8x1xf32>
    %348 = vector.broadcast %347 : vector<2x8x1xf32> to vector<2x8x8xf32>
    %349 = arith.subf %345, %348 : vector<2x8x8xf32>
    %350 = math.exp %349 : vector<2x8x8xf32>
    %cst_99 = arith.constant dense<0.000000e+00> : vector<2x8xf32>
    %351 = vector.multi_reduction <add>, %350, %cst_99 [2] : vector<2x8x8xf32> to vector<2x8xf32>
    %352 = vector.shape_cast %351 : vector<2x8xf32> to vector<2x8x1xf32>
    %353 = tpu.reciprocal %352 {approx = true} : vector<2x8x1xf32> -> vector<2x8x1xf32>
    %354 = vector.broadcast %353 : vector<2x8x1xf32> to vector<2x8x8xf32>
    %355 = arith.mulf %350, %354 : vector<2x8x8xf32>
    "tpu.trace_start"() <{level = 10 : i32, message = "bqk,bkd->bqd"}> : () -> ()
    %cst_100 = arith.constant dense<0.000000e+00> : vector<2x8x8xf32>
    %356 = tpu.matmul %355, %344, %cst_100 {dimension_numbers = #tpu.dot_dimension_numbers<[2], [1], [1], [2], [0, 0, 0, 1, 1, 2], [0], [0]>} : vector<2x8x8xf32>, vector<2x8x8xf32>, vector<2x8x8xf32> -> vector<2x8x8xf32>
    "tpu.trace_stop"() : () -> ()
    %357 = vector.shape_cast %356 : vector<2x8x8xf32> to vector<16x8xf32>
    %358 = vector.extract_strided_slice %316 {offsets = [0, 16], sizes = [16, 8], strides = [1, 1]} : vector<16x32xf32> to vector<16x8xf32>
    %359 = vector.shape_cast %358 : vector<16x8xf32> to vector<2x8x8xf32>
    %360 = vector.extract_strided_slice %318 {offsets = [0, 16], sizes = [16, 8], strides = [1, 1]} : vector<16x32xf32> to vector<16x8xf32>
    %361 = vector.shape_cast %360 : vector<16x8xf32> to vector<2x8x8xf32>
    %362 = vector.extract_strided_slice %319 {offsets = [0, 16], sizes = [16, 8], strides = [1, 1]} : vector<16x32xf32> to vector<16x8xf32>
    %363 = vector.shape_cast %362 : vector<16x8xf32> to vector<2x8x8xf32>
    "tpu.trace_start"() <{level = 10 : i32, message = "bqd,bkd->bqk"}> : () -> ()
    %cst_101 = arith.constant dense<0.000000e+00> : vector<2x8x8xf32>
    %364 = tpu.matmul %359, %361, %cst_101 {dimension_numbers = #tpu.dot_dimension_numbers<[2], [2], [1], [1], [0, 0, 0, 1, 1, 1], [0], [0]>} : vector<2x8x8xf32>, vector<2x8x8xf32>, vector<2x8x8xf32> -> vector<2x8x8xf32>
    "tpu.trace_stop"() : () -> ()
    %cst_102 = arith.constant dense<0xFF800000> : vector<2x8xf32>
    %365 = vector.multi_reduction <maximumf>, %364, %cst_102 [2] : vector<2x8x8xf32> to vector<2x8xf32>
    %366 = vector.shape_cast %365 : vector<2x8xf32> to vector<2x8x1xf32>
    %367 = vector.broadcast %366 : vector<2x8x1xf32> to vector<2x8x8xf32>
    %368 = arith.subf %364, %367 : vector<2x8x8xf32>
    %369 = math.exp %368 : vector<2x8x8xf32>
    %cst_103 = arith.constant dense<0.000000e+00> : vector<2x8xf32>
    %370 = vector.multi_reduction <add>, %369, %cst_103 [2] : vector<2x8x8xf32> to vector<2x8xf32>
    %371 = vector.shape_cast %370 : vector<2x8xf32> to vector<2x8x1xf32>
    %372 = tpu.reciprocal %371 {approx = true} : vector<2x8x1xf32> -> vector<2x8x1xf32>
    %373 = vector.broadcast %372 : vector<2x8x1xf32> to vector<2x8x8xf32>
    %374 = arith.mulf %369, %373 : vector<2x8x8xf32>
    "tpu.trace_start"() <{level = 10 : i32, message = "bqk,bkd->bqd"}> : () -> ()
    %cst_104 = arith.constant dense<0.000000e+00> : vector<2x8x8xf32>
    %375 = tpu.matmul %374, %363, %cst_104 {dimension_numbers = #tpu.dot_dimension_numbers<[2], [1], [1], [2], [0, 0, 0, 1, 1, 2], [0], [0]>} : vector<2x8x8xf32>, vector<2x8x8xf32>, vector<2x8x8xf32> -> vector<2x8x8xf32>
    "tpu.trace_stop"() : () -> ()
    %376 = vector.shape_cast %375 : vector<2x8x8xf32> to vector<16x8xf32>
    %377 = vector.extract_strided_slice %316 {offsets = [0, 24], sizes = [16, 8], strides = [1, 1]} : vector<16x32xf32> to vector<16x8xf32>
    %378 = vector.shape_cast %377 : vector<16x8xf32> to vector<2x8x8xf32>
    %379 = vector.extract_strided_slice %318 {offsets = [0, 24], sizes = [16, 8], strides = [1, 1]} : vector<16x32xf32> to vector<16x8xf32>
    %380 = vector.shape_cast %379 : vector<16x8xf32> to vector<2x8x8xf32>
    %381 = vector.extract_strided_slice %319 {offsets = [0, 24], sizes = [16, 8], strides = [1, 1]} : vector<16x32xf32> to vector<16x8xf32>
    %382 = vector.shape_cast %381 : vector<16x8xf32> to vector<2x8x8xf32>
    "tpu.trace_start"() <{level = 10 : i32, message = "bqd,bkd->bqk"}> : () -> ()
    %cst_105 = arith.constant dense<0.000000e+00> : vector<2x8x8xf32>
    %383 = tpu.matmul %378, %380, %cst_105 {dimension_numbers = #tpu.dot_dimension_numbers<[2], [2], [1], [1], [0, 0, 0, 1, 1, 1], [0], [0]>} : vector<2x8x8xf32>, vector<2x8x8xf32>, vector<2x8x8xf32> -> vector<2x8x8xf32>
    "tpu.trace_stop"() : () -> ()
    %cst_106 = arith.constant dense<0xFF800000> : vector<2x8xf32>
    %384 = vector.multi_reduction <maximumf>, %383, %cst_106 [2] : vector<2x8x8xf32> to vector<2x8xf32>
    %385 = vector.shape_cast %384 : vector<2x8xf32> to vector<2x8x1xf32>
    %386 = vector.broadcast %385 : vector<2x8x1xf32> to vector<2x8x8xf32>
    %387 = arith.subf %383, %386 : vector<2x8x8xf32>
    %388 = math.exp %387 : vector<2x8x8xf32>
    %cst_107 = arith.constant dense<0.000000e+00> : vector<2x8xf32>
    %389 = vector.multi_reduction <add>, %388, %cst_107 [2] : vector<2x8x8xf32> to vector<2x8xf32>
    %390 = vector.shape_cast %389 : vector<2x8xf32> to vector<2x8x1xf32>
    %391 = tpu.reciprocal %390 {approx = true} : vector<2x8x1xf32> -> vector<2x8x1xf32>
    %392 = vector.broadcast %391 : vector<2x8x1xf32> to vector<2x8x8xf32>
    %393 = arith.mulf %388, %392 : vector<2x8x8xf32>
    "tpu.trace_start"() <{level = 10 : i32, message = "bqk,bkd->bqd"}> : () -> ()
    %cst_108 = arith.constant dense<0.000000e+00> : vector<2x8x8xf32>
    %394 = tpu.matmul %393, %382, %cst_108 {dimension_numbers = #tpu.dot_dimension_numbers<[2], [1], [1], [2], [0, 0, 0, 1, 1, 2], [0], [0]>} : vector<2x8x8xf32>, vector<2x8x8xf32>, vector<2x8x8xf32> -> vector<2x8x8xf32>
    "tpu.trace_stop"() : () -> ()
    %395 = vector.shape_cast %394 : vector<2x8x8xf32> to vector<16x8xf32>
    %396 = tpu.concatenate %338, %357, %376, %395 in 1 : vector<16x8xf32>, vector<16x8xf32>, vector<16x8xf32>, vector<16x8xf32> -> vector<16x32xf32>
    %397 = arith.truncf %396 : vector<16x32xf32> to vector<16x32xbf16>
    %cst_109 = arith.constant dense<0.000000e+00> : vector<16x32xf32>
    %398 = tpu.matmul %397, %302, %cst_109 {dimension_numbers = #tpu.dot_dimension_numbers<[1], [0], [0], [1], [0, 0, 1, 1], [], []>} : vector<16x32xbf16>, vector<32x32xbf16>, vector<16x32xf32> -> vector<16x32xf32>
    %399 = arith.addf %298, %398 : vector<16x32xf32>
    %400 = vector.extract_strided_slice %0 {offsets = [5, 0], sizes = [1, 32], strides = [1, 1]} : vector<8x32xf32> to vector<1x32xf32>
    %c0_110 = arith.constant 0 : index
    %c0_111 = arith.constant 0 : index
    %401 = vector.load %arg18[%c0_110, %c0_111] : memref<32x128xbf16, #tpu.memory_space<vmem>>, vector<32x128xbf16>
    %c0_112 = arith.constant 0 : index
    %c0_113 = arith.constant 0 : index
    %402 = vector.load %arg19[%c0_112, %c0_113] : memref<64x32xbf16, #tpu.memory_space<vmem>>, vector<64x32xbf16>
    %403 = arith.mulf %399, %399 : vector<16x32xf32>
    %cst_114 = arith.constant dense<0.000000e+00> : vector<16xf32>
    %404 = vector.multi_reduction <add>, %403, %cst_114 [1] : vector<16x32xf32> to vector<16xf32>
    %405 = vector.shape_cast %404 : vector<16xf32> to vector<16x1xf32>
    %cst_115 = arith.constant 3.200000e+01 : f32
    %406 = vector.broadcast %cst_115 : f32 to vector<16x1xf32>
    %407 = arith.divf %405, %406 : vector<16x1xf32>
    %cst_116 = arith.constant 9.99999997E-7 : f32
    %408 = vector.broadcast %cst_116 : f32 to vector<16x1xf32>
    %409 = arith.addf %407, %408 : vector<16x1xf32>
    %410 = math.rsqrt %409 : vector<16x1xf32>
    %411 = vector.broadcast %410 : vector<16x1xf32> to vector<16x32xf32>
    %412 = arith.mulf %399, %411 : vector<16x32xf32>
    %413 = vector.broadcast %400 : vector<1x32xf32> to vector<16x32xf32>
    %414 = arith.mulf %412, %413 : vector<16x32xf32>
    %415 = arith.truncf %414 : vector<16x32xf32> to vector<16x32xbf16>
    %cst_117 = arith.constant dense<0.000000e+00> : vector<16x128xf32>
    %416 = tpu.matmul %415, %401, %cst_117 {dimension_numbers = #tpu.dot_dimension_numbers<[1], [0], [0], [1], [0, 0, 1, 1], [], []>} : vector<16x32xbf16>, vector<32x128xbf16>, vector<16x128xf32> -> vector<16x128xf32>
    %417 = vector.extract_strided_slice %416 {offsets = [0, 0], sizes = [16, 64], strides = [1, 1]} : vector<16x128xf32> to vector<16x64xf32>
    %418 = vector.extract_strided_slice %416 {offsets = [0, 64], sizes = [16, 64], strides = [1, 1]} : vector<16x128xf32> to vector<16x64xf32>
    %cst_118 = arith.constant 5.000000e-01 : f32
    %419 = vector.broadcast %cst_118 : f32 to vector<16x64xf32>
    %420 = arith.mulf %419, %417 : vector<16x64xf32>
    %cst_119 = arith.constant 4.471500e-02 : f32
    %421 = vector.broadcast %cst_119 : f32 to vector<16x64xf32>
    %422 = arith.mulf %421, %417 : vector<16x64xf32>
    %423 = arith.mulf %422, %417 : vector<16x64xf32>
    %424 = arith.mulf %423, %417 : vector<16x64xf32>
    %425 = arith.addf %417, %424 : vector<16x64xf32>
    %cst_120 = arith.constant 0.797884583 : f32
    %426 = vector.broadcast %cst_120 : f32 to vector<16x64xf32>
    %427 = arith.mulf %426, %425 : vector<16x64xf32>
    %428 = math.tanh %427 : vector<16x64xf32>
    %cst_121 = arith.constant 1.000000e+00 : f32
    %429 = vector.broadcast %cst_121 : f32 to vector<16x64xf32>
    %430 = arith.addf %429, %428 : vector<16x64xf32>
    %431 = arith.mulf %420, %430 : vector<16x64xf32>
    %432 = arith.mulf %431, %418 : vector<16x64xf32>
    %433 = arith.truncf %432 : vector<16x64xf32> to vector<16x64xbf16>
    %cst_122 = arith.constant dense<0.000000e+00> : vector<16x32xf32>
    %434 = tpu.matmul %433, %402, %cst_122 {dimension_numbers = #tpu.dot_dimension_numbers<[1], [0], [0], [1], [0, 0, 1, 1], [], []>} : vector<16x64xbf16>, vector<64x32xbf16>, vector<16x32xf32> -> vector<16x32xf32>
    %435 = arith.addf %399, %434 : vector<16x32xf32>
    %436 = vector.extract_strided_slice %0 {offsets = [6, 0], sizes = [1, 32], strides = [1, 1]} : vector<8x32xf32> to vector<1x32xf32>
    %437 = arith.mulf %435, %435 : vector<16x32xf32>
    %cst_123 = arith.constant dense<0.000000e+00> : vector<16xf32>
    %438 = vector.multi_reduction <add>, %437, %cst_123 [1] : vector<16x32xf32> to vector<16xf32>
    %439 = vector.shape_cast %438 : vector<16xf32> to vector<16x1xf32>
    %cst_124 = arith.constant 3.200000e+01 : f32
    %440 = vector.broadcast %cst_124 : f32 to vector<16x1xf32>
    %441 = arith.divf %439, %440 : vector<16x1xf32>
    %cst_125 = arith.constant 9.99999997E-7 : f32
    %442 = vector.broadcast %cst_125 : f32 to vector<16x1xf32>
    %443 = arith.addf %441, %442 : vector<16x1xf32>
    %444 = math.rsqrt %443 : vector<16x1xf32>
    %445 = vector.broadcast %444 : vector<16x1xf32> to vector<16x32xf32>
    %446 = arith.mulf %435, %445 : vector<16x32xf32>
    %447 = vector.broadcast %436 : vector<1x32xf32> to vector<16x32xf32>
    %448 = arith.mulf %446, %447 : vector<16x32xf32>
    %449 = arith.truncf %448 : vector<16x32xf32> to vector<16x32xbf16>
    %c0_126 = arith.constant 0 : index
    %c0_127 = arith.constant 0 : index
    %450 = vector.load %arg20[%c0_126, %c0_127] : memref<32x64xbf16, #tpu.memory_space<vmem>>, vector<32x64xbf16>
    %cst_128 = arith.constant dense<0.000000e+00> : vector<16x64xf32>
    %451 = tpu.matmul %449, %450, %cst_128 {dimension_numbers = #tpu.dot_dimension_numbers<[1], [0], [0], [1], [0, 0, 1, 1], [], []>} : vector<16x32xbf16>, vector<32x64xbf16>, vector<16x64xf32> -> vector<16x64xf32>
    %c0_129 = arith.constant 0 : index
    %c0_130 = arith.constant 0 : index
    %452 = vector.load %arg4[%c0_129, %c0_130] : memref<16x1xi32, #tpu.memory_space<vmem>>, vector<16x1xi32>
    %c0_131 = arith.constant 0 : index
    %c0_132 = arith.constant 0 : index
    %453 = vector.load %arg5[%c0_131, %c0_132] : memref<16x1xf32, #tpu.memory_space<vmem>>, vector<16x1xf32>
    %cst_133 = arith.constant dense<0xFF800000> : vector<16xf32>
    %454 = vector.multi_reduction <maximumf>, %451, %cst_133 [1] : vector<16x64xf32> to vector<16xf32>
    %455 = vector.shape_cast %454 : vector<16xf32> to vector<16x1xf32>
    %456 = vector.broadcast %455 : vector<16x1xf32> to vector<16x64xf32>
    %457 = arith.subf %451, %456 : vector<16x64xf32>
    %458 = math.exp %457 : vector<16x64xf32>
    %cst_134 = arith.constant dense<0.000000e+00> : vector<16xf32>
    %459 = vector.multi_reduction <add>, %458, %cst_134 [1] : vector<16x64xf32> to vector<16xf32>
    %460 = vector.shape_cast %459 : vector<16xf32> to vector<16x1xf32>
    %461 = math.log %460 : vector<16x1xf32>
    %462 = arith.addf %455, %461 : vector<16x1xf32>
    %463 = tpu.iota {dimensions = array<i32: 1>} : vector<16x64xi32>
    %464 = vector.broadcast %452 : vector<16x1xi32> to vector<16x64xi32>
    %465 = arith.cmpi eq, %463, %464 : vector<16x64xi32>
    %cst_135 = arith.constant 0.000000e+00 : f32
    %466 = vector.broadcast %cst_135 : f32 to vector<16x64xf32>
    %467 = arith.select %465, %451, %466 : vector<16x64xi1>, vector<16x64xf32>
    %cst_136 = arith.constant dense<0.000000e+00> : vector<16xf32>
    %468 = vector.multi_reduction <add>, %467, %cst_136 [1] : vector<16x64xf32> to vector<16xf32>
    %469 = vector.shape_cast %468 : vector<16xf32> to vector<16x1xf32>
    %470 = arith.subf %462, %469 : vector<16x1xf32>
    %471 = arith.mulf %470, %453 : vector<16x1xf32>
    %cst_137 = arith.constant dense<0.000000e+00> : vector<1xf32>
    %472 = vector.multi_reduction <add>, %471, %cst_137 [0] : vector<16x1xf32> to vector<1xf32>
    %473 = vector.shape_cast %472 : vector<1xf32> to vector<1x1xf32>
    %cst_138 = arith.constant dense<0.000000e+00> : vector<1xf32>
    %474 = vector.multi_reduction <add>, %453, %cst_138 [0] : vector<16x1xf32> to vector<1xf32>
    %475 = vector.shape_cast %474 : vector<1xf32> to vector<1x1xf32>
    %cst_139 = arith.constant 1.000000e+00 : f32
    %476 = vector.broadcast %cst_139 : f32 to vector<1x1xf32>
    %477 = arith.maximumf %475, %476 : vector<1x1xf32>
    %478 = arith.divf %473, %477 : vector<1x1xf32>
    %c0_140 = arith.constant 0 : index
    %c0_141 = arith.constant 0 : index
    %479 = vector.load %arg21[%c0_140, %c0_141] : memref<1x1xf32, #tpu.memory_space<vmem>>, vector<1x1xf32>
    tpu.vector_store %arg21[%c0_140, %c0_141], %478 {strides = array<i32>} : memref<1x1xf32, #tpu.memory_space<vmem>>, vector<1x1xf32>,
    return
  }
}

</mosaic_0001>

<bundles_post_ra>
// kernel: _lambda_.1
= control target key start
LH: loop header
LB: loop body
LE: loop exit
PB: predicated region body
PF: predicated region fallthrough
CT: control target
= control target key end

     0   :  { %s7174_s0 = inlined_call_operand.vmem [shape: bf16[16,32], index: 0, kind: input, shape index: {}]   ;;  %s7175_s1 = inlined_call_operand.vmem [shape: bf16[16,32], index: 1, kind: input, shape index: {}]   ;;  %s7176_s2 = inlined_call_operand.vmem [shape: f32[4,8,8], index: 2, kind: input, shape index: {}]   ;;  %s7177_s3 = inlined_call_operand.vmem [shape: f32[4,8,8], index: 3, kind: input, shape index: {}]   ;;  %s7178_s4 = inlined_call_operand.vmem [shape: s32[16,1], index: 4, kind: input, shape index: {}]   ;;  %s7179_s5 = inlined_call_operand.vmem [shape: f32[16,1], index: 5, kind: input, shape index: {}]   ;;  %s7180_s6 = inlined_call_operand.vmem [shape: f32[8,32], index: 6, kind: input, shape index: {}]   ;;  %s7181_s7 = inlined_call_operand.vmem [shape: bf16[32,32], index: 7, kind: input, shape index: {}]   ;;  %s7182_s8 = inlined_call_operand.vmem [shape: bf16[32,64], index: 8, kind: input, shape index: {}]   ;;  %s7183_s9 = inlined_call_operand.vmem [shape: bf16[32,32], index: 9, kind: input, shape index: {}]   ;;  %s7184_s10 = inlined_call_operand.vmem [shape: bf16[32,128], index: 10, kind: input, shape index: {}]   ;;  %s7185_s11 = inlined_call_operand.vmem [shape: bf16[64,32], index: 11, kind: input, shape index: {}]   ;;  %s7186_s12 = inlined_call_operand.vmem [shape: bf16[32,32], index: 12, kind: input, shape index: {}]   ;;  %s7187_s13 = inlined_call_operand.vmem [shape: bf16[32,64], index: 13, kind: input, shape index: {}]   ;;  %s7188_s14 = inlined_call_operand.vmem [shape: bf16[32,32], index: 14, kind: input, shape index: {}]   ;;  %s7189_s15 = inlined_call_operand.vmem [shape: bf16[32,32], index: 15, kind: input, shape index: {}]   ;;  %s7190_s16 = inlined_call_operand.vmem [shape: bf16[32,64], index: 16, kind: input, shape index: {}]   ;;  %s7191_s17 = inlined_call_operand.vmem [shape: bf16[32,32], index: 17, kind: input, shape index: {}]   ;;  %s7192_s18 = inlined_call_operand.vmem [shape: bf16[32,128], index: 18, kind: input, shape index: {}]   ;;  %s7193_s19 = inlined_call_operand.vmem [shape: bf16[64,32], index: 19, kind: input, shape index: {}]   ;;  %s7194_s20 = inlined_call_operand.vmem [shape: bf16[32,64], index: 20, kind: input, shape index: {}]   ;;  %s7195_s21 = inlined_call_operand.hbm [shape: f32[1,1], index: 21, kind: output, shape index: {}]  }
   0x1   :  { %7200 = sst [smem:[#allocation5_spill]] %s7174_s0 }
   0x2   :  { %7201 = sst [smem:[#allocation6_spill]] %s7175_s1 }
   0x3   :  { %7202 = sst [smem:[#allocation7_spill]] %s7176_s2 }
   0x4   :  { %7203 = sst [smem:[#allocation8_spill]] %s7177_s3 }
   0x5   :  { %7204 = sst [smem:[#allocation9_spill]] %s7178_s4 }
   0x6   :  { %7205 = sst [smem:[#allocation10_spill]] %s7179_s5 }
   0x7   :  { %s7206_s26 = sld [smem:[#allocation5_spill]]  ;;  %vm93_vm0 = vcmask 261120  }
   0xd   :  { %v5436_v0 = vld [vmem:[%s7206_s26] sm:$0xff]  }
   0xe   :  { %v6334_v1 = vunpack.c.l.bf16 %v5436_v0  ;;  %v6336_v2 = vunpack.c.h.bf16 %v5436_v0 }
  0x10   :  { %v91_v3 = vmul.f32 %v6334_v1, %v6334_v1  ;;  %v92_v4 = vmul.f32 %v6336_v2, %v6336_v2 }
  0x12   :  { %v94_v5 = vsel %vm93_vm0, %v91_v3, 0.0  ;;  %v97_v6 = vsel %vm93_vm0, %v92_v4, 0.0 }
  0x13   :  { %95 = vadd.xlane.f32.xlu0 %v94_v5 }
  0x17   :  { %98 = vadd.xlane.f32.xlu0 %v97_v6 }
  0x18   :  { %26 = vsyncpa [#allocation3], 0  ;;  %v6007_v7 = vld [vmem:[%s7181_s7] sm:$0xff]   ;;  %v6206_v9 = vmov 0.0   ;;  %v6009_v10 = vld [vmem:[%s7181_s7 + $0x8] sm:$0xff]   ;;  %vm6207_vm1 = vmmov 0   ;;  %v109_v17 = vlaneseq }
  0x19   :  { %v6008_v8 = vld [vmem:[%s7182_s8] sm:$0xff]   ;;  %5585 = vmatprep.subr.bf16.mxu0 %v6206_v9  ;;  %5593 = vmatprep.subr.bf16.mxu1 %v6206_v9  ;;  %v6010_v11 = vld [vmem:[%s7182_s8 + $0x8] sm:$0xff]   ;;  %vm225_vm2 = vcmask 64512   ;;  %s6208_s22 = smov 96   ;;  %s7207_s24 = sld [smem:[#allocation7_spill]]  ;;  %vm1568_vm3 = vcmask 130048  }
  0x1a   :  { %5586 = vmatpush3.bf16.msra.mxu0 %v6007_v7  ;;  %5594 = vmatpush3.bf16.msra.mxu1 %v6008_v8  ;;  %v6367_v19 = vshrl.u32 %v109_v17, 7  ;;  %v6373_v22 = vld [vmem:[%s7180_s6] sm:$0xff]  ;;  %s6209_s2 = smov 120   ;;  %s6210_s27 = smov 88   ;;  %vm1571_vm4 = vcmask 195584   ;;  %vm1777_vm5 = vcmask 523264  }
  0x1b   :  { %5587 = vmatprep.subr.bf16.mxu0 %v6206_v9  ;;  %5595 = vmatprep.subr.bf16.mxu1 %v6206_v9  ;;  %s6211_s3 = smov 112   ;;  %s6212_s0 = smov 80   ;;  %vm5279_vm8 = vcmask 7168   ;;  %vm5301_vm9 = vcmask 0  }
  0x1c   :  { %5589 = vmatprep.mubr.msk.bf16.mxu0 %vm6207_vm1, %v6206_v9  ;;  %5597 = vmatprep.mubr.msk.bf16.mxu1 %vm6207_vm1, %v6206_v9  ;;  %v111_v20 = vsub.s32 0, %v6367_v19  ;;  %s6213_s4 = smov 104   ;;  %s6214_s7 = smov 72  }
  0x1d   :  { %s6215_s8 = smov 8   ;;  %s6216_s23 = smov 16  }
  0x1e   :  { %5588 = vmatpush3.bf16.msra.mxu0 %v6009_v10  ;;  %5596 = vmatpush3.bf16.msra.mxu1 %v6010_v11  ;;  %v112_v24 = vrot.slane %v6373_v22, %v111_v20  ;;  %s6217_s28 = smov 24   ;;  %s7208_s30 = sld [smem:[#allocation6_spill]] }
  0x1f   :  { %5601 = vmatprep.subr.mxu1 %v6206_v9  ;;  %5611 = vmatprep.subr.mxu0 %v6206_v9  ;;  %v87_v39 = vld [vmem:[%s7207_s24] sm:$0xff]  ;;  %v88_v10 = vld [vmem:[%s7207_s24 + $0x8] sm:$0xff]  ;;  %s6218_s5 = smov 64   ;;  %s7209_s1 = sld [smem:[#allocation8_spill]] }
  0x20   :  { %s7210_s25 = sld [smem:[#allocation9_spill]] }
  0xa0   :  { %v96_v12 = vpop.xlane.xlu0 %95 }
  0xa1   :  { %v101_v13 = vmul.f32 0.03125, %v96_v12 }
  0xa3   :  { %v103_v14 = vadd.f32 1e-06, %v101_v13 }
  0xa4   :  { %v99_v15 = vpop.xlane.xlu0 %98 }
  0xa5   :  { %6039 = vrsqrt.f32 %v103_v14  ;;  %v102_v16 = vmul.f32 0.03125, %v99_v15 }
  0xa7   :  { %v104_v18 = vadd.f32 1e-06, %v102_v16 }
  0xa9   :  { %6041 = vrsqrt.f32 %v104_v18 }
  0xaf   :  { %v6040_v21 = vpop.eup %6039 }
  0xb0   :  { %v107_v23 = vmul.f32 %v6040_v21, %v6334_v1 }
  0xb2   :  { %v113_v27 = vmul.f32 %v112_v24, %v107_v23 }
  0xb3   :  { %v6042_v25 = vpop.eup %6041 }
  0xb4   :  { %v108_v26 = vmul.f32 %v6042_v25, %v6336_v2 }
  0xb6   :  { %v114_v28 = vmul.f32 %v112_v24, %v108_v26 }
  0xb8   :  { %v115_v29 = vpack.c.bf16 %v114_v28, %v113_v27 }
  0xba   :  { %5590 = vmatmul.mubr.msk.bf16.vlgmr.msra.gmra.mrb[0].mxu0 %vm93_vm0, %v115_v29  ;;  %5598 = vmatmul.mubr.msk.bf16.vlgmr.msra.gmra.mrb[0].mxu1 %vm93_vm0, %v115_v29 }
  0xbb   :  { %5603 = vmatprep.mubr.msk.f32.mxu1 %vm6207_vm1, %v6206_v9  ;;  %5613 = vmatprep.mubr.msk.f32.mxu0 %vm6207_vm1, %v6206_v9 }
 0x18d   :  { %v6384_v30 = vpop.f32.mrb[0].mxu0  ;;  %v6386_v31 = vpop.f32.mrb[0].mxu1 }
 0x18e   :  { %400 = vrot.lane.b32.xlu0 %v6386_v31, %s6208_s22  ;;  %v5591_v32 = vpop.f32.mrb[1].mxu0  ;;  %v5599_v33 = vpop.f32.mrb[1].mxu1  ;;  %5602 = vmatpush3.xpose.msk.msra.mxu1 %vm225_vm2, %v6386_v31 }
 0x18f   :  { %v6392_v34 = vpop.f32.mrb[2].mxu0  ;;  %v6394_v35 = vpop.f32.mrb[2].mxu1  ;;  %5606 = vmatprep.subr.mxu1 %v6206_v9 }
 0x190   :  { %v5592_v36 = vpop.f32.mrb[3].mxu0  ;;  %v5600_v37 = vpop.f32.mrb[3].mxu1 }
 0x191   :  { %5604 = vmatmul.mubr.msk.f32.vlgmr.msra.gmra.mrb[4].mxu1 %vm225_vm2, %v6384_v30 }
 0x192   :  { %5607 = vmatpush3.xpose.msk.msra.mxu1 %vm225_vm2, %v6394_v35  ;;  %5608 = vmatprep.mubr.msk.f32.mxu1 %vm6207_vm1, %v6206_v9 }
 0x193   :  { %5616 = vmatprep.subr.mxu1 %v6206_v9 }
 0x195   :  { %5609 = vmatmul.mubr.msk.f32.vlgmr.msra.gmra.mrb[6].mxu1 %vm225_vm2, %v6392_v34 }
 0x196   :  { %5618 = vmatprep.mubr.msk.f32.mxu1 %vm6207_vm1, %v6206_v9 }
 0x200   :  { %v401_v38 = vpop.permute.xlu0 %400 }
 0x201   :  { %5612 = vmatpush3.msra.mxu0 %v401_v38 }
 0x202   :  { %5621 = vmatprep.subr.mxu0 %v6206_v9 }
 0x264   :  { %v298_v40 = vpop.f32.mrb[4].mxu1 }
 0x265   :  { %v299_v41 = vadd.f32 %v298_v40, %v87_v39  ;;  %v5605_v42 = vpop.f32.mrb[5].mxu1 }
 0x267   :  { %v378_v43 = vsel %vm225_vm2, %v299_v41, -inf }
 0x268   :  { %379 = vmax.xlane.f32.xlu1 %v378_v43  ;;  %v374_v44 = vpop.f32.mrb[6].mxu1 }
 0x269   :  { %v375_v45 = vadd.f32 %v374_v44, %v87_v39  ;;  %v5610_v46 = vpop.f32.mrb[7].mxu1 }
 0x26b   :  { %v381_v47 = vsel %vm225_vm2, %v375_v45, -inf }
 0x26c   :  { %382 = vmax.xlane.f32.xlu1 %v381_v47 }
 0x27d   :  { %476 = vrot.lane.b32.xlu1 %v6394_v35, %s6208_s22 }
 0x281   :  { %554 = vrot.lane.b32.xlu1 %v6386_v31, %s6209_s2 }
 0x285   :  { %632 = vrot.lane.b32.xlu1 %v6394_v35, %s6209_s2 }
 0x2f5   :  { %v380_v48 = vpop.xlane.xlu1 %379 }
 0x2f6   :  { %v384_v49 = vsub.f32 %v299_v41, %v380_v48 }
 0x2f8   :  { %v386_v50 = vmul.f32 1.442695, %v384_v49 }
 0x2f9   :  { %v383_v51 = vpop.xlane.xlu1 %382 }
 0x2fa   :  { %6043 = vpow2.f32 %v386_v50  ;;  %v385_v52 = vsub.f32 %v375_v45, %v383_v51 }
 0x2fc   :  { %v388_v53 = vmul.f32 1.442695, %v385_v52  ;;  %v89_v52 = vld [vmem:[%s7207_s24 + $0x10] sm:$0xff] }
 0x2fd   :  { %v477_v54 = vpop.permute.xlu1 %476 }
 0x2fe   :  { %6045 = vpow2.f32 %v388_v53  ;;  %5617 = vmatpush3.msra.mxu1 %v477_v54 }
 0x2ff   :  { %5626 = vmatprep.subr.mxu1 %v6206_v9 }
 0x301   :  { %v555_v59 = vpop.permute.xlu1 %554 }
 0x304   :  { %v6044_v55 = vpop.eup %6043 }
 0x305   :  { %v390_v56 = vsel %vm225_vm2, %v6044_v55, 0.0  ;;  %v633_v60 = vpop.permute.xlu1 %632 }
 0x306   :  { %391 = vadd.xlane.f32.xlu0 %v390_v56 }
 0x308   :  { %v6046_v57 = vpop.eup %6045 }
 0x309   :  { %v393_v58 = vsel %vm225_vm2, %v6046_v57, 0.0 }
 0x30a   :  { %394 = vadd.xlane.f32.xlu1 %v393_v58 }
 0x31b   :  { %630 = vrot.lane.b32.xlu1 %v6392_v34, %s6209_s2 }
 0x31c   :  { %552 = vrot.lane.b32.xlu0 %v6384_v30, %s6209_s2 }
 0x393   :  { %v392_v61 = vpop.xlane.xlu0 %391 }
 0x394   :  { %6047 = vrcp.f32 %v392_v61 }
 0x397   :  { %v395_v62 = vpop.xlane.xlu1 %394  ;;  %v553_v5 = vpop.permute.xlu0 %552 }
 0x398   :  { %6049 = vrcp.f32 %v395_v62 }
 0x39b   :  { %v631_v6 = vpop.permute.xlu1 %630 }
 0x39e   :  { %v6048_v63 = vpop.eup %6047 }
 0x39f   :  { %v398_v0 = vmul.f32 %v6048_v63, %v6044_v55 }
 0x3a1   :  { %5614 = vmatmul.mubr.msk.f32.vlgmr.msra.gmra.mrb[4].mxu0 %vm225_vm2, %v398_v0 }
 0x3a2   :  { %v6050_v3 = vpop.eup %6049  ;;  %5622 = vmatpush3.xpose.msk.msra.mxu0 %vm225_vm2, %v555_v59  ;;  %5623 = vmatprep.mubr.msk.f32.mxu0 %vm6207_vm1, %v6206_v9 }
 0x3a3   :  { %v399_v4 = vmul.f32 %v6050_v3, %v6046_v57  ;;  %5631 = vmatprep.subr.mxu0 %v6206_v9 }
 0x3a5   :  { %5619 = vmatmul.mubr.msk.f32.vlgmr.msra.gmra.mrb[8].mxu1 %vm225_vm2, %v399_v4  ;;  %5624 = vmatmul.mubr.msk.f32.vlgmr.msra.gmra.mrb[6].mxu0 %vm225_vm2, %v553_v5 }
 0x3a6   :  { %5627 = vmatpush3.xpose.msk.msra.mxu1 %vm225_vm2, %v633_v60  ;;  %5628 = vmatprep.mubr.msk.f32.mxu1 %vm6207_vm1, %v6206_v9 }
 0x3a7   :  { %5636 = vmatprep.subr.mxu1 %v6206_v9  ;;  %5633 = vmatprep.mubr.msk.f32.mxu0 %vm6207_vm1, %v6206_v9 }
 0x3a9   :  { %5629 = vmatmul.mubr.msk.f32.vlgmr.msra.gmra.mrb[10].mxu1 %vm225_vm2, %v631_v6 }
 0x3aa   :  { %5638 = vmatprep.mubr.msk.f32.mxu1 %vm6207_vm1, %v6206_v9 }
 0x474   :  { %v6443_v7 = vpop.f32.mrb[4].mxu0 }
 0x475   :  { %v5615_v8 = vpop.f32.mrb[5].mxu0 }
 0x478   :  { %v6448_v11 = vpop.f32.mrb[8].mxu1  ;;  %v626_v12 = vpop.f32.mrb[6].mxu0 }
 0x479   :  { %v627_v13 = vadd.f32 %v626_v12, %v88_v10  ;;  %v5620_v14 = vpop.f32.mrb[9].mxu1  ;;  %v5625_v15 = vpop.f32.mrb[7].mxu0 }
 0x47b   :  { %v708_v16 = vsel %vm225_vm2, %v627_v13, -inf }
 0x47c   :  { %v704_v18 = vpop.f32.mrb[10].mxu1  ;;  %709 = vmax.xlane.f32.xlu0 %v708_v16 }
 0x47d   :  { %v705_v20 = vadd.f32 %v704_v18, %v88_v10  ;;  %v5630_v21 = vpop.f32.mrb[11].mxu1 }
 0x47f   :  { %v711_v23 = vsel %vm225_vm2, %v705_v20, -inf }
 0x480   :  { %712 = vmax.xlane.f32.xlu1 %v711_v23 }
 0x491   :  { %806 = vrot.lane.b32.xlu1 %v6394_v35, %s6210_s27 }
 0x492   :  { %730 = vrot.lane.b32.xlu0 %v6386_v31, %s6210_s27 }
 0x495   :  { %884 = vrot.lane.b32.xlu1 %v6386_v31, %s6211_s3 }
 0x499   :  { %962 = vrot.lane.b32.xlu1 %v6394_v35, %s6211_s3 }
 0x49d   :  { %960 = vrot.lane.b32.xlu1 %v6392_v34, %s6211_s3 }
 0x509   :  { %v710_v24 = vpop.xlane.xlu0 %709 }
 0x50a   :  { %v714_v25 = vsub.f32 %v627_v13, %v710_v24 }
 0x50c   :  { %v716_v26 = vmul.f32 1.442695, %v714_v25 }
 0x50d   :  { %v713_v27 = vpop.xlane.xlu1 %712  ;;  %v731_v28 = vpop.permute.xlu0 %730 }
 0x50e   :  { %6051 = vpow2.f32 %v716_v26  ;;  %v715_v29 = vsub.f32 %v705_v20, %v713_v27  ;;  %5632 = vmatpush3.msra.mxu0 %v731_v28 }
 0x50f   :  { %5641 = vmatprep.subr.mxu0 %v6206_v9 }
 0x510   :  { %v718_v32 = vmul.f32 1.442695, %v715_v29 }
 0x511   :  { %v807_v33 = vpop.permute.xlu1 %806 }
 0x512   :  { %6053 = vpow2.f32 %v718_v32  ;;  %5637 = vmatpush3.msra.mxu1 %v807_v33  ;;  %v90_v32 = vld [vmem:[%s7207_s24 + $0x18] sm:$0xff] }
 0x513   :  { %5646 = vmatprep.subr.mxu1 %v6206_v9 }
 0x515   :  { %v885_v42 = vpop.permute.xlu1 %884 }
 0x518   :  { %v6052_v36 = vpop.eup %6051 }
 0x519   :  { %v720_v37 = vsel %vm225_vm2, %v6052_v36, 0.0  ;;  %v963_v46 = vpop.permute.xlu1 %962 }
 0x51a   :  { %721 = vadd.xlane.f32.xlu0 %v720_v37 }
 0x51c   :  { %v6054_v38 = vpop.eup %6053 }
 0x51d   :  { %v723_v39 = vsel %vm225_vm2, %v6054_v38, 0.0  ;;  %v961_v49 = vpop.permute.xlu1 %960 }
 0x51e   :  { %724 = vadd.xlane.f32.xlu0 %v723_v39 }
 0x534   :  { %882 = vrot.lane.b32.xlu0 %v6384_v30, %s6211_s3 }
 0x5a7   :  { %v722_v40 = vpop.xlane.xlu0 %721 }
 0x5a8   :  { %6055 = vrcp.f32 %v722_v40 }
 0x5ab   :  { %v725_v41 = vpop.xlane.xlu0 %724 }
 0x5ac   :  { %6057 = vrcp.f32 %v725_v41 }
 0x5af   :  { %v883_v48 = vpop.permute.xlu0 %882 }
 0x5b2   :  { %v6056_v43 = vpop.eup %6055 }
 0x5b3   :  { %v728_v44 = vmul.f32 %v6056_v43, %v6052_v36 }
 0x5b5   :  { %5634 = vmatmul.mubr.msk.f32.vlgmr.msra.gmra.mrb[8].mxu0 %vm225_vm2, %v728_v44 }
 0x5b6   :  { %v6058_v45 = vpop.eup %6057  ;;  %5642 = vmatpush3.xpose.msk.msra.mxu0 %vm225_vm2, %v885_v42  ;;  %5643 = vmatprep.mubr.msk.f32.mxu0 %vm6207_vm1, %v6206_v9 }
 0x5b7   :  { %v729_v47 = vmul.f32 %v6058_v45, %v6054_v38  ;;  %5651 = vmatprep.subr.mxu0 %v6206_v9 }
 0x5b9   :  { %5639 = vmatmul.mubr.msk.f32.vlgmr.msra.gmra.mrb[12].mxu1 %vm225_vm2, %v729_v47  ;;  %5644 = vmatmul.mubr.msk.f32.vlgmr.msra.gmra.mrb[10].mxu0 %vm225_vm2, %v883_v48 }
 0x5ba   :  { %5647 = vmatpush3.xpose.msk.msra.mxu1 %vm225_vm2, %v963_v46  ;;  %5648 = vmatprep.mubr.msk.f32.mxu1 %vm6207_vm1, %v6206_v9 }
 0x5bb   :  { %5656 = vmatprep.subr.mxu1 %v6206_v9  ;;  %5653 = vmatprep.mubr.msk.f32.mxu0 %vm6207_vm1, %v6206_v9 }
 0x5bd   :  { %5649 = vmatmul.mubr.msk.f32.vlgmr.msra.gmra.mrb[14].mxu1 %vm225_vm2, %v961_v49 }
 0x5be   :  { %5658 = vmatprep.mubr.msk.f32.mxu1 %vm6207_vm1, %v6206_v9 }
 0x688   :  { %v6484_v50 = vpop.f32.mrb[8].mxu0 }
 0x689   :  { %v5635_v51 = vpop.f32.mrb[9].mxu0 }
 0x68c   :  { %v6489_v53 = vpop.f32.mrb[12].mxu1  ;;  %v956_v54 = vpop.f32.mrb[10].mxu0 }
 0x68d   :  { %v5960_v55 = vpack.i.bf16 %v6489_v53, %v6484_v50  ;;  %v957_v56 = vadd.f32 %v956_v54, %v89_v52  ;;  %v5640_v57 = vpop.f32.mrb[13].mxu1  ;;  %v5645_v58 = vpop.f32.mrb[11].mxu0 }
 0x68f   :  { %v1038_v59 = vsel %vm225_vm2, %v957_v56, -inf }
 0x690   :  { %v1034_v60 = vpop.f32.mrb[14].mxu1  ;;  %1039 = vmax.xlane.f32.xlu0 %v1038_v59 }
 0x691   :  { %v1035_v61 = vadd.f32 %v1034_v60, %v89_v52  ;;  %v5650_v62 = vpop.f32.mrb[15].mxu1 }
 0x693   :  { %v1041_v63 = vsel %vm225_vm2, %v1035_v61, -inf }
 0x694   :  { %1042 = vmax.xlane.f32.xlu1 %v1041_v63  ;;  %v6012_v63 = vld [vmem:[%s7183_s9 + $0x8] sm:$0xff]  }
 0x6a5   :  { %1136 = vrot.lane.b32.xlu1 %v6394_v35, %s6212_s0 }
 0x6a6   :  { %1060 = vrot.lane.b32.xlu0 %v6386_v31, %s6212_s0 }
 0x6a9   :  { %1214 = vrot.lane.b32.xlu1 %v6386_v31, %s6213_s4 }
 0x6ad   :  { %1292 = vrot.lane.b32.xlu1 %v6394_v35, %s6213_s4 }
 0x6b1   :  { %1290 = vrot.lane.b32.xlu1 %v6392_v34, %s6213_s4 }
 0x71d   :  { %v1040_v0 = vpop.xlane.xlu0 %1039 }
 0x71e   :  { %v1044_v3 = vsub.f32 %v957_v56, %v1040_v0 }
 0x720   :  { %v1046_v4 = vmul.f32 1.442695, %v1044_v3 }
 0x721   :  { %v1043_v5 = vpop.xlane.xlu1 %1042  ;;  %v1061_v6 = vpop.permute.xlu0 %1060 }
 0x722   :  { %6059 = vpow2.f32 %v1046_v4  ;;  %v1045_v8 = vsub.f32 %v1035_v61, %v1043_v5  ;;  %5652 = vmatpush3.msra.mxu0 %v1061_v6 }
 0x723   :  { %5661 = vmatprep.subr.mxu0 %v6206_v9 }
 0x724   :  { %v1048_v10 = vmul.f32 1.442695, %v1045_v8 }
 0x725   :  { %v1137_v12 = vpop.permute.xlu1 %1136 }
 0x726   :  { %6061 = vpow2.f32 %v1048_v10  ;;  %5657 = vmatpush3.msra.mxu1 %v1137_v12 }
 0x727   :  { %5666 = vmatprep.subr.mxu1 %v6206_v9 }
 0x729   :  { %v1215_v20 = vpop.permute.xlu1 %1214 }
 0x72c   :  { %v6060_v13 = vpop.eup %6059 }
 0x72d   :  { %v1050_v14 = vsel %vm225_vm2, %v6060_v13, 0.0  ;;  %v1293_v25 = vpop.permute.xlu1 %1292 }
 0x72e   :  { %1051 = vadd.xlane.f32.xlu0 %v1050_v14 }
 0x730   :  { %v6062_v34 = vpop.eup %6061 }
 0x731   :  { %v1053_v15 = vsel %vm225_vm2, %v6062_v34, 0.0  ;;  %v1291_v27 = vpop.permute.xlu1 %1290 }
 0x732   :  { %1054 = vadd.xlane.f32.xlu0 %v1053_v15 }
 0x748   :  { %1212 = vrot.lane.b32.xlu0 %v6384_v30, %s6213_s4 }
 0x7bb   :  { %v1052_v16 = vpop.xlane.xlu0 %1051 }
 0x7bc   :  { %6063 = vrcp.f32 %v1052_v16 }
 0x7bf   :  { %v1055_v18 = vpop.xlane.xlu0 %1054 }
 0x7c0   :  { %6065 = vrcp.f32 %v1055_v18 }
 0x7c3   :  { %v1213_v30 = vpop.permute.xlu0 %1212 }
 0x7c6   :  { %v6064_v21 = vpop.eup %6063 }
 0x7c7   :  { %v1058_v23 = vmul.f32 %v6064_v21, %v6060_v13 }
 0x7c9   :  { %5654 = vmatmul.mubr.msk.f32.vlgmr.msra.gmra.mrb[12].mxu0 %vm225_vm2, %v1058_v23 }
 0x7ca   :  { %v6066_v24 = vpop.eup %6065  ;;  %5662 = vmatpush3.xpose.msk.msra.mxu0 %vm225_vm2, %v1215_v20  ;;  %5663 = vmatprep.mubr.msk.f32.mxu0 %vm6207_vm1, %v6206_v9 }
 0x7cb   :  { %v1059_v26 = vmul.f32 %v6066_v24, %v6062_v34  ;;  %5671 = vmatprep.subr.mxu0 %v6206_v9 }
 0x7cd   :  { %5659 = vmatmul.mubr.msk.f32.vlgmr.msra.gmra.mrb[16].mxu1 %vm225_vm2, %v1059_v26  ;;  %5664 = vmatmul.mubr.msk.f32.vlgmr.msra.gmra.mrb[14].mxu0 %vm225_vm2, %v1213_v30 }
 0x7ce   :  { %5667 = vmatpush3.xpose.msk.msra.mxu1 %vm225_vm2, %v1293_v25  ;;  %5668 = vmatprep.mubr.msk.f32.mxu1 %vm6207_vm1, %v6206_v9 }
 0x7cf   :  { %5676 = vmatprep.subr.mxu1 %v6206_v9  ;;  %5673 = vmatprep.mubr.msk.f32.mxu0 %vm6207_vm1, %v6206_v9 }
 0x7d1   :  { %5669 = vmatmul.mubr.msk.f32.vlgmr.msra.gmra.mrb[18].mxu1 %vm225_vm2, %v1291_v27 }
 0x7d2   :  { %5678 = vmatprep.mubr.msk.f32.mxu1 %vm6207_vm1, %v6206_v9 }
 0x89c   :  { %v1132_v28 = vpop.f32.mrb[12].mxu0 }
 0x89d   :  { %v5655_v29 = vpop.f32.mrb[13].mxu0 }
 0x8a0   :  { %v1208_v33 = vpop.f32.mrb[16].mxu1  ;;  %v1286_v36 = vpop.f32.mrb[14].mxu0 }
 0x8a1   :  { %v5965_v37 = vpack.i.bf16 %v1208_v33, %v1132_v28  ;;  %v1287_v38 = vadd.f32 %v1286_v36, %v90_v32  ;;  %v5660_v39 = vpop.f32.mrb[17].mxu1  ;;  %v5665_v40 = vpop.f32.mrb[15].mxu0 }
 0x8a3   :  { %v1368_v41 = vsel %vm225_vm2, %v1287_v38, -inf }
 0x8a4   :  { %v1364_v42 = vpop.f32.mrb[18].mxu1  ;;  %1369 = vmax.xlane.f32.xlu0 %v1368_v41 }
 0x8a5   :  { %v1365_v43 = vadd.f32 %v1364_v42, %v90_v32  ;;  %v5670_v44 = vpop.f32.mrb[19].mxu1 }
 0x8a6   :  { %v6013_v44 = vld [vmem:[%s7184_s10] sm:$0xff]  }
 0x8a7   :  { %v1371_v45 = vsel %vm225_vm2, %v1365_v43, -inf }
 0x8a8   :  { %1372 = vmax.xlane.f32.xlu1 %v1371_v45  ;;  %v6014_v45 = vld [vmem:[%s7184_s10 + $0x8] sm:$0xff]  }
 0x8b9   :  { %1466 = vrot.lane.b32.xlu1 %v6394_v35, %s6214_s7 }
 0x8bd   :  { %5961 = vrot.lane.b32.xlu1 %v5960_v55, %s6215_s8 }
 0x8c1   :  { %5966 = vrot.lane.b32.xlu1 %v5965_v37, %s6216_s23 }
 0x931   :  { %v1370_v46 = vpop.xlane.xlu0 %1369 }
 0x932   :  { %v1374_v47 = vsub.f32 %v1287_v38, %v1370_v46 }
 0x934   :  { %v1376_v48 = vmul.f32 1.442695, %v1374_v47 }
 0x935   :  { %v1373_v49 = vpop.xlane.xlu1 %1372 }
 0x936   :  { %6067 = vpow2.f32 %v1376_v48  ;;  %v1375_v51 = vsub.f32 %v1365_v43, %v1373_v49 }
 0x938   :  { %v1378_v52 = vmul.f32 1.442695, %v1375_v51 }
 0x939   :  { %v1467_v54 = vpop.permute.xlu1 %1466 }
 0x93a   :  { %6069 = vpow2.f32 %v1378_v52  ;;  %5677 = vmatpush3.msra.mxu1 %v1467_v54 }
 0x93b   :  { %5689 = vmatprep.subr.bf16.mxu1 %v6206_v9 }
 0x93d   :  { %v5962_v8 = vpop.permute.xlu1 %5961 }
 0x93e   :  { %v5964_v12 = vunpack.i.h.bf16 %v5962_v8  ;;  %v5963_v13 = vunpack.i.l.bf16 %v5962_v8 }
 0x940   :  { %v6068_v35 = vpop.eup %6067  ;;  %v1567_v16 = vsel %vm225_vm2, %v6448_v11, %v5964_v12  ;;  %v1566_v18 = vsel %vm225_vm2, %v6443_v7, %v5963_v13  ;;  %v5440_v7 = vld [vmem:[%s7208_s30] sm:$0xff]   ;;  %v6016_v12 = vld [vmem:[%s7186_s12 + $0x8] sm:$0xff]  }
 0x941   :  { %v1380_v56 = vsel %vm225_vm2, %v6068_v35, 0.0  ;;  %v5967_v10 = vpop.permute.xlu1 %5966  ;;  %v6577_v29 = vunpack.c.l.bf16 %v5440_v7  ;;  %v6589_v40 = vunpack.c.h.bf16 %v5440_v7 }
 0x942   :  { %1381 = vadd.xlane.f32.xlu0 %v1380_v56  ;;  %v5969_v14 = vunpack.i.h.bf16 %v5967_v10  ;;  %v5968_v34 = vunpack.i.l.bf16 %v5967_v10 }
 0x943   :  { %v1868_v42 = vmul.f32 %v6589_v40, %v6589_v40 }
 0x944   :  { %v6070_v50 = vpop.eup %6069  ;;  %v1570_v23 = vsel %vm1568_vm3, %v1567_v16, %v5969_v14  ;;  %v1569_v24 = vsel %vm1568_vm3, %v1566_v18, %v5968_v34  ;;  %v6018_v16 = vld [vmem:[%s7187_s13 + $0x8] sm:$0xff]   ;;  %v6019_v18 = vld [vmem:[%s7185_s11] sm:$0xff]  }
 0x945   :  { %v1383_v53 = vsel %vm225_vm2, %v6070_v50, 0.0  ;;  %v1872_v43 = vsel %vm93_vm0, %v1868_v42, 0.0 }
 0x946   :  { %1384 = vadd.xlane.f32.xlu0 %v1383_v53 }
 0x95c   :  { %1390 = vrot.lane.b32.xlu0 %v6386_v31, %s6214_s7  ;;  %v6011_v31 = vld [vmem:[%s7183_s9] sm:$0xff]  }
 0x9cf   :  { %v1382_v55 = vpop.xlane.xlu0 %1381 }
 0x9d0   :  { %6071 = vrcp.f32 %v1382_v55  ;;  %v1663_v55 = vsub.s32 1, %v6367_v19 }
 0x9d3   :  { %v1385_v57 = vpop.xlane.xlu0 %1384 }
 0x9d4   :  { %6073 = vrcp.f32 %v1385_v57 }
 0x9d7   :  { %v1391_v58 = vpop.permute.xlu0 %1390 }
 0x9d8   :  { %5672 = vmatpush3.msra.mxu0 %v1391_v58 }
 0x9d9   :  { %5681 = vmatprep.subr.bf16.mxu0 %v6206_v9 }
 0x9da   :  { %v6072_v59 = vpop.eup %6071 }
 0x9db   :  { %v1388_v60 = vmul.f32 %v6072_v59, %v6068_v35 }
 0x9dd   :  { %5674 = vmatmul.mubr.msk.f32.vlgmr.msra.gmra.mrb[16].mxu0 %vm225_vm2, %v1388_v60  ;;  %v1664_v60 = vrot.slane %v6373_v22, %v1663_v55 }
 0x9de   :  { %v6074_v61 = vpop.eup %6073  ;;  %5685 = vmatprep.mubr.msk.bf16.mxu0 %vm6207_vm1, %v6206_v9  ;;  %5682 = vmatpush3.bf16.msra.mxu0 %v6011_v31  ;;  %v1885_v31 = vsub.s32 3, %v6367_v19 }
 0x9df   :  { %v1389_v62 = vmul.f32 %v6074_v61, %v6070_v50  ;;  %5683 = vmatprep.subr.bf16.mxu0 %v6206_v9 }
 0x9e0   :  { %v1886_v8 = vrot.slane %v6373_v22, %v1885_v31  ;;  %v6017_v22 = vld [vmem:[%s7187_s13] sm:$0xff]   ;;  %s7211_s13 = sld [smem:[#allocation10_spill]] }
 0x9e1   :  { %5679 = vmatmul.mubr.msk.f32.vlgmr.msra.gmra.mrb[20].mxu1 %vm225_vm2, %v1389_v62 }
 0x9e2   :  { %5693 = vmatprep.mubr.msk.bf16.mxu1 %vm6207_vm1, %v6206_v9  ;;  %5684 = vmatpush3.bf16.msra.mxu0 %v6012_v63 }
 0x9e3   :  { %5697 = vmatprep.subr.bf16.mxu0 %v6206_v9  ;;  %5690 = vmatpush3.bf16.msra.mxu1 %v6013_v44 }
 0x9e4   :  { %5691 = vmatprep.subr.bf16.mxu1 %v6206_v9 }
 0x9e7   :  { %5692 = vmatpush3.bf16.msra.mxu1 %v6014_v45 }
 0x9e8   :  { %5709 = vmatprep.subr.bf16.mxu1 %v6206_v9 }
 0xab0   :  { %v1462_v0 = vpop.f32.mrb[16].mxu0 }
 0xab1   :  { %v5675_v3 = vpop.f32.mrb[17].mxu0 }
 0xab4   :  { %v1538_v4 = vpop.f32.mrb[20].mxu1 }
 0xab5   :  { %v5970_v5 = vpack.i.bf16 %v1538_v4, %v1462_v0  ;;  %v5680_v6 = vpop.f32.mrb[21].mxu1  ;;  %v6015_v4 = vld [vmem:[%s7186_s12] sm:$0xff]  }
 0xab7   :  { %5971 = vrot.lane.b32.xlu0 %v5970_v5, %s6217_s28 }
 0xb29   :  { %v5972_v15 = vpop.permute.xlu0 %5971 }
 0xb2a   :  { %v5974_v20 = vunpack.i.h.bf16 %v5972_v15  ;;  %v5973_v21 = vunpack.i.l.bf16 %v5972_v15 }
 0xb2c   :  { %v1573_v25 = vsel %vm1571_vm4, %v1570_v23, %v5974_v20  ;;  %v1572_v26 = vsel %vm1571_vm4, %v1569_v24, %v5973_v21  ;;  %v6020_v20 = vld [vmem:[%s7185_s11 + $0x8] sm:$0xff]   ;;  %v6021_v21 = vld [vmem:[%s7185_s11 + $0x10] sm:$0xff]   ;;  %v6022_v23 = vld [vmem:[%s7185_s11 + $0x18] sm:$0xff]  }
 0xb2d   :  { %v1574_v30 = vpack.c.bf16 %v1573_v25, %v1572_v26 }
 0xb2f   :  { %5686 = vmatmul.mubr.msk.bf16.vlgmr.msra.gmra.mrb[20].mxu0 %vm93_vm0, %v1574_v30 }
 0xb30   :  { %5705 = vmatprep.mubr.msk.bf16.mxu0 %vm6207_vm1, %v6206_v9  ;;  %5698 = vmatpush3.bf16.msra.mxu0 %v6019_v18 }
 0xb31   :  { %5699 = vmatprep.subr.bf16.mxu0 %v6206_v9 }
 0xb34   :  { %5700 = vmatpush3.bf16.msra.mxu0 %v6020_v20 }
 0xb35   :  { %5701 = vmatprep.subr.bf16.mxu0 %v6206_v9 }
 0xb38   :  { %5702 = vmatpush3.bf16.msra.mxu0 %v6021_v21 }
 0xb39   :  { %5703 = vmatprep.subr.bf16.mxu0 %v6206_v9 }
 0xb3c   :  { %5704 = vmatpush3.bf16.msra.mxu0 %v6022_v23 }
 0xb3d   :  { %5725 = vmatprep.subr.mxu0 %v6206_v9 }
 0xc02   :  { %v1624_v11 = vpop.f32.mrb[20].mxu0 }
 0xc03   :  { %v6575_v27 = vadd.f32 %v6334_v1, %v1624_v11  ;;  %v5687_v28 = vpop.f32.mrb[21].mxu0  ;;  %v1867_v1 = vmul.f32 %v6577_v29, %v6577_v29 }
 0xc04   :  { %v1627_v32 = vpop.f32.mrb[22].mxu0 }
 0xc05   :  { %v6580_v33 = vadd.f32 %v6336_v2, %v1627_v32  ;;  %v5688_v36 = vpop.f32.mrb[23].mxu0  ;;  %v1645_v37 = vmul.f32 %v6575_v27, %v6575_v27  ;;  %v1869_v2 = vsel %vm93_vm0, %v1867_v1, 0.0 }
 0xc07   :  { %v1647_v38 = vsel %vm93_vm0, %v1645_v37, 0.0  ;;  %v1646_v39 = vmul.f32 %v6580_v33, %v6580_v33 }
 0xc08   :  { %1648 = vadd.xlane.f32.xlu1 %v1647_v38 }
 0xc09   :  { %v1650_v41 = vsel %vm93_vm0, %v1646_v39, 0.0 }
 0xc0a   :  { %1651 = vadd.xlane.f32.xlu0 %v1650_v41 }
 0xc0e   :  { %1870 = vadd.xlane.f32.xlu0 %v1869_v2 }
 0xc12   :  { %1873 = vadd.xlane.f32.xlu0 %v1872_v43 }
 0xc95   :  { %v1649_v46 = vpop.xlane.xlu1 %1648 }
 0xc96   :  { %v1653_v47 = vmul.f32 0.03125, %v1649_v46 }
 0xc97   :  { %v1652_v48 = vpop.xlane.xlu0 %1651 }
 0xc98   :  { %v1655_v49 = vadd.f32 1e-06, %v1653_v47  ;;  %v1654_v51 = vmul.f32 0.03125, %v1652_v48 }
 0xc9a   :  { %6075 = vrsqrt.f32 %v1655_v49  ;;  %v1656_v52 = vadd.f32 1e-06, %v1654_v51 }
 0xc9b   :  { %v1871_v54 = vpop.xlane.xlu0 %1870 }
 0xc9c   :  { %6077 = vrsqrt.f32 %v1656_v52  ;;  %v1875_v35 = vmul.f32 0.03125, %v1871_v54 }
 0xc9e   :  { %v1877_v56 = vadd.f32 1e-06, %v1875_v35 }
 0xc9f   :  { %v1874_v50 = vpop.xlane.xlu0 %1873 }
 0xca0   :  { %6079 = vrsqrt.f32 %v1877_v56  ;;  %v1876_v53 = vmul.f32 0.03125, %v1874_v50 }
 0xca2   :  { %v1878_v57 = vadd.f32 1e-06, %v1876_v53 }
 0xca4   :  { %v6076_v58 = vpop.eup %6075  ;;  %6081 = vrsqrt.f32 %v1878_v57 }
 0xca5   :  { %v1659_v59 = vmul.f32 %v6076_v58, %v6575_v27 }
 0xca6   :  { %v6078_v61 = vpop.eup %6077 }
 0xca7   :  { %v1660_v62 = vmul.f32 %v6078_v61, %v6580_v33  ;;  %v1665_v63 = vmul.f32 %v1664_v60, %v1659_v59  ;;  %v1863_v61 = vld [vmem:[%s7209_s1] sm:$0xff] }
 0xca9   :  { %v1666_v0 = vmul.f32 %v1664_v60, %v1660_v62 }
 0xcaa   :  { %v6080_v3 = vpop.eup %6079 }
 0xcab   :  { %v1881_v5 = vmul.f32 %v6080_v3, %v6577_v29  ;;  %v1667_v6 = vpack.c.bf16 %v1666_v0, %v1665_v63 }
 0xcad   :  { %5694 = vmatmul.mubr.msk.bf16.vlgmr.msra.gmra.mrb[24].mxu1 %vm93_vm0, %v1667_v6  ;;  %v1887_v14 = vmul.f32 %v1886_v8, %v1881_v5 }
 0xcae   :  { %v6082_v10 = vpop.eup %6081  ;;  %5710 = vmatpush3.bf16.msra.mxu1 %v6015_v4  ;;  %5713 = vmatprep.mubr.msk.bf16.mxu1 %vm6207_vm1, %v6206_v9 }
 0xcaf   :  { %v1882_v13 = vmul.f32 %v6082_v10, %v6589_v40  ;;  %5711 = vmatprep.subr.bf16.mxu1 %v6206_v9 }
 0xcb1   :  { %v1888_v34 = vmul.f32 %v1886_v8, %v1882_v13 }
 0xcb2   :  { %5712 = vmatpush3.bf16.msra.mxu1 %v6016_v12 }
 0xcb3   :  { %v1889_v15 = vpack.c.bf16 %v1888_v34, %v1887_v14  ;;  %5717 = vmatprep.subr.bf16.mxu1 %v6206_v9 }
 0xcb5   :  { %5714 = vmatmul.mubr.msk.bf16.vlgmr.msra.gmra.mrb[28].mxu1 %vm93_vm0, %v1889_v15 }
 0xcb6   :  { %5718 = vmatpush3.bf16.msra.mxu1 %v6017_v22  ;;  %5721 = vmatprep.mubr.msk.bf16.mxu1 %vm6207_vm1, %v6206_v9 }
 0xcb7   :  { %5719 = vmatprep.subr.bf16.mxu1 %v6206_v9 }
 0xcba   :  { %5720 = vmatpush3.bf16.msra.mxu1 %v6018_v16 }
 0xcbb   :  { %5730 = vmatprep.subr.mxu1 %v6206_v9 }
 0xcbd   :  { %5722 = vmatmul.mubr.msk.bf16.vlgmr.msra.gmra.mrb[32].mxu1 %vm93_vm0, %v1889_v15 }
 0xcbe   :  { %5732 = vmatprep.mubr.msk.f32.mxu1 %vm6207_vm1, %v6206_v9 }
 0xd80   :  { %v1717_v24 = vpop.f32.mrb[24].mxu1 }
 0xd81   :  { %1744 = vrot.lane.b32.xlu1 %v1717_v24, %s6218_s5  ;;  %v5695_v25 = vpop.f32.mrb[25].mxu1  ;;  %v1726_v1 = vmul.f32 0.044715, %v1717_v24  ;;  %v1724_v35 = vmul.f32 0.5, %v1717_v24 }
 0xd82   :  { %v1720_v26 = vpop.f32.mrb[26].mxu1 }
 0xd83   :  { %1746 = vrot.lane.b32.xlu0 %v1720_v26, %s6218_s5  ;;  %v5696_v30 = vpop.f32.mrb[27].mxu1  ;;  %v1727_v41 = vmul.f32 0.044715, %v1720_v26  ;;  %v1728_v2 = vmul.f32 %v1726_v1, %v1717_v24  ;;  %v1725_v56 = vmul.f32 0.5, %v1720_v26 }
 0xd85   :  { %v1729_v42 = vmul.f32 %v1727_v41, %v1720_v26  ;;  %v1730_v43 = vmul.f32 %v1728_v2, %v1717_v24 }
 0xd87   :  { %v1731_v44 = vmul.f32 %v1729_v42, %v1720_v26  ;;  %v1732_v45 = vadd.f32 %v1730_v43, %v1717_v24 }
 0xd88   :  { %v6655_v7 = vpop.f32.mrb[28].mxu1 }
 0xd89   :  { %v5715_v11 = vpop.f32.mrb[29].mxu1  ;;  %v1733_v46 = vadd.f32 %v1731_v44, %v1720_v26  ;;  %v1734_v47 = vmul.f32 0.7978846, %v1732_v45 }
 0xd8a   :  { %v6657_v28 = vpop.f32.mrb[30].mxu1 }
 0xd8b   :  { %v5716_v32 = vpop.f32.mrb[31].mxu1  ;;  %v1735_v48 = vmul.f32 0.7978846, %v1733_v46  ;;  %6083 = vtanh.f32 %v1734_v47  ;;  %v1864_v46 = vld [vmem:[%s7209_s1 + $0x8] sm:$0xff] }
 0xd8d   :  { %6085 = vtanh.f32 %v1735_v48 }
 0xd90   :  { %v6659_v36 = vpop.f32.mrb[32].mxu1 }
 0xd91   :  { %v5723_v37 = vpop.f32.mrb[33].mxu1 }
 0xd92   :  { %v6661_v38 = vpop.f32.mrb[34].mxu1 }
 0xd93   :  { %5731 = vmatpush3.xpose.msk.msra.mxu1 %vm225_vm2, %v6661_v38  ;;  %v5724_v39 = vpop.f32.mrb[35].mxu1 }
 0xd94   :  { %5740 = vmatprep.subr.mxu1 %v6206_v9 }
 0xd95   :  { %v6084_v49 = vpop.eup %6083 }
 0xd96   :  { %5733 = vmatmul.mubr.msk.f32.vlgmr.msra.gmra.mrb[22].mxu1 %vm225_vm2, %v6657_v28  ;;  %v1738_v52 = vadd.f32 1.0, %v6084_v49 }
 0xd97   :  { %5742 = vmatprep.mubr.msk.f32.mxu1 %vm6207_vm1, %v6206_v9  ;;  %v6086_v51 = vpop.eup %6085 }
 0xd98   :  { %v1739_v54 = vadd.f32 1.0, %v6086_v51  ;;  %v1740_v53 = vmul.f32 %v1738_v52, %v1724_v35 }
 0xd9a   :  { %v1741_v55 = vmul.f32 %v1739_v54, %v1725_v56 }
 0xdf3   :  { %v1745_v50 = vpop.permute.xlu1 %1744 }
 0xdf4   :  { %v1750_v58 = vmul.f32 %v1745_v50, %v1740_v53 }
 0xdf5   :  { %v1747_v57 = vpop.permute.xlu0 %1746 }
 0xdf6   :  { %v1751_v59 = vmul.f32 %v1747_v57, %v1741_v55 }
 0xdf8   :  { %v1752_v60 = vpack.c.bf16 %v1751_v59, %v1750_v58 }
 0xdfa   :  { %5706 = vmatmul.mubr.msk.bf16.vlgmr.msra.gmra.mrb[24].mxu0 %vm1777_vm5, %v1752_v60 }
 0xdfb   :  { %5726 = vmatpush3.xpose.msk.msra.mxu0 %vm225_vm2, %v6659_v36  ;;  %5727 = vmatprep.mubr.msk.f32.mxu0 %vm6207_vm1, %v6206_v9 }
 0xdfc   :  { %5735 = vmatprep.subr.mxu0 %v6206_v9 }
 0xe02   :  { %5728 = vmatmul.mubr.msk.f32.vlgmr.msra.gmra.mrb[18].mxu0 %vm225_vm2, %v6655_v7 }
 0xe03   :  { %5737 = vmatprep.mubr.msk.f32.mxu0 %vm6207_vm1, %v6206_v9 }
 0xe69   :  { %v2147_v62 = vpop.f32.mrb[22].mxu1 }
 0xe6a   :  { %v2148_v31 = vadd.f32 %v2147_v62, %v1863_v61  ;;  %v5734_v63 = vpop.f32.mrb[23].mxu1 }
 0xe6c   :  { %v2154_v0 = vsel %vm225_vm2, %v2148_v31, -inf }
 0xe6d   :  { %2155 = vmax.xlane.f32.xlu0 %v2154_v0 }
 0xe83   :  { %2249 = vrot.lane.b32.xlu0 %v6661_v38, %s6208_s22 }
 0xecd   :  { %v6686_v3 = vpop.f32.mrb[24].mxu0 }
 0xece   :  { %v5707_v4 = vpop.f32.mrb[25].mxu0 }
 0xecf   :  { %v6688_v5 = vpop.f32.mrb[26].mxu0 }
 0xed0   :  { %v5708_v6 = vpop.f32.mrb[27].mxu0 }
 0xed5   :  { %v2071_v8 = vpop.f32.mrb[18].mxu0 }
 0xed6   :  { %v2072_v10 = vadd.f32 %v2071_v8, %v1863_v61  ;;  %v5729_v12 = vpop.f32.mrb[19].mxu0 }
 0xed8   :  { %v2151_v13 = vsel %vm225_vm2, %v2072_v10, -inf }
 0xed9   :  { %2152 = vmax.xlane.f32.xlu1 %v2151_v13 }
 0xeea   :  { %2173 = vrot.lane.b32.xlu1 %v6659_v36, %s6208_s22 }
 0xeee   :  { %2327 = vrot.lane.b32.xlu1 %v6659_v36, %s6209_s2 }
 0xef2   :  { %2405 = vrot.lane.b32.xlu1 %v6661_v38, %s6209_s2 }
 0xefa   :  { %v2156_v14 = vpop.xlane.xlu0 %2155 }
 0xefb   :  { %v2158_v34 = vsub.f32 %v2148_v31, %v2156_v14 }
 0xefd   :  { %v2161_v22 = vmul.f32 1.442695, %v2158_v34 }
 0xefe   :  { %v2250_v15 = vpop.permute.xlu0 %2249 }
 0xeff   :  { %6087 = vpow2.f32 %v2161_v22  ;;  %5741 = vmatpush3.msra.mxu1 %v2250_v15 }
 0xf00   :  { %5750 = vmatprep.subr.mxu1 %v6206_v9 }
 0xf09   :  { %v6088_v16 = vpop.eup %6087 }
 0xf0a   :  { %v2166_v18 = vsel %vm225_vm2, %v6088_v16, 0.0 }
 0xf0b   :  { %2167 = vadd.xlane.f32.xlu0 %v2166_v18 }
 0xf21   :  { %2403 = vrot.lane.b32.xlu0 %v6657_v28, %s6209_s2 }
 0xf66   :  { %v2153_v20 = vpop.xlane.xlu1 %2152 }
 0xf67   :  { %v2157_v21 = vsub.f32 %v2072_v10, %v2153_v20 }
 0xf69   :  { %v2159_v23 = vmul.f32 1.442695, %v2157_v21 }
 0xf6a   :  { %v2174_v24 = vpop.permute.xlu1 %2173 }
 0xf6b   :  { %6089 = vpow2.f32 %v2159_v23  ;;  %5736 = vmatpush3.msra.mxu0 %v2174_v24  ;;  %v1865_v23 = vld [vmem:[%s7209_s1 + $0x10] sm:$0xff] }
 0xf6c   :  { %5745 = vmatprep.subr.mxu0 %v6206_v9 }
 0xf6e   :  { %v2328_v11 = vpop.permute.xlu1 %2327 }
 0xf72   :  { %v2406_v39 = vpop.permute.xlu1 %2405 }
 0xf75   :  { %v6090_v25 = vpop.eup %6089 }
 0xf76   :  { %v2163_v26 = vsel %vm225_vm2, %v6090_v25, 0.0 }
 0xf77   :  { %2164 = vadd.xlane.f32.xlu1 %v2163_v26 }
 0xf88   :  { %2325 = vrot.lane.b32.xlu1 %v6655_v7, %s6209_s2 }
 0xf98   :  { %v2168_v30 = vpop.xlane.xlu0 %2167 }
 0xf99   :  { %6091 = vrcp.f32 %v2168_v30 }
 0xf9c   :  { %v2404_v1 = vpop.permute.xlu0 %2403 }
 0xfa3   :  { %v6092_v32 = vpop.eup %6091 }
 0xfa4   :  { %v2172_v37 = vmul.f32 %v6092_v32, %v6088_v16 }
 0xfa6   :  { %5743 = vmatmul.mubr.msk.f32.vlgmr.msra.gmra.mrb[36].mxu1 %vm225_vm2, %v2172_v37 }
 0xfa7   :  { %5751 = vmatpush3.xpose.msk.msra.mxu1 %vm225_vm2, %v2406_v39  ;;  %5752 = vmatprep.mubr.msk.f32.mxu1 %vm6207_vm1, %v6206_v9 }
 0xfa8   :  { %5760 = vmatprep.subr.mxu1 %v6206_v9 }
 0xfaa   :  { %5753 = vmatmul.mubr.msk.f32.vlgmr.msra.gmra.mrb[38].mxu1 %vm225_vm2, %v2404_v1 }
 0xfab   :  { %5762 = vmatprep.mubr.msk.f32.mxu1 %vm6207_vm1, %v6206_v9 }
0x1004   :  { %v2165_v41 = vpop.xlane.xlu1 %2164 }
0x1005   :  { %6093 = vrcp.f32 %v2165_v41 }
0x1008   :  { %v2326_v43 = vpop.permute.xlu1 %2325 }
0x100f   :  { %v6094_v2 = vpop.eup %6093 }
0x1010   :  { %v2171_v42 = vmul.f32 %v6094_v2, %v6090_v25 }
0x1012   :  { %5738 = vmatmul.mubr.msk.f32.vlgmr.msra.gmra.mrb[28].mxu0 %vm225_vm2, %v2171_v42 }
0x1013   :  { %5746 = vmatpush3.xpose.msk.msra.mxu0 %vm225_vm2, %v2328_v11  ;;  %5747 = vmatprep.mubr.msk.f32.mxu0 %vm6207_vm1, %v6206_v9 }
0x1014   :  { %5755 = vmatprep.subr.mxu0 %v6206_v9 }
0x1016   :  { %5748 = vmatmul.mubr.msk.f32.vlgmr.msra.gmra.mrb[30].mxu0 %vm225_vm2, %v2326_v43 }
0x1017   :  { %5757 = vmatprep.mubr.msk.f32.mxu0 %vm6207_vm1, %v6206_v9 }
0x1079   :  { %v6721_v44 = vpop.f32.mrb[36].mxu1 }
0x107a   :  { %v5744_v45 = vpop.f32.mrb[37].mxu1 }
0x107d   :  { %v2477_v47 = vpop.f32.mrb[38].mxu1 }
0x107e   :  { %v2478_v48 = vadd.f32 %v2477_v47, %v1864_v46  ;;  %v5754_v49 = vpop.f32.mrb[39].mxu1 }
0x1080   :  { %v2484_v51 = vsel %vm225_vm2, %v2478_v48, -inf }
0x1081   :  { %2485 = vmax.xlane.f32.xlu0 %v2484_v51 }
0x1097   :  { %2579 = vrot.lane.b32.xlu0 %v6661_v38, %s6210_s27 }
0x10e5   :  { %v6729_v52 = vpop.f32.mrb[28].mxu0 }
0x10e6   :  { %v5739_v54 = vpop.f32.mrb[29].mxu0 }
0x10e9   :  { %v2399_v35 = vpop.f32.mrb[30].mxu0 }
0x10ea   :  { %v2400_v56 = vadd.f32 %v2399_v35, %v1864_v46  ;;  %v5749_v50 = vpop.f32.mrb[31].mxu0 }
0x10ec   :  { %v2481_v53 = vsel %vm225_vm2, %v2400_v56, -inf }
0x10ed   :  { %2482 = vmax.xlane.f32.xlu1 %v2481_v53 }
0x10fe   :  { %2503 = vrot.lane.b32.xlu1 %v6659_v36, %s6210_s27 }
0x1102   :  { %2657 = vrot.lane.b32.xlu1 %v6659_v36, %s6211_s3 }
0x1106   :  { %2735 = vrot.lane.b32.xlu1 %v6661_v38, %s6211_s3 }
0x110a   :  { %2655 = vrot.lane.b32.xlu1 %v6655_v7, %s6211_s3 }
0x110e   :  { %v2486_v55 = vpop.xlane.xlu0 %2485 }
0x110f   :  { %v2488_v57 = vsub.f32 %v2478_v48, %v2486_v55 }
0x1111   :  { %v2491_v58 = vmul.f32 1.442695, %v2488_v57 }
0x1112   :  { %v2580_v59 = vpop.permute.xlu0 %2579 }
0x1113   :  { %6095 = vpow2.f32 %v2491_v58  ;;  %5761 = vmatpush3.msra.mxu1 %v2580_v59 }
0x1114   :  { %5770 = vmatprep.subr.mxu1 %v6206_v9 }
0x111d   :  { %v6096_v60 = vpop.eup %6095 }
0x111e   :  { %v2496_v61 = vsel %vm225_vm2, %v6096_v60, 0.0 }
0x111f   :  { %2497 = vadd.xlane.f32.xlu0 %v2496_v61 }
0x117a   :  { %v2483_v62 = vpop.xlane.xlu1 %2482 }
0x117b   :  { %v2487_v31 = vsub.f32 %v2400_v56, %v2483_v62 }
0x117d   :  { %v2489_v63 = vmul.f32 1.442695, %v2487_v31 }
0x117e   :  { %v2504_v0 = vpop.permute.xlu1 %2503 }
0x117f   :  { %6097 = vpow2.f32 %v2489_v63  ;;  %5756 = vmatpush3.msra.mxu0 %v2504_v0  ;;  %v1866_v0 = vld [vmem:[%s7209_s1 + $0x18] sm:$0xff] }
0x1180   :  { %5765 = vmatprep.subr.mxu0 %v6206_v9 }
0x1182   :  { %v2658_v10 = vpop.permute.xlu1 %2657 }
0x1186   :  { %v2736_v14 = vpop.permute.xlu1 %2735 }
0x1189   :  { %v6098_v4 = vpop.eup %6097 }
0x118a   :  { %v2493_v6 = vsel %vm225_vm2, %v6098_v4, 0.0  ;;  %v2656_v18 = vpop.permute.xlu1 %2655 }
0x118b   :  { %2494 = vadd.xlane.f32.xlu0 %v2493_v6 }
0x11a1   :  { %2733 = vrot.lane.b32.xlu0 %v6657_v28, %s6211_s3 }
0x11ac   :  { %v2498_v8 = vpop.xlane.xlu0 %2497 }
0x11ad   :  { %6099 = vrcp.f32 %v2498_v8 }
0x11b7   :  { %v6100_v12 = vpop.eup %6099 }
0x11b8   :  { %v2502_v13 = vmul.f32 %v6100_v12, %v6096_v60 }
0x11ba   :  { %5763 = vmatmul.mubr.msk.f32.vlgmr.msra.gmra.mrb[40].mxu1 %vm225_vm2, %v2502_v13 }
0x11bb   :  { %5771 = vmatpush3.xpose.msk.msra.mxu1 %vm225_vm2, %v2736_v14  ;;  %5772 = vmatprep.mubr.msk.f32.mxu1 %vm6207_vm1, %v6206_v9 }
0x11bc   :  { %5780 = vmatprep.subr.mxu1 %v6206_v9 }
0x1218   :  { %v2495_v34 = vpop.xlane.xlu0 %2494 }
0x1219   :  { %6101 = vrcp.f32 %v2495_v34 }
0x121c   :  { %v2734_v22 = vpop.permute.xlu0 %2733 }
0x121d   :  { %5773 = vmatmul.mubr.msk.f32.vlgmr.msra.gmra.mrb[42].mxu1 %vm225_vm2, %v2734_v22 }
0x121e   :  { %5782 = vmatprep.mubr.msk.f32.mxu1 %vm6207_vm1, %v6206_v9 }
0x1223   :  { %v6102_v15 = vpop.eup %6101 }
0x1224   :  { %v2501_v16 = vmul.f32 %v6102_v15, %v6098_v4 }
0x1226   :  { %5758 = vmatmul.mubr.msk.f32.vlgmr.msra.gmra.mrb[32].mxu0 %vm225_vm2, %v2501_v16 }
0x1227   :  { %5766 = vmatpush3.xpose.msk.msra.mxu0 %vm225_vm2, %v2658_v10  ;;  %5767 = vmatprep.mubr.msk.f32.mxu0 %vm6207_vm1, %v6206_v9 }
0x1228   :  { %5775 = vmatprep.subr.mxu0 %v6206_v9 }
0x122a   :  { %5768 = vmatmul.mubr.msk.f32.vlgmr.msra.gmra.mrb[34].mxu0 %vm225_vm2, %v2656_v18 }
0x122b   :  { %5777 = vmatprep.mubr.msk.f32.mxu0 %vm6207_vm1, %v6206_v9 }
0x128d   :  { %v6762_v20 = vpop.f32.mrb[40].mxu1 }
0x128e   :  { %v5764_v21 = vpop.f32.mrb[41].mxu1 }
0x12f0   :  { %v2807_v24 = vpop.f32.mrb[42].mxu1 }
0x12f1   :  { %v2808_v25 = vadd.f32 %v2807_v24, %v1865_v23  ;;  %v5774_v26 = vpop.f32.mrb[43].mxu1 }
0x12f3   :  { %v2814_v30 = vsel %vm225_vm2, %v2808_v25, -inf }
0x12f4   :  { %2815 = vmax.xlane.f32.xlu0 %v2814_v30 }
0x12f9   :  { %v6768_v11 = vpop.f32.mrb[32].mxu0 }
0x12fa   :  { %v5975_v32 = vpack.i.bf16 %v6762_v20, %v6768_v11  ;;  %v5759_v37 = vpop.f32.mrb[33].mxu0  ;;  %v6824_v11 = vadd.f32 %v6686_v3, %v6575_v27  ;;  %v6023_v3 = vld [vmem:[%s7188_s14] sm:$0xff]  }
0x12fd   :  { %v2729_v39 = vpop.f32.mrb[34].mxu0 }
0x12fe   :  { %v2730_v1 = vadd.f32 %v2729_v39, %v1865_v23  ;;  %v5769_v41 = vpop.f32.mrb[35].mxu0 }
0x1300   :  { %v2811_v2 = vsel %vm225_vm2, %v2730_v1, -inf }
0x1301   :  { %2812 = vmax.xlane.f32.xlu1 %v2811_v2 }
0x130a   :  { %2909 = vrot.lane.b32.xlu0 %v6661_v38, %s6212_s0 }
0x1312   :  { %2833 = vrot.lane.b32.xlu1 %v6659_v36, %s6212_s0 }
0x1316   :  { %2987 = vrot.lane.b32.xlu1 %v6659_v36, %s6213_s4 }
0x131a   :  { %3065 = vrot.lane.b32.xlu1 %v6661_v38, %s6213_s4 }
0x131e   :  { %2985 = vrot.lane.b32.xlu1 %v6655_v7, %s6213_s4 }
0x1381   :  { %v2816_v42 = vpop.xlane.xlu0 %2815 }
0x1382   :  { %v2818_v43 = vsub.f32 %v2808_v25, %v2816_v42 }
0x1384   :  { %v2821_v45 = vmul.f32 1.442695, %v2818_v43 }
0x1385   :  { %v2910_v46 = vpop.permute.xlu0 %2909 }
0x1386   :  { %6103 = vpow2.f32 %v2821_v45  ;;  %5781 = vmatpush3.msra.mxu1 %v2910_v46  ;;  %v6024_v46 = vld [vmem:[%s7188_s14 + $0x8] sm:$0xff]  }
0x1387   :  { %5790 = vmatprep.subr.mxu1 %v6206_v9 }
0x138e   :  { %v2813_v47 = vpop.xlane.xlu1 %2812 }
0x138f   :  { %v2817_v48 = vsub.f32 %v2730_v1, %v2813_v47 }
0x1390   :  { %v6104_v49 = vpop.eup %6103 }
0x1391   :  { %v2819_v51 = vmul.f32 1.442695, %v2817_v48  ;;  %v2826_v54 = vsel %vm225_vm2, %v6104_v49, 0.0 }
0x1392   :  { %2827 = vadd.xlane.f32.xlu0 %v2826_v54  ;;  %v2834_v35 = vpop.permute.xlu1 %2833 }
0x1393   :  { %6105 = vpow2.f32 %v2819_v51  ;;  %5776 = vmatpush3.msra.mxu0 %v2834_v35  ;;  %v1823_v35 = vadd.f32 %v6688_v5, %v6580_v33 }
0x1394   :  { %5785 = vmatprep.subr.mxu0 %v6206_v9 }
0x1396   :  { %v2988_v53 = vpop.permute.xlu1 %2987 }
0x139a   :  { %v3066_v59 = vpop.permute.xlu1 %3065 }
0x139d   :  { %v6106_v7 = vpop.eup %6105 }
0x139e   :  { %v2823_v56 = vsel %vm225_vm2, %v6106_v7, 0.0  ;;  %v2986_v62 = vpop.permute.xlu1 %2985 }
0x139f   :  { %2824 = vadd.xlane.f32.xlu0 %v2823_v56 }
0x13b5   :  { %3063 = vrot.lane.b32.xlu0 %v6657_v28, %s6213_s4 }
0x141f   :  { %v2828_v50 = vpop.xlane.xlu0 %2827 }
0x1420   :  { %6107 = vrcp.f32 %v2828_v50 }
0x142a   :  { %v6108_v55 = vpop.eup %6107 }
0x142b   :  { %v2832_v57 = vmul.f32 %v6108_v55, %v6104_v49 }
0x142c   :  { %v2825_v58 = vpop.xlane.xlu0 %2824 }
0x142d   :  { %6109 = vrcp.f32 %v2825_v58  ;;  %5783 = vmatmul.mubr.msk.f32.vlgmr.msra.gmra.mrb[44].mxu1 %vm225_vm2, %v2832_v57 }
0x142e   :  { %5791 = vmatpush3.xpose.msk.msra.mxu1 %vm225_vm2, %v3066_v59  ;;  %5792 = vmatprep.mubr.msk.f32.mxu1 %vm6207_vm1, %v6206_v9 }
0x142f   :  { %5800 = vmatprep.subr.mxu1 %v6206_v9 }
0x1430   :  { %v3064_v60 = vpop.permute.xlu0 %3063 }
0x1431   :  { %5793 = vmatmul.mubr.msk.f32.vlgmr.msra.gmra.mrb[46].mxu1 %vm225_vm2, %v3064_v60 }
0x1432   :  { %5802 = vmatprep.mubr.msk.f32.mxu1 %vm6207_vm1, %v6206_v9 }
0x1437   :  { %v6110_v28 = vpop.eup %6109 }
0x1438   :  { %v2831_v61 = vmul.f32 %v6110_v28, %v6106_v7  ;;  %v1825_v7 = vmul.f32 %v1823_v35, %v1823_v35 }
0x143a   :  { %5778 = vmatmul.mubr.msk.f32.vlgmr.msra.gmra.mrb[36].mxu0 %vm225_vm2, %v2831_v61  ;;  %v1829_v56 = vsel %vm93_vm0, %v1825_v7, 0.0 }
0x143b   :  { %5786 = vmatpush3.xpose.msk.msra.mxu0 %vm225_vm2, %v2988_v53  ;;  %5787 = vmatprep.mubr.msk.f32.mxu0 %vm6207_vm1, %v6206_v9 }
0x143c   :  { %5795 = vmatprep.subr.mxu0 %v6206_v9 }
0x143e   :  { %5788 = vmatmul.mubr.msk.f32.vlgmr.msra.gmra.mrb[38].mxu0 %vm225_vm2, %v2986_v62 }
0x143f   :  { %5797 = vmatprep.mubr.msk.f32.mxu0 %vm6207_vm1, %v6206_v9 }
0x1500   :  { %v2981_v31 = vpop.f32.mrb[44].mxu1 }
0x1501   :  { %v5784_v63 = vpop.f32.mrb[45].mxu1 }
0x1504   :  { %v3137_v4 = vpop.f32.mrb[46].mxu1 }
0x1505   :  { %v3138_v6 = vadd.f32 %v3137_v4, %v1866_v0  ;;  %v5794_v8 = vpop.f32.mrb[47].mxu1  ;;  %v6025_v4 = vld [vmem:[%s7190_s16] sm:$0xff]  }
0x1507   :  { %v3144_v10 = vsel %vm225_vm2, %v3138_v6, -inf }
0x1508   :  { %3145 = vmax.xlane.f32.xlu0 %v3144_v10 }
0x150d   :  { %v2905_v12 = vpop.f32.mrb[36].mxu0 }
0x150e   :  { %v5980_v13 = vpack.i.bf16 %v2981_v31, %v2905_v12  ;;  %v5779_v14 = vpop.f32.mrb[37].mxu0 }
0x1511   :  { %v3059_v34 = vpop.f32.mrb[38].mxu0 }
0x1512   :  { %v3060_v22 = vadd.f32 %v3059_v34, %v1866_v0  ;;  %v5789_v15 = vpop.f32.mrb[39].mxu0  ;;  %v1842_v34 = vsub.s32 2, %v6367_v19 }
0x1514   :  { %v3141_v16 = vsel %vm225_vm2, %v3060_v22, -inf }
0x1515   :  { %3142 = vmax.xlane.f32.xlu1 %v3141_v16  ;;  %v6872_v16 = vld [vmem:[%s7180_s6] sm:$0xff] }
0x1526   :  { %3163 = vrot.lane.b32.xlu1 %v6659_v36, %s6214_s7 }
0x152a   :  { %5976 = vrot.lane.b32.xlu1 %v5975_v32, %s6215_s8  ;;  %v1824_v32 = vmul.f32 %v6824_v11, %v6824_v11 }
0x152c   :  { %v1826_v1 = vsel %vm93_vm0, %v1824_v32, 0.0 }
0x152e   :  { %5981 = vrot.lane.b32.xlu1 %v5980_v13, %s6216_s23 }
0x1595   :  { %v3146_v18 = vpop.xlane.xlu0 %3145 }
0x1596   :  { %v3148_v21 = vsub.f32 %v3138_v6, %v3146_v18  ;;  %v1843_v18 = vrot.slane %v6872_v16, %v1842_v34 }
0x1598   :  { %v3151_v23 = vmul.f32 1.442695, %v3148_v21 }
0x159a   :  { %6111 = vpow2.f32 %v3151_v23 }
0x15a2   :  { %v3143_v24 = vpop.xlane.xlu1 %3142 }
0x15a3   :  { %v3147_v25 = vsub.f32 %v3060_v22, %v3143_v24 }
0x15a4   :  { %v6112_v26 = vpop.eup %6111 }
0x15a5   :  { %v3149_v30 = vmul.f32 1.442695, %v3147_v25  ;;  %v3156_v37 = vsel %vm225_vm2, %v6112_v26, 0.0 }
0x15a6   :  { %3157 = vadd.xlane.f32.xlu0 %v3156_v37  ;;  %v3164_v39 = vpop.permute.xlu1 %3163 }
0x15a7   :  { %6113 = vpow2.f32 %v3149_v30  ;;  %5796 = vmatpush3.msra.mxu0 %v3164_v39 }
0x15a8   :  { %5805 = vmatprep.subr.bf16.mxu0 %v6206_v9 }
0x15aa   :  { %v5977_v50 = vpop.permute.xlu1 %5976 }
0x15ab   :  { %v5979_v55 = vunpack.i.h.bf16 %v5977_v50  ;;  %v5978_v57 = vunpack.i.l.bf16 %v5977_v50 }
0x15ad   :  { %v3340_v28 = vsel %vm225_vm2, %v6721_v44, %v5979_v55  ;;  %v3339_v61 = vsel %vm225_vm2, %v6729_v52, %v5978_v57  ;;  %v6026_v44 = vld [vmem:[%s7190_s16 + $0x8] sm:$0xff]  }
0x15ae   :  { %v5982_v53 = vpop.permute.xlu1 %5981 }
0x15af   :  { %v5984_v58 = vunpack.i.h.bf16 %v5982_v53  ;;  %v5983_v59 = vunpack.i.l.bf16 %v5982_v53 }
0x15b1   :  { %v6114_v36 = vpop.eup %6113  ;;  %v3341_v33 = vsel %vm1568_vm3, %v3339_v61, %v5983_v59  ;;  %v3342_v5 = vsel %vm1568_vm3, %v3340_v28, %v5984_v58 }
0x15b2   :  { %v3153_v20 = vsel %vm225_vm2, %v6114_v36, 0.0 }
0x15b3   :  { %3154 = vadd.xlane.f32.xlu0 %v3153_v20 }
0x15c9   :  { %3239 = vrot.lane.b32.xlu0 %v6661_v38, %s6214_s7 }
0x15e8   :  { %1827 = vadd.xlane.f32.xlu0 %v1826_v1 }
0x1633   :  { %v3158_v41 = vpop.xlane.xlu0 %3157 }
0x1634   :  { %6115 = vrcp.f32 %v3158_v41 }
0x163e   :  { %v6116_v42 = vpop.eup %6115 }
0x163f   :  { %v3162_v43 = vmul.f32 %v6116_v42, %v6112_v26 }
0x1640   :  { %v3155_v2 = vpop.xlane.xlu0 %3154 }
0x1641   :  { %6117 = vrcp.f32 %v3155_v2 }
0x1644   :  { %v3240_v45 = vpop.permute.xlu0 %3239 }
0x1645   :  { %5801 = vmatpush3.msra.mxu1 %v3240_v45 }
0x1646   :  { %5803 = vmatmul.mubr.msk.f32.vlgmr.msra.gmra.mrb[48].mxu1 %vm225_vm2, %v3162_v43  ;;  %5813 = vmatprep.subr.bf16.mxu1 %v6206_v9 }
0x1647   :  { %5817 = vmatprep.mubr.msk.bf16.mxu1 %vm6207_vm1, %v6206_v9 }
0x164b   :  { %v6118_v27 = vpop.eup %6117 }
0x164c   :  { %v3161_v38 = vmul.f32 %v6118_v27, %v6114_v36 }
0x164e   :  { %5798 = vmatmul.mubr.msk.f32.vlgmr.msra.gmra.mrb[40].mxu0 %vm225_vm2, %v3161_v38 }
0x164f   :  { %5809 = vmatprep.mubr.msk.bf16.mxu0 %vm6207_vm1, %v6206_v9  ;;  %5806 = vmatpush3.bf16.msra.mxu0 %v6023_v3 }
0x1650   :  { %5807 = vmatprep.subr.bf16.mxu0 %v6206_v9 }
0x1653   :  { %5808 = vmatpush3.bf16.msra.mxu0 %v6024_v46 }
0x1654   :  { %5821 = vmatprep.subr.bf16.mxu0 %v6206_v9 }
0x1675   :  { %v1828_v52 = vpop.xlane.xlu0 %1827 }
0x1676   :  { %v1832_v8 = vmul.f32 0.03125, %v1828_v52 }
0x1678   :  { %v1834_v10 = vadd.f32 1e-06, %v1832_v8 }
0x167a   :  { %6119 = vrsqrt.f32 %v1834_v10 }
0x1684   :  { %v6120_v22 = vpop.eup %6119 }
0x1685   :  { %v1838_v15 = vmul.f32 %v6120_v22, %v6824_v11 }
0x1687   :  { %v1844_v24 = vmul.f32 %v1843_v18, %v1838_v15 }
0x1719   :  { %v3311_v47 = vpop.f32.mrb[48].mxu1 }
0x171a   :  { %v5804_v48 = vpop.f32.mrb[49].mxu1 }
0x1721   :  { %v3235_v49 = vpop.f32.mrb[40].mxu0 }
0x1722   :  { %v5985_v51 = vpack.i.bf16 %v3311_v47, %v3235_v49  ;;  %v5799_v54 = vpop.f32.mrb[41].mxu0 }
0x1724   :  { %5986 = vrot.lane.b32.xlu1 %v5985_v51, %s6217_s28  ;;  %v3434_v51 = vsub.s32 4, %v6367_v19 }
0x1726   :  { %v3435_v7 = vrot.slane %v6872_v16, %v3434_v51 }
0x1748   :  { %1830 = vadd.xlane.f32.xlu1 %v1829_v56 }
0x1796   :  { %v5987_v60 = vpop.permute.xlu1 %5986 }
0x1797   :  { %v5989_v62 = vunpack.i.h.bf16 %v5987_v60  ;;  %v5988_v31 = vunpack.i.l.bf16 %v5987_v60 }
0x1799   :  { %v3344_v63 = vsel %vm1571_vm4, %v3342_v5, %v5989_v62  ;;  %v3343_v0 = vsel %vm1571_vm4, %v3341_v33, %v5988_v31 }
0x179a   :  { %v3345_v6 = vpack.c.bf16 %v3344_v63, %v3343_v0 }
0x179c   :  { %5810 = vmatmul.mubr.msk.bf16.vlgmr.msra.gmra.mrb[44].mxu0 %vm93_vm0, %v3345_v6 }
0x179d   :  { %5822 = vmatpush3.bf16.msra.mxu0 %v6025_v4  ;;  %5825 = vmatprep.mubr.msk.bf16.mxu0 %vm6207_vm1, %v6206_v9 }
0x179e   :  { %5823 = vmatprep.subr.bf16.mxu0 %v6206_v9 }
0x17a1   :  { %5824 = vmatpush3.bf16.msra.mxu0 %v6026_v44 }
0x17a2   :  { %5839 = vmatprep.subr.mxu0 %v6206_v9 }
0x17d5   :  { %v1831_v12 = vpop.xlane.xlu1 %1830 }
0x17d6   :  { %v1833_v13 = vmul.f32 0.03125, %v1831_v12 }
0x17d8   :  { %v1835_v14 = vadd.f32 1e-06, %v1833_v13 }
0x17da   :  { %6121 = vrsqrt.f32 %v1835_v14 }
0x17e4   :  { %v6122_v21 = vpop.eup %6121 }
0x17e5   :  { %v1839_v23 = vmul.f32 %v6122_v21, %v1823_v35 }
0x17e7   :  { %v1845_v25 = vmul.f32 %v1843_v18, %v1839_v23 }
0x17e9   :  { %v1846_v26 = vpack.c.bf16 %v1845_v25, %v1844_v24 }
0x17eb   :  { %5826 = vmatmul.mubr.msk.bf16.vlgmr.msra.gmra.mrb[48].mxu0 %vm93_vm0, %v1846_v26 }
0x17ec   :  { %5841 = vmatprep.mubr.msk.f32.mxu0 %vm6207_vm1, %v6206_v9 }
0x186f   :  { %v3395_v30 = vpop.f32.mrb[44].mxu0 }
0x1870   :  { %v6879_v37 = vadd.f32 %v6577_v29, %v3395_v30  ;;  %v5811_v39 = vpop.f32.mrb[45].mxu0  ;;  %v6027_v29 = vld [vmem:[%s7189_s15] sm:$0xff]  }
0x1871   :  { %v3398_v36 = vpop.f32.mrb[46].mxu0  ;;  %5814 = vmatpush3.bf16.msra.mxu1 %v6027_v29 }
0x1872   :  { %v6882_v20 = vadd.f32 %v6589_v40, %v3398_v36  ;;  %v5812_v11 = vpop.f32.mrb[47].mxu0  ;;  %v3416_v32 = vmul.f32 %v6879_v37, %v6879_v37  ;;  %5815 = vmatprep.subr.bf16.mxu1 %v6206_v9  ;;  %v6028_v40 = vld [vmem:[%s7189_s15 + $0x8] sm:$0xff]   ;;  %s6220_s15 = smov [#allocation2]  }
0x1874   :  { %v3418_v1 = vsel %vm93_vm0, %v3416_v32, 0.0  ;;  %v3417_v41 = vmul.f32 %v6882_v20, %v6882_v20 }
0x1875   :  { %3419 = vadd.xlane.f32.xlu0 %v3418_v1  ;;  %5816 = vmatpush3.bf16.msra.mxu1 %v6028_v40 }
0x1876   :  { %v3421_v2 = vsel %vm93_vm0, %v3417_v41, 0.0  ;;  %5829 = vmatprep.subr.mxu1 %v6206_v9 }
0x1879   :  { %3422 = vadd.xlane.f32.xlu0 %v3421_v2 }
0x18be   :  { %v6898_v42 = vpop.f32.mrb[48].mxu0 }
0x18bf   :  { %v5827_v43 = vpop.f32.mrb[49].mxu0 }
0x18c0   :  { %v6900_v45 = vpop.f32.mrb[50].mxu0 }
0x18c1   :  { %v5828_v27 = vpop.f32.mrb[51].mxu0 }
0x1902   :  { %v3420_v38 = vpop.xlane.xlu0 %3419 }
0x1903   :  { %v3424_v3 = vmul.f32 0.03125, %v3420_v38 }
0x1905   :  { %v3426_v46 = vadd.f32 1e-06, %v3424_v3 }
0x1906   :  { %v3423_v47 = vpop.xlane.xlu0 %3422 }
0x1907   :  { %6123 = vrsqrt.f32 %v3426_v46  ;;  %v3425_v48 = vmul.f32 0.03125, %v3423_v47 }
0x1909   :  { %v3427_v49 = vadd.f32 1e-06, %v3425_v48 }
0x190b   :  { %6125 = vrsqrt.f32 %v3427_v49 }
0x1911   :  { %v6124_v54 = vpop.eup %6123 }
0x1912   :  { %v3430_v35 = vmul.f32 %v6124_v54, %v6879_v37 }
0x1914   :  { %v3436_v53 = vmul.f32 %v3435_v7, %v3430_v35 }
0x1915   :  { %v6126_v56 = vpop.eup %6125 }
0x1916   :  { %v3431_v50 = vmul.f32 %v6126_v56, %v6882_v20 }
0x1918   :  { %v3437_v55 = vmul.f32 %v3435_v7, %v3431_v50 }
0x191a   :  { %v3438_v57 = vpack.c.bf16 %v3437_v55, %v3436_v53 }
0x191c   :  { %5818 = vmatmul.mubr.msk.bf16.vlgmr.msra.gmra.mrb[52].mxu1 %vm93_vm0, %v3438_v57 }
0x191d   :  { %5830 = vmatpush3.xpose.msk.msra.mxu1 %vm225_vm2, %v6898_v42  ;;  %5831 = vmatprep.mubr.msk.f32.mxu1 %vm6207_vm1, %v6206_v9 }
0x191e   :  { %5834 = vmatprep.subr.mxu1 %v6206_v9 }
0x19ef   :  { %v6912_v58 = vpop.f32.mrb[52].mxu1 }
0x19f0   :  { %v5819_v59 = vpop.f32.mrb[53].mxu1  ;;  %5832 = vmatmul.mubr.msk.f32.vlgmr.msra.gmra.mrb[50].mxu1 %vm225_vm2, %v6912_v58 }
0x19f1   :  { %5835 = vmatpush3.xpose.msk.msra.mxu1 %vm225_vm2, %v6900_v45  ;;  %v6918_v60 = vpop.f32.mrb[54].mxu1  ;;  %5836 = vmatprep.mubr.msk.f32.mxu1 %vm6207_vm1, %v6206_v9 }
0x19f2   :  { %v5820_v28 = vpop.f32.mrb[55].mxu1  ;;  %5844 = vmatprep.subr.mxu1 %v6206_v9 }
0x19f4   :  { %5837 = vmatmul.mubr.msk.f32.vlgmr.msra.gmra.mrb[56].mxu1 %vm225_vm2, %v6918_v60 }
0x19f5   :  { %5846 = vmatprep.mubr.msk.f32.mxu1 %vm6207_vm1, %v6206_v9 }
0x1ac3   :  { %v3623_v61 = vpop.f32.mrb[50].mxu1 }
0x1ac4   :  { %v5833_v62 = vpop.f32.mrb[51].mxu1  ;;  %v3703_v31 = vsel %vm225_vm2, %v3623_v61, -inf }
0x1ac5   :  { %3704 = vmax.xlane.f32.xlu0 %v3703_v31 }
0x1ac7   :  { %v3699_v33 = vpop.f32.mrb[56].mxu1 }
0x1ac8   :  { %v5838_v5 = vpop.f32.mrb[57].mxu1  ;;  %v3706_v63 = vsel %vm225_vm2, %v3699_v33, -inf }
0x1ac9   :  { %3707 = vmax.xlane.f32.xlu1 %v3706_v63 }
0x1ada   :  { %3801 = vrot.lane.b32.xlu1 %v6900_v45, %s6208_s22 }
0x1adb   :  { %3725 = vrot.lane.b32.xlu0 %v6898_v42, %s6208_s22  ;;  %s5309_s22 = sshll.u32 %s6220_s15, 4  ;;  %s5310_s22 = int_to_ptr.vmem [resolvable:$true] %s5309_s22 }
0x1adc   :  { %p6187_p1 = scmp.lt.s32.totalorder %s5310_s22, %s5310_s22 }
0x1ade   :  { %3879 = vrot.lane.b32.xlu1 %v6898_v42, %s6209_s2 }
0x1ae2   :  { %3957 = vrot.lane.b32.xlu1 %v6900_v45, %s6209_s2 }
0x1b52   :  { %v3705_v0 = vpop.xlane.xlu0 %3704 }
0x1b53   :  { %v3709_v4 = vsub.f32 %v3623_v61, %v3705_v0 }
0x1b55   :  { %v3711_v6 = vmul.f32 1.442695, %v3709_v4 }
0x1b56   :  { %v3726_v44 = vpop.permute.xlu0 %3725  ;;  %v3708_v52 = vpop.xlane.xlu1 %3707 }
0x1b57   :  { %6127 = vpow2.f32 %v3711_v6  ;;  %v3710_v8 = vsub.f32 %v3699_v33, %v3708_v52  ;;  %5840 = vmatpush3.msra.mxu0 %v3726_v44 }
0x1b58   :  { %5849 = vmatprep.subr.mxu0 %v6206_v9 }
0x1b59   :  { %v3713_v10 = vmul.f32 1.442695, %v3710_v8 }
0x1b5a   :  { %v3802_v12 = vpop.permute.xlu1 %3801 }
0x1b5b   :  { %6129 = vpow2.f32 %v3713_v10  ;;  %5845 = vmatpush3.msra.mxu1 %v3802_v12 }
0x1b5c   :  { %5854 = vmatprep.subr.mxu1 %v6206_v9 }
0x1b5e   :  { %v3880_v15 = vpop.permute.xlu1 %3879 }
0x1b61   :  { %v6128_v13 = vpop.eup %6127 }
0x1b62   :  { %v3715_v14 = vsel %vm225_vm2, %v6128_v13, 0.0  ;;  %v3958_v18 = vpop.permute.xlu1 %3957 }
0x1b63   :  { %3716 = vadd.xlane.f32.xlu0 %v3715_v14 }
0x1b65   :  { %v6130_v34 = vpop.eup %6129 }
0x1b66   :  { %v3718_v22 = vsel %vm225_vm2, %v6130_v34, 0.0 }
0x1b67   :  { %3719 = vadd.xlane.f32.xlu1 %v3718_v22 }
0x1b78   :  { %3955 = vrot.lane.b32.xlu1 %v6918_v60, %s6209_s2 }
0x1b79   :  { %3877 = vrot.lane.b32.xlu0 %v6912_v58, %s6209_s2  ;;  %s6182_s2 = scalar_lea.vmem %s5310_s22, 16 }
0x1b7a   :  { %p6183_p0 = scmp.ne.s32.totalorder %s5310_s22, %s6182_s2 }
0x1bf0   :  { %v3717_v21 = vpop.xlane.xlu0 %3716 }
0x1bf1   :  { %6131 = vrcp.f32 %v3717_v21 }
0x1bf4   :  { %v3720_v23 = vpop.xlane.xlu1 %3719  ;;  %v3878_v39 = vpop.permute.xlu0 %3877 }
0x1bf5   :  { %6133 = vrcp.f32 %v3720_v23 }
0x1bf8   :  { %v3956_v36 = vpop.permute.xlu1 %3955 }
0x1bfb   :  { %v6132_v24 = vpop.eup %6131 }
0x1bfc   :  { %v3723_v25 = vmul.f32 %v6132_v24, %v6128_v13 }
0x1bfe   :  { %5842 = vmatmul.mubr.msk.f32.vlgmr.msra.gmra.mrb[42].mxu0 %vm225_vm2, %v3723_v25 }
0x1bff   :  { %v6134_v26 = vpop.eup %6133  ;;  %5850 = vmatpush3.xpose.msk.msra.mxu0 %vm225_vm2, %v3880_v15  ;;  %5851 = vmatprep.mubr.msk.f32.mxu0 %vm6207_vm1, %v6206_v9 }
0x1c00   :  { %v3724_v30 = vmul.f32 %v6134_v26, %v6130_v34  ;;  %5859 = vmatprep.subr.mxu0 %v6206_v9 }
0x1c02   :  { %5847 = vmatmul.mubr.msk.f32.vlgmr.msra.gmra.mrb[58].mxu1 %vm225_vm2, %v3724_v30  ;;  %5852 = vmatmul.mubr.msk.f32.vlgmr.msra.gmra.mrb[52].mxu0 %vm225_vm2, %v3878_v39 }
0x1c03   :  { %5855 = vmatpush3.xpose.msk.msra.mxu1 %vm225_vm2, %v3958_v18  ;;  %5856 = vmatprep.mubr.msk.f32.mxu1 %vm6207_vm1, %v6206_v9 }
0x1c04   :  { %5864 = vmatprep.subr.mxu1 %v6206_v9  ;;  %5861 = vmatprep.mubr.msk.f32.mxu0 %vm6207_vm1, %v6206_v9 }
0x1c06   :  { %5857 = vmatmul.mubr.msk.f32.vlgmr.msra.gmra.mrb[60].mxu1 %vm225_vm2, %v3956_v36 }
0x1c07   :  { %5866 = vmatprep.mubr.msk.f32.mxu1 %vm6207_vm1, %v6206_v9 }
0x1cd1   :  { %v6961_v11 = vpop.f32.mrb[42].mxu0 }
0x1cd2   :  { %v5843_v32 = vpop.f32.mrb[43].mxu0 }
0x1cd5   :  { %v6963_v1 = vpop.f32.mrb[58].mxu1  ;;  %v3951_v41 = vpop.f32.mrb[52].mxu0 }
0x1cd6   :  { %v5848_v2 = vpop.f32.mrb[59].mxu1  ;;  %v5853_v29 = vpop.f32.mrb[53].mxu0  ;;  %v4033_v40 = vsel %vm225_vm2, %v3951_v41, -inf }
0x1cd7   :  { %4034 = vmax.xlane.f32.xlu0 %v4033_v40 }
0x1cd9   :  { %v4029_v43 = vpop.f32.mrb[60].mxu1 }
0x1cda   :  { %v5858_v27 = vpop.f32.mrb[61].mxu1  ;;  %v4036_v38 = vsel %vm225_vm2, %v4029_v43, -inf }
0x1cdb   :  { %4037 = vmax.xlane.f32.xlu1 %v4036_v38 }
0x1cec   :  { %4131 = vrot.lane.b32.xlu1 %v6900_v45, %s6210_s27 }
0x1ced   :  { %4055 = vrot.lane.b32.xlu0 %v6898_v42, %s6210_s27  ;;  %s6186_s27 = scalar_lea.vmem %s5310_s22, 32 }
0x1cee   :  { %p6188_p2 = scmp.lt.s32.totalorder %s6186_s27, %s6182_s2 }
0x1cf0   :  { %4209 = vrot.lane.b32.xlu1 %v6898_v42, %s6211_s3  ;;  %p6189_p3 = por %p6188_p2, %p6187_p1 }
0x1cf2   :  { %p6190_p4 = pnand %p6189_p3, %p6183_p0 }
0x1cf4   :  { %4287 = vrot.lane.b32.xlu1 %v6900_v45, %s6211_s3 }
0x1cf8   :  { %4285 = vrot.lane.b32.xlu1 %v6918_v60, %s6211_s3 }
0x1d64   :  { %v4035_v3 = vpop.xlane.xlu0 %4034 }
0x1d65   :  { %v4039_v46 = vsub.f32 %v3951_v41, %v4035_v3 }
0x1d67   :  { %v4041_v47 = vmul.f32 1.442695, %v4039_v46 }
0x1d68   :  { %v4038_v48 = vpop.xlane.xlu1 %4037  ;;  %v4056_v49 = vpop.permute.xlu0 %4055 }
0x1d69   :  { %6135 = vpow2.f32 %v4041_v47  ;;  %v4040_v51 = vsub.f32 %v4029_v43, %v4038_v48  ;;  %5860 = vmatpush3.msra.mxu0 %v4056_v49 }
0x1d6a   :  { %5869 = vmatprep.subr.mxu0 %v6206_v9 }
0x1d6b   :  { %v4043_v54 = vmul.f32 1.442695, %v4040_v51 }
0x1d6c   :  { %v4132_v35 = vpop.permute.xlu1 %4131 }
0x1d6d   :  { %6137 = vpow2.f32 %v4043_v54  ;;  %5865 = vmatpush3.msra.mxu1 %v4132_v35 }
0x1d6e   :  { %5874 = vmatprep.subr.mxu1 %v6206_v9 }
0x1d70   :  { %v4210_v59 = vpop.permute.xlu1 %4209 }
0x1d73   :  { %v6136_v7 = vpop.eup %6135 }
0x1d74   :  { %v4045_v56 = vsel %vm225_vm2, %v6136_v7, 0.0  ;;  %v4288_v31 = vpop.permute.xlu1 %4287 }
0x1d75   :  { %4046 = vadd.xlane.f32.xlu0 %v4045_v56 }
0x1d77   :  { %v6138_v50 = vpop.eup %6137 }
0x1d78   :  { %v4048_v53 = vsel %vm225_vm2, %v6138_v50, 0.0  ;;  %v4286_v63 = vpop.permute.xlu1 %4285 }
0x1d79   :  { %4049 = vadd.xlane.f32.xlu0 %v4048_v53 }
0x1d8f   :  { %4207 = vrot.lane.b32.xlu0 %v6912_v58, %s6211_s3 }
0x1e02   :  { %v4047_v55 = vpop.xlane.xlu0 %4046 }
0x1e03   :  { %6139 = vrcp.f32 %v4047_v55 }
0x1e06   :  { %v4050_v57 = vpop.xlane.xlu0 %4049 }
0x1e07   :  { %6141 = vrcp.f32 %v4050_v57 }
0x1e0a   :  { %v4208_v5 = vpop.permute.xlu0 %4207 }
0x1e0d   :  { %v6140_v28 = vpop.eup %6139 }
0x1e0e   :  { %v4053_v61 = vmul.f32 %v6140_v28, %v6136_v7 }
0x1e10   :  { %5862 = vmatmul.mubr.msk.f32.vlgmr.msra.gmra.mrb[54].mxu0 %vm225_vm2, %v4053_v61 }
0x1e11   :  { %v6142_v62 = vpop.eup %6141  ;;  %5870 = vmatpush3.xpose.msk.msra.mxu0 %vm225_vm2, %v4210_v59  ;;  %5871 = vmatprep.mubr.msk.f32.mxu0 %vm6207_vm1, %v6206_v9 }
0x1e12   :  { %v4054_v33 = vmul.f32 %v6142_v62, %v6138_v50  ;;  %5879 = vmatprep.subr.mxu0 %v6206_v9 }
0x1e14   :  { %5867 = vmatmul.mubr.msk.f32.vlgmr.msra.gmra.mrb[62].mxu1 %vm225_vm2, %v4054_v33  ;;  %5872 = vmatmul.mubr.msk.f32.vlgmr.msra.gmra.mrb[56].mxu0 %vm225_vm2, %v4208_v5 }
0x1e15   :  { %5875 = vmatpush3.xpose.msk.msra.mxu1 %vm225_vm2, %v4288_v31  ;;  %5876 = vmatprep.mubr.msk.f32.mxu1 %vm6207_vm1, %v6206_v9 }
0x1e16   :  { %5884 = vmatprep.subr.mxu1 %v6206_v9  ;;  %5881 = vmatprep.mubr.msk.f32.mxu0 %vm6207_vm1, %v6206_v9 }
0x1e18   :  { %5877 = vmatmul.mubr.msk.f32.vlgmr.msra.gmra.mrb[64].mxu1 %vm225_vm2, %v4286_v63 }
0x1e19   :  { %5886 = vmatprep.mubr.msk.f32.mxu1 %vm6207_vm1, %v6206_v9 }
0x1ee3   :  { %v6999_v0 = vpop.f32.mrb[54].mxu0 }
0x1ee4   :  { %v5863_v4 = vpop.f32.mrb[55].mxu0 }
0x1ee7   :  { %v7001_v6 = vpop.f32.mrb[62].mxu1  ;;  %v4281_v44 = vpop.f32.mrb[56].mxu0 }
0x1ee8   :  { %v5990_v52 = vpack.i.bf16 %v7001_v6, %v6999_v0  ;;  %v5868_v8 = vpop.f32.mrb[63].mxu1  ;;  %v5873_v10 = vpop.f32.mrb[57].mxu0  ;;  %v4363_v12 = vsel %vm225_vm2, %v4281_v44, -inf }
0x1ee9   :  { %4364 = vmax.xlane.f32.xlu0 %v4363_v12  ;;  %v6030_v12 = vld [vmem:[%s7191_s17 + $0x8] sm:$0xff]  }
0x1eeb   :  { %v4359_v13 = vpop.f32.mrb[64].mxu1 }
0x1eec   :  { %v5878_v14 = vpop.f32.mrb[65].mxu1  ;;  %v4366_v34 = vsel %vm225_vm2, %v4359_v13, -inf }
0x1eed   :  { %4367 = vmax.xlane.f32.xlu1 %v4366_v34 }
0x1efe   :  { %4461 = vrot.lane.b32.xlu1 %v6900_v45, %s6212_s0 }
0x1eff   :  { %4385 = vrot.lane.b32.xlu0 %v6898_v42, %s6212_s0 }
0x1f02   :  { %4539 = vrot.lane.b32.xlu1 %v6898_v42, %s6213_s4 }
0x1f06   :  { %4617 = vrot.lane.b32.xlu1 %v6900_v45, %s6213_s4 }
0x1f0a   :  { %4615 = vrot.lane.b32.xlu1 %v6918_v60, %s6213_s4 }
0x1f76   :  { %v4365_v22 = vpop.xlane.xlu0 %4364 }
0x1f77   :  { %v4369_v15 = vsub.f32 %v4281_v44, %v4365_v22 }
0x1f79   :  { %v4371_v18 = vmul.f32 1.442695, %v4369_v15 }
0x1f7a   :  { %v4368_v21 = vpop.xlane.xlu1 %4367  ;;  %v4386_v23 = vpop.permute.xlu0 %4385 }
0x1f7b   :  { %6143 = vpow2.f32 %v4371_v18  ;;  %v4370_v24 = vsub.f32 %v4359_v13, %v4368_v21  ;;  %5880 = vmatpush3.msra.mxu0 %v4386_v23 }
0x1f7c   :  { %5889 = vmatprep.subr.mxu0 %v6206_v9 }
0x1f7d   :  { %v4373_v25 = vmul.f32 1.442695, %v4370_v24 }
0x1f7e   :  { %v4462_v26 = vpop.permute.xlu1 %4461 }
0x1f7f   :  { %6145 = vpow2.f32 %v4373_v25  ;;  %5885 = vmatpush3.msra.mxu1 %v4462_v26 }
0x1f80   :  { %5894 = vmatprep.subr.mxu1 %v6206_v9 }
0x1f82   :  { %v4540_v2 = vpop.permute.xlu1 %4539 }
0x1f85   :  { %v6144_v30 = vpop.eup %6143 }
0x1f86   :  { %v4375_v39 = vsel %vm225_vm2, %v6144_v30, 0.0  ;;  %v4618_v27 = vpop.permute.xlu1 %4617 }
0x1f87   :  { %4376 = vadd.xlane.f32.xlu0 %v4375_v39 }
0x1f89   :  { %v6146_v60 = vpop.eup %6145 }
0x1f8a   :  { %v4378_v36 = vsel %vm225_vm2, %v6146_v60, 0.0  ;;  %v4616_v3 = vpop.permute.xlu1 %4615 }
0x1f8b   :  { %4379 = vadd.xlane.f32.xlu0 %v4378_v36 }
0x1fa1   :  { %4537 = vrot.lane.b32.xlu0 %v6912_v58, %s6213_s4 }
0x2014   :  { %v4377_v32 = vpop.xlane.xlu0 %4376 }
0x2015   :  { %6147 = vrcp.f32 %v4377_v32 }
0x2018   :  { %v4380_v41 = vpop.xlane.xlu0 %4379 }
0x2019   :  { %6149 = vrcp.f32 %v4380_v41 }
0x201c   :  { %v4538_v58 = vpop.permute.xlu0 %4537 }
0x201f   :  { %v6148_v29 = vpop.eup %6147 }
0x2020   :  { %v4383_v40 = vmul.f32 %v6148_v29, %v6144_v30 }
0x2022   :  { %5882 = vmatmul.mubr.msk.f32.vlgmr.msra.gmra.mrb[58].mxu0 %vm225_vm2, %v4383_v40 }
0x2023   :  { %v6150_v43 = vpop.eup %6149  ;;  %5890 = vmatpush3.xpose.msk.msra.mxu0 %vm225_vm2, %v4540_v2  ;;  %5891 = vmatprep.mubr.msk.f32.mxu0 %vm6207_vm1, %v6206_v9 }
0x2024   :  { %v4384_v38 = vmul.f32 %v6150_v43, %v6146_v60  ;;  %5899 = vmatprep.subr.mxu0 %v6206_v9 }
0x2026   :  { %5887 = vmatmul.mubr.msk.f32.vlgmr.msra.gmra.mrb[66].mxu1 %vm225_vm2, %v4384_v38  ;;  %5892 = vmatmul.mubr.msk.f32.vlgmr.msra.gmra.mrb[60].mxu0 %vm225_vm2, %v4538_v58 }
0x2027   :  { %5895 = vmatpush3.xpose.msk.msra.mxu1 %vm225_vm2, %v4618_v27  ;;  %5896 = vmatprep.mubr.msk.f32.mxu1 %vm6207_vm1, %v6206_v9 }
0x2028   :  { %5904 = vmatprep.subr.mxu1 %v6206_v9  ;;  %5901 = vmatprep.mubr.msk.f32.mxu0 %vm6207_vm1, %v6206_v9 }
0x202a   :  { %5897 = vmatmul.mubr.msk.f32.vlgmr.msra.gmra.mrb[68].mxu1 %vm225_vm2, %v4616_v3 }
0x202b   :  { %5906 = vmatprep.mubr.msk.f32.mxu1 %vm6207_vm1, %v6206_v9 }
0x20f5   :  { %v4457_v46 = vpop.f32.mrb[58].mxu0 }
0x20f6   :  { %v5883_v47 = vpop.f32.mrb[59].mxu0 }
0x20f9   :  { %v4533_v48 = vpop.f32.mrb[66].mxu1  ;;  %v4611_v49 = vpop.f32.mrb[60].mxu0 }
0x20fa   :  { %v5995_v51 = vpack.i.bf16 %v4533_v48, %v4457_v46  ;;  %v5888_v54 = vpop.f32.mrb[67].mxu1  ;;  %v5893_v35 = vpop.f32.mrb[61].mxu0  ;;  %v4693_v7 = vsel %vm225_vm2, %v4611_v49, -inf }
0x20fb   :  { %4694 = vmax.xlane.f32.xlu0 %v4693_v7 }
0x20fd   :  { %v4689_v56 = vpop.f32.mrb[68].mxu1 }
0x20fe   :  { %v5898_v50 = vpop.f32.mrb[69].mxu1  ;;  %v4696_v53 = vsel %vm225_vm2, %v4689_v56, -inf }
0x20ff   :  { %4697 = vmax.xlane.f32.xlu1 %v4696_v53  ;;  %v4986_v53 = vsub.s32 5, %v6367_v19 }
0x2110   :  { %4791 = vrot.lane.b32.xlu1 %v6900_v45, %s6214_s7 }
0x2114   :  { %5991 = vrot.lane.b32.xlu1 %v5990_v52, %s6215_s8 }
0x2118   :  { %5996 = vrot.lane.b32.xlu1 %v5995_v51, %s6216_s23 }
0x2188   :  { %v4695_v55 = vpop.xlane.xlu0 %4694 }
0x2189   :  { %v4699_v57 = vsub.f32 %v4611_v49, %v4695_v55 }
0x218b   :  { %v4701_v59 = vmul.f32 1.442695, %v4699_v57 }
0x218c   :  { %v4698_v28 = vpop.xlane.xlu1 %4697 }
0x218d   :  { %6151 = vpow2.f32 %v4701_v59  ;;  %v4700_v61 = vsub.f32 %v4689_v56, %v4698_v28  ;;  %v4987_v59 = vrot.slane %v6872_v16, %v4986_v53  ;;  %v5164_v53 = vsub.s32 6, %v6367_v19 }
0x218f   :  { %v4703_v62 = vmul.f32 1.442695, %v4700_v61 }
0x2190   :  { %v4792_v31 = vpop.permute.xlu1 %4791 }
0x2191   :  { %6153 = vpow2.f32 %v4703_v62  ;;  %5905 = vmatpush3.msra.mxu1 %v4792_v31 }
0x2192   :  { %5917 = vmatprep.subr.bf16.mxu1 %v6206_v9 }
0x2194   :  { %v5992_v18 = vpop.permute.xlu1 %5991 }
0x2195   :  { %v5994_v23 = vunpack.i.h.bf16 %v5992_v18  ;;  %v5993_v24 = vunpack.i.l.bf16 %v5992_v18 }
0x2197   :  { %v6152_v45 = vpop.eup %6151  ;;  %v4892_v39 = vsel %vm225_vm2, %v6963_v1, %v5994_v23  ;;  %v4891_v60 = vsel %vm225_vm2, %v6961_v11, %v5993_v24 }
0x2198   :  { %v4705_v33 = vsel %vm225_vm2, %v6152_v45, 0.0  ;;  %v5997_v21 = vpop.permute.xlu1 %5996 }
0x2199   :  { %4706 = vadd.xlane.f32.xlu0 %v4705_v33  ;;  %v5999_v25 = vunpack.i.h.bf16 %v5997_v21  ;;  %v5998_v26 = vunpack.i.l.bf16 %v5997_v21  ;;  %v6033_v33 = vld [vmem:[%s7193_s19] sm:$0xff]  }
0x219b   :  { %v6154_v5 = vpop.eup %6153  ;;  %v4894_v41 = vsel %vm1568_vm3, %v4892_v39, %v5999_v25  ;;  %v4893_v2 = vsel %vm1568_vm3, %v4891_v60, %v5998_v26 }
0x219c   :  { %v4708_v63 = vsel %vm225_vm2, %v6154_v5, 0.0 }
0x219d   :  { %4709 = vadd.xlane.f32.xlu0 %v4708_v63  ;;  %v6035_v63 = vld [vmem:[%s7193_s19 + $0x10] sm:$0xff]  }
0x21b3   :  { %4715 = vrot.lane.b32.xlu0 %v6898_v42, %s6214_s7  ;;  %v6029_v42 = vld [vmem:[%s7191_s17] sm:$0xff]  }
0x2226   :  { %v4707_v0 = vpop.xlane.xlu0 %4706 }
0x2227   :  { %6155 = vrcp.f32 %v4707_v0  ;;  %v6036_v0 = vld [vmem:[%s7193_s19 + $0x18] sm:$0xff]  }
0x222a   :  { %v4710_v4 = vpop.xlane.xlu0 %4709 }
0x222b   :  { %6157 = vrcp.f32 %v4710_v4 }
0x222e   :  { %v4716_v6 = vpop.permute.xlu0 %4715 }
0x222f   :  { %5900 = vmatpush3.msra.mxu0 %v4716_v6 }
0x2230   :  { %5909 = vmatprep.subr.bf16.mxu0 %v6206_v9 }
0x2231   :  { %v6156_v44 = vpop.eup %6155 }
0x2232   :  { %v4713_v52 = vmul.f32 %v6156_v44, %v6152_v45 }
0x2234   :  { %5902 = vmatmul.mubr.msk.f32.vlgmr.msra.gmra.mrb[62].mxu0 %vm225_vm2, %v4713_v52 }
0x2235   :  { %v6158_v8 = vpop.eup %6157  ;;  %5913 = vmatprep.mubr.msk.bf16.mxu0 %vm6207_vm1, %v6206_v9  ;;  %5910 = vmatpush3.bf16.msra.mxu0 %v6029_v42 }
0x2236   :  { %v4714_v10 = vmul.f32 %v6158_v8, %v6154_v5  ;;  %5911 = vmatprep.subr.bf16.mxu0 %v6206_v9  ;;  %v6034_v5 = vld [vmem:[%s7193_s19 + $0x8] sm:$0xff]  }
0x2238   :  { %5907 = vmatmul.mubr.msk.f32.vlgmr.msra.gmra.mrb[70].mxu1 %vm225_vm2, %v4714_v10 }
0x2239   :  { %5921 = vmatprep.mubr.msk.bf16.mxu1 %vm6207_vm1, %v6206_v9  ;;  %5912 = vmatpush3.bf16.msra.mxu0 %v6030_v12 }
0x223a   :  { %5925 = vmatprep.subr.bf16.mxu0 %v6206_v9 }
0x2307   :  { %v4787_v13 = vpop.f32.mrb[62].mxu0 }
0x2308   :  { %v5903_v14 = vpop.f32.mrb[63].mxu0 }
0x230b   :  { %v4863_v34 = vpop.f32.mrb[70].mxu1 }
0x230c   :  { %v6000_v22 = vpack.i.bf16 %v4863_v34, %v4787_v13  ;;  %v5908_v15 = vpop.f32.mrb[71].mxu1 }
0x230e   :  { %6001 = vrot.lane.b32.xlu0 %v6000_v22, %s6217_s28 }
0x2380   :  { %v6002_v30 = vpop.permute.xlu0 %6001 }
0x2381   :  { %v6004_v36 = vunpack.i.h.bf16 %v6002_v30  ;;  %v6003_v32 = vunpack.i.l.bf16 %v6002_v30 }
0x2383   :  { %v4896_v29 = vsel %vm1571_vm4, %v4894_v41, %v6004_v36  ;;  %v4895_v40 = vsel %vm1571_vm4, %v4893_v2, %v6003_v32 }
0x2384   :  { %v4897_v43 = vpack.c.bf16 %v4896_v29, %v4895_v40 }
0x2386   :  { %5914 = vmatmul.mubr.msk.bf16.vlgmr.msra.gmra.mrb[64].mxu0 %vm93_vm0, %v4897_v43 }
0x2387   :  { %5933 = vmatprep.mubr.msk.bf16.mxu0 %vm6207_vm1, %v6206_v9  ;;  %5926 = vmatpush3.bf16.msra.mxu0 %v6033_v33 }
0x2388   :  { %5927 = vmatprep.subr.bf16.mxu0 %v6206_v9 }
0x238b   :  { %5928 = vmatpush3.bf16.msra.mxu0 %v6034_v5 }
0x238c   :  { %5929 = vmatprep.subr.bf16.mxu0 %v6206_v9 }
0x238f   :  { %5930 = vmatpush3.bf16.msra.mxu0 %v6035_v63 }
0x2390   :  { %5931 = vmatprep.subr.bf16.mxu0 %v6206_v9 }
0x2393   :  { %5932 = vmatpush3.bf16.msra.mxu0 %v6036_v0 }
0x2459   :  { %v4947_v1 = vpop.f32.mrb[64].mxu0 }
0x245a   :  { %v7081_v27 = vadd.f32 %v4947_v1, %v6879_v37  ;;  %v5915_v11 = vpop.f32.mrb[65].mxu0  ;;  %v6031_v37 = vld [vmem:[%s7192_s18] sm:$0xff]  }
0x245b   :  { %v4950_v38 = vpop.f32.mrb[66].mxu0  ;;  %5918 = vmatpush3.bf16.msra.mxu1 %v6031_v37  ;;  %v6037_v37 = vld [vmem:[%s7194_s20] sm:$0xff]  }
0x245c   :  { %v7084_v58 = vadd.f32 %v4950_v38, %v6882_v20  ;;  %v5916_v3 = vpop.f32.mrb[67].mxu0  ;;  %v4968_v46 = vmul.f32 %v7081_v27, %v7081_v27  ;;  %v6032_v20 = vld [vmem:[%s7192_s18 + $0x8] sm:$0xff]   ;;  %5919 = vmatprep.subr.bf16.mxu1 %v6206_v9 }
0x245e   :  { %v4970_v47 = vsel %vm93_vm0, %v4968_v46, 0.0  ;;  %v4969_v48 = vmul.f32 %v7084_v58, %v7084_v58 }
0x245f   :  { %4971 = vadd.xlane.f32.xlu1 %v4970_v47  ;;  %5920 = vmatpush3.bf16.msra.mxu1 %v6032_v20  ;;  %v6219_v20 = vmov 0  }
0x2460   :  { %v4973_v49 = vsel %vm93_vm0, %v4969_v48, 0.0  ;;  %5937 = vmatprep.subr.bf16.mxu1 %v6206_v9  ;;  %6005 = vset.pattern.permute.xlu1 %v6219_v20 }
0x2461   :  { %4974 = vadd.xlane.f32.xlu0 %v4973_v49 }
0x2462   :  { %6006 = vset.pattern.permute.xlu0 %v6219_v20 }
0x24ec   :  { %v4972_v51 = vpop.xlane.xlu1 %4971 }
0x24ed   :  { %v4976_v54 = vmul.f32 0.03125, %v4972_v51 }
0x24ee   :  { %v4975_v35 = vpop.xlane.xlu0 %4974 }
0x24ef   :  { %v4978_v7 = vadd.f32 1e-06, %v4976_v54  ;;  %v4977_v56 = vmul.f32 0.03125, %v4975_v35 }
0x24f1   :  { %6159 = vrsqrt.f32 %v4978_v7  ;;  %v4979_v50 = vadd.f32 1e-06, %v4977_v56 }
0x24f3   :  { %6161 = vrsqrt.f32 %v4979_v50 }
0x24fb   :  { %v6160_v55 = vpop.eup %6159 }
0x24fc   :  { %v4982_v57 = vmul.f32 %v6160_v55, %v7081_v27 }
0x24fd   :  { %v6162_v28 = vpop.eup %6161 }
0x24fe   :  { %v4983_v61 = vmul.f32 %v6162_v28, %v7084_v58  ;;  %v4988_v62 = vmul.f32 %v4987_v59, %v4982_v57  ;;  %v5165_v57 = vrot.slane %v6872_v16, %v5164_v53  ;;  %v5230_v16 = vld [vmem:[%s7210_s25 + $0x8] sm:$0xff] }
0x2500   :  { %v4989_v31 = vmul.f32 %v4987_v59, %v4983_v61 }
0x2502   :  { %v4990_v45 = vpack.c.bf16 %v4989_v31, %v4988_v62 }
0x2504   :  { %5922 = vmatmul.mubr.msk.bf16.vlgmr.msra.gmra.mrb[72].mxu1 %vm93_vm0, %v4990_v45 }
0x2505   :  { %5941 = vmatprep.mubr.msk.bf16.mxu1 %vm6207_vm1, %v6206_v9  ;;  %5938 = vmatpush3.bf16.msra.mxu1 %v6037_v37 }
0x2506   :  { %5939 = vmatprep.subr.bf16.mxu1 %v6206_v9 }
0x25d7   :  { %v5040_v4 = vpop.f32.mrb[72].mxu1 }
0x25d8   :  { %5067 = vrot.lane.b32.xlu0 %v5040_v4, %s6218_s5  ;;  %v5923_v6 = vpop.f32.mrb[73].mxu1  ;;  %v5049_v8 = vmul.f32 0.044715, %v5040_v4  ;;  %v5047_v26 = vmul.f32 0.5, %v5040_v4 }
0x25d9   :  { %v5043_v44 = vpop.f32.mrb[74].mxu1 }
0x25da   :  { %5069 = vrot.lane.b32.xlu1 %v5043_v44, %s6218_s5  ;;  %v5924_v52 = vpop.f32.mrb[75].mxu1  ;;  %v5050_v10 = vmul.f32 0.044715, %v5043_v44  ;;  %v5051_v42 = vmul.f32 %v5049_v8, %v5040_v4  ;;  %v5048_v30 = vmul.f32 0.5, %v5043_v44 }
0x25dc   :  { %v5052_v12 = vmul.f32 %v5050_v10, %v5043_v44  ;;  %v5053_v13 = vmul.f32 %v5051_v42, %v5040_v4  ;;  %v5258_v42 = vand.u32 127, %v109_v17  ;;  %v5231_v17 = vld [vmem:[%s7211_s13] sm:$0xff] }
0x25de   :  { %v5054_v14 = vmul.f32 %v5052_v12, %v5043_v44  ;;  %v5055_v34 = vadd.f32 %v5053_v13, %v5040_v4 }
0x25e0   :  { %v5056_v22 = vadd.f32 %v5054_v14, %v5043_v44  ;;  %v5057_v15 = vmul.f32 0.7978846, %v5055_v34 }
0x25e2   :  { %v5058_v18 = vmul.f32 0.7978846, %v5056_v22  ;;  %6163 = vtanh.f32 %v5057_v15 }
0x25e4   :  { %6165 = vtanh.f32 %v5058_v18 }
0x25ec   :  { %v6164_v21 = vpop.eup %6163 }
0x25ed   :  { %v5061_v24 = vadd.f32 1.0, %v6164_v21 }
0x25ee   :  { %v6166_v23 = vpop.eup %6165 }
0x25ef   :  { %v5062_v25 = vadd.f32 1.0, %v6166_v23  ;;  %v5063_v60 = vmul.f32 %v5061_v24, %v5047_v26  ;;  %v5289_v26 = vsel %vm5279_vm8, %v5231_v17, 0.0 }
0x25f1   :  { %v5064_v36 = vmul.f32 %v5062_v25, %v5048_v30  ;;  %v5232_v25 = vld [vmem:[%s7211_s13 + $0x8] sm:$0xff] }
0x25f2   :  { %v5290_v30 = vsel %vm5279_vm8, %v5232_v25, 0.0 }
0x264a   :  { %v5068_v39 = vpop.permute.xlu0 %5067 }
0x264b   :  { %v5073_v41 = vmul.f32 %v5068_v39, %v5063_v60  ;;  %v5291_v39 = vadd.f32 %v5290_v30, %v5289_v26 }
0x264c   :  { %v5070_v32 = vpop.permute.xlu1 %5069 }
0x264d   :  { %v5074_v2 = vmul.f32 %v5070_v32, %v5064_v36  ;;  %v5292_v60 = vrot.slane %v5291_v39, 4 }
0x264f   :  { %v5075_v29 = vpack.c.bf16 %v5074_v2, %v5073_v41  ;;  %v5293_v32 = vadd.f32 %v5292_v60, %v5291_v39 }
0x2651   :  { %5934 = vmatmul.mubr.msk.bf16.vlgmr.msra.gmra.mrb[68].mxu0 %vm1777_vm5, %v5075_v29  ;;  %v5294_v2 = vrot.slane %v5293_v32, 2 }
0x2653   :  { %v5295_v29 = vadd.f32 %v5294_v2, %v5293_v32 }
0x2724   :  { %v5137_v40 = vpop.f32.mrb[68].mxu0 }
0x2725   :  { %v5144_v43 = vadd.f32 %v5137_v40, %v7081_v27  ;;  %v5935_v1 = vpop.f32.mrb[69].mxu0  ;;  %v6038_v27 = vld [vmem:[%s7194_s20 + $0x8] sm:$0xff]  }
0x2726   :  { %v5140_v11 = vpop.f32.mrb[70].mxu0  ;;  %5940 = vmatpush3.bf16.msra.mxu1 %v6038_v27 }
0x2727   :  { %v5146_v38 = vmul.f32 %v5144_v43, %v5144_v43  ;;  %v5145_v3 = vadd.f32 %v5140_v11, %v7084_v58  ;;  %v5936_v46 = vpop.f32.mrb[71].mxu0  ;;  %v5229_v58 = vld [vmem:[%s7210_s25] sm:$0xff] }
0x2729   :  { %v5147_v47 = vmul.f32 %v5145_v3, %v5145_v3  ;;  %v5148_v48 = vsel %vm93_vm0, %v5146_v38, 0.0  ;;  %v5296_v38 = vrot.slane %v5295_v29, 1 }
0x272a   :  { %5149 = vadd.xlane.f32.xlu1 %v5148_v48 }
0x272b   :  { %v5151_v49 = vsel %vm93_vm0, %v5147_v47, 0.0  ;;  %v5297_v48 = vadd.f32 %v5296_v38, %v5295_v29 }
0x272c   :  { %5152 = vadd.xlane.f32.xlu0 %v5151_v49 }
0x272d   :  { %v5298_v20 = vmax.f32 %v5297_v48, 1.0 }
0x273b   :  { %5260 = vperm.xlu1 %6005, %v5229_v58  }
0x27b7   :  { %v5150_v51 = vpop.xlane.xlu1 %5149 }
0x27b8   :  { %v5154_v54 = vmul.f32 0.03125, %v5150_v51 }
0x27b9   :  { %v5153_v35 = vpop.xlane.xlu0 %5152 }
0x27ba   :  { %v5156_v7 = vadd.f32 1e-06, %v5154_v54  ;;  %v5155_v56 = vmul.f32 0.03125, %v5153_v35 }
0x27bb   :  { %v5261_v12 = vpop.permute.xlu1 %5260 }
0x27bc   :  { %6167 = vrsqrt.f32 %v5156_v7  ;;  %v5157_v50 = vadd.f32 1e-06, %v5155_v56  ;;  %vm5265_vm6 = vcmp.eq.s32.totalorder %v5258_v42, %v5261_v12 }
0x27be   :  { %6169 = vrsqrt.f32 %v5157_v50 }
0x27c6   :  { %v6168_v9 = vpop.eup %6167 }
0x27c7   :  { %v5160_v55 = vmul.f32 %v6168_v9, %v5144_v43 }
0x27c8   :  { %v6170_v59 = vpop.eup %6169 }
0x27c9   :  { %v5161_v28 = vmul.f32 %v6170_v59, %v5145_v3  ;;  %v5166_v61 = vmul.f32 %v5165_v57, %v5160_v55 }
0x27cb   :  { %v5167_v62 = vmul.f32 %v5165_v57, %v5161_v28 }
0x27cd   :  { %v5168_v31 = vpack.c.bf16 %v5167_v62, %v5166_v61 }
0x27cf   :  { %5942 = vmatmul.mubr.msk.bf16.vlgmr.msra.gmra.mrb[76].mxu1 %vm93_vm0, %v5168_v31 }
0x28a2   :  { %v5222_v45 = vpop.f32.mrb[76].mxu1 }
0x28a3   :  { %v5943_v33 = vpop.f32.mrb[77].mxu1  ;;  %v5233_v5 = vsel %vm1777_vm5, %v5222_v45, -inf  ;;  %v5267_v22 = vsel %vm5265_vm6, %v5222_v45, 0.0 }
0x28a4   :  { %5234 = vmax.xlane.f32.xlu0 %v5233_v5  ;;  %v5225_v63 = vpop.f32.mrb[78].mxu1  ;;  %v5269_v18 = vsel %vm1777_vm5, %v5267_v22, 0.0 }
0x28a5   :  { %v5944_v0 = vpop.f32.mrb[79].mxu1  ;;  %v5236_v19 = vsel %vm1777_vm5, %v5225_v63, -inf }
0x28a8   :  { %5237 = vmax.xlane.f32.xlu0 %v5236_v19 }
0x28be   :  { %5263 = vperm.xlu0 %6006, %v5230_v16  }
0x2931   :  { %v5235_v4 = vpop.xlane.xlu0 %5234 }
0x2932   :  { %v5239_v6 = vsub.f32 %v5222_v45, %v5235_v4 }
0x2934   :  { %v5241_v44 = vmul.f32 1.442695, %v5239_v6 }
0x2935   :  { %v5238_v52 = vpop.xlane.xlu0 %5237 }
0x2936   :  { %6171 = vpow2.f32 %v5241_v44  ;;  %v5240_v8 = vsub.f32 %v5225_v63, %v5238_v52 }
0x2938   :  { %v5243_v10 = vmul.f32 1.442695, %v5240_v8 }
0x293a   :  { %6173 = vpow2.f32 %v5243_v10 }
0x293d   :  { %v5264_v14 = vpop.permute.xlu0 %5263 }
0x293e   :  { %vm5266_vm7 = vcmp.eq.s32.totalorder %v5258_v42, %v5264_v14 }
0x293f   :  { %v5268_v23 = vsel %vm5266_vm7, %v5225_v63, 0.0 }
0x2940   :  { %v6172_v13 = vpop.eup %6171  ;;  %v5272_v24 = vsel %vm1777_vm5, %v5268_v23, 0.0 }
0x2941   :  { %v5245_v34 = vsel %vm1777_vm5, %v6172_v13, 0.0 }
0x2942   :  { %5246 = vadd.xlane.f32.xlu1 %v5245_v34 }
0x2944   :  { %v6174_v15 = vpop.eup %6173 }
0x2945   :  { %v5248_v21 = vsel %vm1777_vm5, %v6174_v15, 0.0 }
0x2946   :  { %5270 = vadd.xlane.f32.xlu1 %v5269_v18  ;;  %5249 = vadd.xlane.f32.xlu0 %v5248_v21 }
0x294a   :  { %5273 = vadd.xlane.f32.xlu1 %v5272_v24 }
0x29cf   :  { %v5247_v36 = vpop.xlane.xlu1 %5246 }
0x29d0   :  { %6175 = vlog2.f32 %v5247_v36 }
0x29d3   :  { %v5250_v41 = vpop.xlane.xlu0 %5249  ;;  %v5271_v1 = vpop.xlane.xlu1 %5270 }
0x29d4   :  { %6177 = vlog2.f32 %v5250_v41 }
0x29d5   :  { %6179 = vrcp.f32 %v5298_v20 }
0x29d7   :  { %v5274_v37 = vpop.xlane.xlu1 %5273 }
0x29da   :  { %v6176_v40 = vpop.eup %6175 }
0x29db   :  { %v5252_v43 = vmul.f32 0.6931472, %v6176_v40 }
0x29dd   :  { %v5255_v11 = vadd.f32 %v5252_v43, %v5235_v4 }
0x29de   :  { %v6178_v3 = vpop.eup %6177 }
0x29df   :  { %v5275_v46 = vsub.f32 %v5255_v11, %v5271_v1  ;;  %v5254_v47 = vmul.f32 0.6931472, %v6178_v3  ;;  %v6180_v57 = vpop.eup %6179 }
0x29e1   :  { %v5256_v49 = vadd.f32 %v5254_v47, %v5238_v52  ;;  %v5277_v27 = vmul.f32 %v5275_v46, %v5231_v17 }
0x29e3   :  { %v5276_v58 = vsub.f32 %v5256_v49, %v5274_v37  ;;  %v5280_v54 = vsel %vm5279_vm8, %v5277_v27, 0.0 }
0x29e5   :  { %v5278_v51 = vmul.f32 %v5276_v58, %v5232_v25 }
0x29e7   :  { %v5281_v35 = vsel %vm5279_vm8, %v5278_v51, 0.0 }
0x29e8   :  { %v5282_v7 = vadd.f32 %v5281_v35, %v5280_v54 }
0x29ea   :  { %v5283_v56 = vrot.slane %v5282_v7, 4 }
0x29ec   :  { %v5284_v50 = vadd.f32 %v5283_v56, %v5282_v7 }
0x29ee   :  { %v5285_v53 = vrot.slane %v5284_v50, 2 }
0x29f0   :  { %v5286_v9 = vadd.f32 %v5285_v53, %v5284_v50 }
0x29f2   :  { %v5287_v55 = vrot.slane %v5286_v9, 1 }
0x29f4   :  { %v5288_v59 = vadd.f32 %v5287_v55, %v5286_v9 }
0x29f6   :  { %v5300_v28 = vmul.f32 %v6180_v57, %v5288_v59 }
0x29f8   :  { %5302 = vst.msk [vmem:[#allocation2] sm:$0x1] %vm5301_vm9, %v5300_v28 }
0x29f9   :  { %6193 = shalt.err (!%p6190_p4)
}
0x29fa   :  { %s6194_s0 = scalar_lea.hbm %s7195_s21, 16 }
0x29fb   :  { %p6195_p5 = scmp.ne.s32.totalorder %s7195_s21, %s6194_s0  ;;  %p6198_p6 = scmp.lt.u32.totalorder %s6194_s0, %s7195_s21 }
0x29fd   :  { %p6200_p7 = pnand %p6198_p6, %p6195_p5 }
0x29ff   :  { %6203 = shalt.err (!%p6200_p7)
}
0x2a00   :  { %5312 = dma.vmem_to_hbm [thread:$0]  %s5310_s22, 16, %s7195_s21, [#allocation3]  }
0x2a01   :  { %6204 = dma.done.wait [#allocation3], 16  }
0x2a02   :  { %6205 = vsyncadd [#allocation3], 4294967280 }
0x2a03   :  { %5316 = vsyncpa [#allocation3], 1 }

</bundles_post_ra>
